<compile_context>
chip_gen: v6e
topology: v6e:2x2x1
jax: 0.10.0
libtpu: 0.0.40
codegen_flags: <defaults>
</compile_context>

<pallas_src>
import functools

import jax
import jax.numpy as jnp
from jax import lax
from jax.experimental import pallas as pl
from jax.experimental.pallas import tpu as pltpu

_MATMUL_DTYPE = jnp.bfloat16   # MXU operand dtype (accumulation stays f32)


# ---------------------------------------------------------------------------
# Fused kernel: per-block non-local attention -> reassemble -> 3x3 conv ->
#               BN (folded) -> gamma*ctx + x -> ReLU.   One batch / grid step.
# ---------------------------------------------------------------------------
def _agcb_nogca_kernel(xs_ref, wqkv_ref, bqkv_ref, wconv_ref, bconv_ref,
                       bn_scale_ref, bn_bias_ref, o_ref, ctx_ref, *,
                       scale, hs, ws, W, inter, gamma_nl, gamma, pad):
    HW, C = o_ref.shape
    cd = _MATMUL_DTYPE

    # -- Zero ONLY the conv halo rows (the HW interior is fully overwritten by
    #    the scatter below).  Re-done every grid step: VMEM scratch persists.
    ctx_ref[pl.ds(0, pad), :] = jnp.zeros((pad, C), jnp.float32)
    ctx_ref[pl.ds(pad + HW, pad), :] = jnp.zeros((pad, C), jnp.float32)

    # -- Fused q|k|v projection for the whole image (== per-block 1x1 convs).
    x = xs_ref[...]                                               # (HW, C) f32
    qkv = jnp.dot(x.astype(cd), wqkv_ref[...],
                  preferred_element_type=jnp.float32) + bqkv_ref[...]   # (HW, 2IC+C) f32

    # -- NonLocalBlock on every spatial block (shared weights), one block-row
    #    at a time so both horizontally adjacent blocks can be written back as
    #    coalesced full-width (W, C) row stores.
    # NOTE: unrolled Python loop is fine for scale**2 == 4 tiny blocks; switch
    #       to lax.fori_loop + pl.ds offsets if scale / block size grows.
    for gi in range(scale):
        row_out = []
        for gj in range(scale):
            # Gather this block's rows from spatial-order qkv: hs static,
            # sublane-aligned (ws, .) strips (ws % 8 == 0).
            strips = []
            for kr in range(hs):
                r0 = (gi * hs + kr) * W + gj * ws
                strips.append(qkv[r0:r0 + ws, :])
            blk = jnp.concatenate(strips, axis=0)                 # (N, 2IC+C) f32
            q = blk[:, 0:inter].astype(cd)                        # (N, IC)
            k = blk[:, inter:2 * inter].astype(cd)                # (N, IC)
            v = blk[:, 2 * inter:].astype(cd)                     # (N, C)
            # energy[i, j] = <q_i, k_j>  (contract IC directly; no transpose)
            energy = lax.dot_general(q, k, (((1,), (1,)), ((), ())),
                                     preferred_element_type=jnp.float32)
            m = jnp.max(energy, axis=-1, keepdims=True)
            p = jnp.exp(energy - m)
            denom = jnp.sum(p, axis=-1, keepdims=True)
            attn = p * pl.reciprocal(denom, approx=True)          # softmax(dim=-1)
            row_out.append(jnp.dot(attn.astype(cd), v,
                                   preferred_element_type=jnp.float32))  # (N, C)

        # Coalesced scatter: one full-width (W, C) store per spatial row,
        # fused with the non-local residual  gamma_nl * out + x.
        for kr in range(hs):
            r0 = (gi * hs + kr) * W
            row = jnp.concatenate(
                [row_out[gj][kr * ws:(kr + 1) * ws, :] for gj in range(scale)],
                axis=0)                                           # (W, C)
            ctx_ref[pl.ds(pad + r0, W), :] = gamma_nl * row + x[r0:r0 + W, :]

    # -- 3x3 conv: one ALIGNED (HW, C) load per dy; the dx = +-1 taps come from
    #    XLU sublane rotations of that load (the rows that wrap around are
    #    exactly the masked image-edge rows).  Wrap masks hoisted, in-kernel iota.
    flat = lax.broadcasted_iota(jnp.int32, (HW, C), 0)            # flat spatial index
    if W & (W - 1) == 0:
        col = jnp.bitwise_and(flat, W - 1)
    else:
        col = flat - W * ((flat.astype(jnp.float32) + 0.5) * (1.0 / W)).astype(jnp.int32)
    not_left_edge = col >= 1                                      # valid for dx = -1
    not_right_edge = col <= W - 2                                 # valid for dx = +1

    acc = jnp.zeros((HW, C), jnp.float32)
    tap = 0
    for dy in (-1, 0, 1):
        base = ctx_ref[pl.ds(pad + dy * W, HW), :]                # aligned (pad, W % 8 == 0)
        # roll(+1):    win[i] = base[i-1]  -> pixel to the LEFT   (dx = -1)
        # roll(HW-1):  win[i] = base[i+1]  -> pixel to the RIGHT  (dx = +1)
        left = jnp.where(not_left_edge, pltpu.roll(base, 1, 0), 0.0)
        right = jnp.where(not_right_edge, pltpu.roll(base, HW - 1, 0), 0.0)
        for win in (left, base, right):                           # dx = -1, 0, +1
            acc = acc + jnp.dot(win.astype(cd), wconv_ref[tap],
                                preferred_element_type=jnp.float32)
            tap += 1

    y = acc + bconv_ref[...]                        # conv bias
    y = y * bn_scale_ref[...] + bn_bias_ref[...]    # folded BatchNorm (inference)
    o_ref[...] = jnp.maximum(gamma * y + x, 0.0).astype(o_ref.dtype)


# ---------------------------------------------------------------------------
# Wrapper (NCHW in / NCHW out, like the PyTorch module)
# ---------------------------------------------------------------------------
def agcb_nogca_forward(x_nchw, params, *, scale=2):
    B, C, H, W = x_nchw.shape
    # Uniform blocks only (matches the module when H, W divide evenly).
    assert H % scale == 0 and W % scale == 0
    hs, ws = H // scale, W // scale
    assert W % 8 == 0 and ws % 8 == 0, "rows / block strips must stay sublane-aligned"
    HW = H * W
    qkvc = params['wqkv'].shape[1]
    inter = (qkvc - C) // 2

    # Single NCHW -> (HW, C) layout; no duplicate block-major copy of x.
    xs = jnp.transpose(x_nchw, (0, 2, 3, 1)).astype(jnp.float32).reshape(B, HW, C)

    pad = max(((W + 7) // 8) * 8, 8)          # conv halo rows (>= W, 8-row aligned)

    kern = functools.partial(
        _agcb_nogca_kernel, scale=scale, hs=hs, ws=ws, W=W, inter=inter,
        gamma_nl=float(params['gamma_nl']), gamma=float(params['gamma']), pad=pad)

    out = pl.pallas_call(
        kern,
        out_shape=jax.ShapeDtypeStruct((B, HW, C), jnp.float32),
        grid=(B,),
        in_specs=[
            pl.BlockSpec((None, HW, C), lambda b: (b, 0, 0)),      # x (spatial layout)
            pl.BlockSpec((C, qkvc), lambda b: (0, 0)),             # fused Wq|Wk|Wv
            pl.BlockSpec((1, qkvc), lambda b: (0, 0)),             # fused bq|bk|bv
            pl.BlockSpec((9, C, C), lambda b: (0, 0, 0)),          # conv taps [cin,cout]
            pl.BlockSpec((1, C), lambda b: (0, 0)),                # conv bias
            pl.BlockSpec((1, C), lambda b: (0, 0)),                # bn scale (folded)
            pl.BlockSpec((1, C), lambda b: (0, 0)),                # bn bias  (folded)
        ],
        out_specs=pl.BlockSpec((None, HW, C), lambda b: (b, 0, 0)),
        scratch_shapes=[pltpu.VMEM((HW + 2 * pad, C), jnp.float32)],
        compiler_params=pltpu.CompilerParams(
            dimension_semantics=("parallel",),
            vmem_limit_bytes=32 * 1024 * 1024),
    )(xs, params['wqkv'], params['bqkv'], params['wconv'], params['bconv'],
      params['bn_scale'], params['bn_bias'])

    return jnp.transpose(out.reshape(B, H, W, C), (0, 3, 1, 2))   # back to NCHW


# ---------------------------------------------------------------------------
# Pure-JAX f32 reference (exact module semantics, for correctness checking)
# ---------------------------------------------------------------------------
def agcb_nogca_reference(x_nchw, params, *, scale=2):
    B, C, H, W = x_nchw.shape
    hs, ws = H // scale, W // scale
    hp = jax.lax.Precision.HIGHEST
    x = jnp.transpose(x_nchw, (0, 2, 3, 1)).astype(jnp.float32)          # NHWC
    wqkv = params['wqkv'].astype(jnp.float32)
    qkvc = wqkv.shape[1]
    inter = (qkvc - C) // 2
    qkv = jnp.einsum('bhwc,cd->bhwd', x, wqkv, precision=hp) + params['bqkv'][0]

    ctx = jnp.zeros_like(x)
    for gi in range(scale):
        for gj in range(scale):
            ys, xs_ = gi * hs, gj * ws
            blk = qkv[:, ys:ys + hs, xs_:xs_ + ws, :].reshape(B, hs * ws, qkvc)
            q, k, v = blk[..., :inter], blk[..., inter:2 * inter], blk[..., 2 * inter:]
            attn = jax.nn.softmax(
                jnp.einsum('bnd,bmd->bnm', q, k, precision=hp), axis=-1)
            out = jnp.einsum('bnm,bmc->bnc', attn, v, precision=hp)
            out = out.reshape(B, hs, ws, C)
            ctx = ctx.at[:, ys:ys + hs, xs_:xs_ + ws, :].set(
                params['gamma_nl'] * out + x[:, ys:ys + hs, xs_:xs_ + ws, :])

    wconv = params['wconv'].astype(jnp.float32).reshape(3, 3, C, C)      # (ky,kx,ci,co)
    y = lax.conv_general_dilated(ctx, wconv, (1, 1), 'SAME',
                                 dimension_numbers=('NHWC', 'HWIO', 'NHWC'),
                                 precision=hp)
    y = y + params['bconv'][0]
    y = y * params['bn_scale'][0] + params['bn_bias'][0]
    out = jnp.maximum(params['gamma'] * y + x, 0.0)
    return jnp.transpose(out, (0, 3, 1, 2))


# ---------------------------------------------------------------------------
# Parameter construction (random, PyTorch-equivalent layout folded for TPU)
# ---------------------------------------------------------------------------
def init_params(key, planes, reduce_ratio_nl):
    inter = max(planes // reduce_ratio_nl, 1)
    ks = jax.random.split(key, 12)

    wq = 0.1 * jax.random.normal(ks[0], (planes, inter), jnp.float32)
    wk = 0.1 * jax.random.normal(ks[1], (planes, inter), jnp.float32)
    wv = 0.1 * jax.random.normal(ks[2], (planes, planes), jnp.float32)
    bq = 0.1 * jax.random.normal(ks[3], (1, inter), jnp.float32)
    bk = 0.1 * jax.random.normal(ks[4], (1, inter), jnp.float32)
    bv = 0.1 * jax.random.normal(ks[5], (1, planes), jnp.float32)
    wqkv = jnp.concatenate([wq, wk, wv], axis=1).astype(_MATMUL_DTYPE)   # (C, 2*IC+C)
    bqkv = jnp.concatenate([bq, bk, bv], axis=1)                         # f32

    # 3x3 conv weights, tap-major (dy, dx) with [cin, cout] per tap.
    conv_w = 0.05 * jax.random.normal(ks[6], (3, 3, planes, planes), jnp.float32)
    wconv = conv_w.reshape(9, planes, planes).astype(_MATMUL_DTYPE)
    bconv = 0.05 * jax.random.normal(ks[7], (1, planes), jnp.float32)

    # BatchNorm folded into scale/bias (inference mode).
    bn_w = 1.0 + 0.05 * jax.random.normal(ks[8], (planes,), jnp.float32)
    bn_b = 0.05 * jax.random.normal(ks[9], (planes,), jnp.float32)
    run_mean = 0.05 * jax.random.normal(ks[10], (planes,), jnp.float32)
    run_var = 1.0 + 0.1 * jnp.abs(jax.random.normal(ks[11], (planes,), jnp.float32))
    inv_std = bn_w / jnp.sqrt(run_var + 1e-5)
    bn_scale = inv_std.reshape(1, planes)
    bn_bias = (bn_b - run_mean * inv_std).reshape(1, planes)

    # NOTE: PyTorch initializes both gamma scalars to 0 (making the non-local
    # and conv branches numerically inert at init).  Nonzero values are used
    # here so every fused stage contributes to the test output.
    return dict(wqkv=wqkv, bqkv=bqkv, wconv=wconv, bconv=bconv,
                bn_scale=bn_scale, bn_bias=bn_bias,
                gamma_nl=0.5, gamma=0.25)


if __name__ == "__main__":
    key = jax.random.PRNGKey(0)
    kx, kp = jax.random.split(key)

    # Small shapes consistent with the module: planes=16, scale=2,
    # reduce_ratio_nl=4 (so inter_planes = 4 >= 1).
    B, C, H, W = 2, 16, 16, 16
    scale, reduce_ratio_nl = 2, 4

    x = jax.random.normal(kx, (B, C, H, W), jnp.float32)
    params = init_params(kp, C, reduce_ratio_nl)

    out = agcb_nogca_forward(x, params, scale=scale)
    out = jax.block_until_ready(out)
    assert out.shape == (B, C, H, W)
    assert bool(jnp.all(jnp.isfinite(out)))
    assert bool(jnp.all(out >= 0.0))                     # final ReLU

    # Correctness vs. pure-JAX f32 reference (tolerance covers the bf16 MXU
    # operands and the approximate softmax reciprocal used in the kernel).
    ref = agcb_nogca_reference(x, params, scale=scale)
    max_err = float(jnp.max(jnp.abs(out - ref)))
    assert max_err < 0.08, f"max |kernel - reference| = {max_err}"

    print("KERNEL_OK")
</pallas_src>

<mosaic_0001>
module attributes {stable_mosaic.version = 11 : i64} {
  func.func @_agcb_nogca_kernel(%arg0: i32, %arg1: memref<1x256x16xf32, #tpu.memory_space<vmem>>, %arg2: memref<16x24xbf16, #tpu.memory_space<vmem>>, %arg3: memref<1x24xf32, #tpu.memory_space<vmem>>, %arg4: memref<9x16x16xbf16, #tpu.memory_space<vmem>>, %arg5: memref<1x16xf32, #tpu.memory_space<vmem>>, %arg6: memref<1x16xf32, #tpu.memory_space<vmem>>, %arg7: memref<1x16xf32, #tpu.memory_space<vmem>>, %arg8: memref<1x256x16xf32, #tpu.memory_space<vmem>>, %arg9: memref<288x16xf32, #tpu.memory_space<vmem>>) attributes {dimension_semantics = [#tpu.dimension_semantics<parallel>], iteration_bounds = array<i64: 2>, scalar_prefetch = 0 : i64, scratch_operands = 1 : i64, tpu.core_type = #tpu.core_type<tc>, window_params = [{transform_indices = @transform_0, window_bounds = array<i64: 1, 256, 16>}, {pipeline_mode = #tpu.pipeline_mode<synchronous>, transform_indices = @transform_1, window_bounds = array<i64: 16, 24>}, {pipeline_mode = #tpu.pipeline_mode<synchronous>, transform_indices = @transform_2, window_bounds = array<i64: 1, 24>}, {pipeline_mode = #tpu.pipeline_mode<synchronous>, transform_indices = @transform_3, window_bounds = array<i64: 9, 16, 16>}, {pipeline_mode = #tpu.pipeline_mode<synchronous>, transform_indices = @transform_4, window_bounds = array<i64: 1, 16>}, {pipeline_mode = #tpu.pipeline_mode<synchronous>, transform_indices = @transform_5, window_bounds = array<i64: 1, 16>}, {pipeline_mode = #tpu.pipeline_mode<synchronous>, transform_indices = @transform_6, window_bounds = array<i64: 1, 16>}, {transform_indices = @transform_7, window_bounds = array<i64: 1, 256, 16>}]} {
    %cst = arith.constant 0.000000e+00 : f32
    %0 = vector.broadcast %cst : f32 to vector<16x16xf32>
    %c0 = arith.constant 0 : index
    %c0_0 = arith.constant 0 : index
    %1 = vector.load %arg9[%c0, %c0_0] : memref<288x16xf32, #tpu.memory_space<vmem>>, vector<16x16xf32>
    tpu.vector_store %arg9[%c0, %c0_0], %0 {strides = array<i32>} : memref<288x16xf32, #tpu.memory_space<vmem>>, vector<16x16xf32>,
    %cst_1 = arith.constant 0.000000e+00 : f32
    %2 = vector.broadcast %cst_1 : f32 to vector<16x16xf32>
    %c272 = arith.constant 272 : index
    %c0_2 = arith.constant 0 : index
    %3 = vector.load %arg9[%c272, %c0_2] : memref<288x16xf32, #tpu.memory_space<vmem>>, vector<16x16xf32>
    tpu.vector_store %arg9[%c272, %c0_2], %2 {strides = array<i32>} : memref<288x16xf32, #tpu.memory_space<vmem>>, vector<16x16xf32>,
    %c0_3 = arith.constant 0 : index
    %c0_4 = arith.constant 0 : index
    %c0_5 = arith.constant 0 : index
    %4 = vector.load %arg1[%c0_3, %c0_4, %c0_5] : memref<1x256x16xf32, #tpu.memory_space<vmem>>, vector<1x256x16xf32>
    %5 = vector.shape_cast %4 : vector<1x256x16xf32> to vector<256x16xf32>
    %6 = arith.truncf %5 : vector<256x16xf32> to vector<256x16xbf16>
    %c0_6 = arith.constant 0 : index
    %c0_7 = arith.constant 0 : index
    %7 = vector.load %arg2[%c0_6, %c0_7] : memref<16x24xbf16, #tpu.memory_space<vmem>>, vector<16x24xbf16>
    %cst_8 = arith.constant dense<0.000000e+00> : vector<256x24xf32>
    %8 = tpu.matmul %6, %7, %cst_8 {dimension_numbers = #tpu.dot_dimension_numbers<[1], [0], [0], [1], [0, 0, 1, 1], [], []>} : vector<256x16xbf16>, vector<16x24xbf16>, vector<256x24xf32> -> vector<256x24xf32>
    %c0_9 = arith.constant 0 : index
    %c0_10 = arith.constant 0 : index
    %9 = vector.load %arg3[%c0_9, %c0_10] : memref<1x24xf32, #tpu.memory_space<vmem>>, vector<1x24xf32>
    %10 = vector.broadcast %9 : vector<1x24xf32> to vector<256x24xf32>
    %11 = arith.addf %8, %10 : vector<256x24xf32>
    %12 = vector.extract_strided_slice %11 {offsets = [0, 0], sizes = [8, 24], strides = [1, 1]} : vector<256x24xf32> to vector<8x24xf32>
    %13 = vector.extract_strided_slice %11 {offsets = [16, 0], sizes = [8, 24], strides = [1, 1]} : vector<256x24xf32> to vector<8x24xf32>
    %14 = vector.extract_strided_slice %11 {offsets = [32, 0], sizes = [8, 24], strides = [1, 1]} : vector<256x24xf32> to vector<8x24xf32>
    %15 = vector.extract_strided_slice %11 {offsets = [48, 0], sizes = [8, 24], strides = [1, 1]} : vector<256x24xf32> to vector<8x24xf32>
    %16 = vector.extract_strided_slice %11 {offsets = [64, 0], sizes = [8, 24], strides = [1, 1]} : vector<256x24xf32> to vector<8x24xf32>
    %17 = vector.extract_strided_slice %11 {offsets = [80, 0], sizes = [8, 24], strides = [1, 1]} : vector<256x24xf32> to vector<8x24xf32>
    %18 = vector.extract_strided_slice %11 {offsets = [96, 0], sizes = [8, 24], strides = [1, 1]} : vector<256x24xf32> to vector<8x24xf32>
    %19 = vector.extract_strided_slice %11 {offsets = [112, 0], sizes = [8, 24], strides = [1, 1]} : vector<256x24xf32> to vector<8x24xf32>
    %20 = tpu.concatenate %12, %13, %14, %15, %16, %17, %18, %19 in 0 : vector<8x24xf32>, vector<8x24xf32>, vector<8x24xf32>, vector<8x24xf32>, vector<8x24xf32>, vector<8x24xf32>, vector<8x24xf32>, vector<8x24xf32> -> vector<64x24xf32>
    %21 = vector.extract_strided_slice %20 {offsets = [0, 0], sizes = [64, 4], strides = [1, 1]} : vector<64x24xf32> to vector<64x4xf32>
    %22 = arith.truncf %21 : vector<64x4xf32> to vector<64x4xbf16>
    %23 = vector.extract_strided_slice %20 {offsets = [0, 4], sizes = [64, 4], strides = [1, 1]} : vector<64x24xf32> to vector<64x4xf32>
    %24 = arith.truncf %23 : vector<64x4xf32> to vector<64x4xbf16>
    %25 = vector.extract_strided_slice %20 {offsets = [0, 8], sizes = [64, 16], strides = [1, 1]} : vector<64x24xf32> to vector<64x16xf32>
    %26 = arith.truncf %25 : vector<64x16xf32> to vector<64x16xbf16>
    %cst_11 = arith.constant dense<0.000000e+00> : vector<64x64xf32>
    %27 = tpu.matmul %22, %24, %cst_11 {dimension_numbers = #tpu.dot_dimension_numbers<[1], [1], [0], [0], [0, 0, 1, 0], [], []>} : vector<64x4xbf16>, vector<64x4xbf16>, vector<64x64xf32> -> vector<64x64xf32>
    %cst_12 = arith.constant dense<0xFF800000> : vector<64xf32>
    %28 = vector.multi_reduction <maximumf>, %27, %cst_12 [1] : vector<64x64xf32> to vector<64xf32>
    %29 = vector.shape_cast %28 : vector<64xf32> to vector<64x1xf32>
    %30 = vector.broadcast %29 : vector<64x1xf32> to vector<64x64xf32>
    %31 = arith.subf %27, %30 : vector<64x64xf32>
    %32 = math.exp %31 : vector<64x64xf32>
    %cst_13 = arith.constant dense<0.000000e+00> : vector<64xf32>
    %33 = vector.multi_reduction <add>, %32, %cst_13 [1] : vector<64x64xf32> to vector<64xf32>
    %34 = vector.shape_cast %33 : vector<64xf32> to vector<64x1xf32>
    %35 = tpu.reciprocal %34 {approx = true} : vector<64x1xf32> -> vector<64x1xf32>
    %36 = vector.broadcast %35 : vector<64x1xf32> to vector<64x64xf32>
    %37 = arith.mulf %32, %36 : vector<64x64xf32>
    %38 = arith.truncf %37 : vector<64x64xf32> to vector<64x64xbf16>
    %cst_14 = arith.constant dense<0.000000e+00> : vector<64x16xf32>
    %39 = tpu.matmul %38, %26, %cst_14 {dimension_numbers = #tpu.dot_dimension_numbers<[1], [0], [0], [1], [0, 0, 1, 1], [], []>} : vector<64x64xbf16>, vector<64x16xbf16>, vector<64x16xf32> -> vector<64x16xf32>
    %40 = vector.extract_strided_slice %11 {offsets = [8, 0], sizes = [8, 24], strides = [1, 1]} : vector<256x24xf32> to vector<8x24xf32>
    %41 = vector.extract_strided_slice %11 {offsets = [24, 0], sizes = [8, 24], strides = [1, 1]} : vector<256x24xf32> to vector<8x24xf32>
    %42 = vector.extract_strided_slice %11 {offsets = [40, 0], sizes = [8, 24], strides = [1, 1]} : vector<256x24xf32> to vector<8x24xf32>
    %43 = vector.extract_strided_slice %11 {offsets = [56, 0], sizes = [8, 24], strides = [1, 1]} : vector<256x24xf32> to vector<8x24xf32>
    %44 = vector.extract_strided_slice %11 {offsets = [72, 0], sizes = [8, 24], strides = [1, 1]} : vector<256x24xf32> to vector<8x24xf32>
    %45 = vector.extract_strided_slice %11 {offsets = [88, 0], sizes = [8, 24], strides = [1, 1]} : vector<256x24xf32> to vector<8x24xf32>
    %46 = vector.extract_strided_slice %11 {offsets = [104, 0], sizes = [8, 24], strides = [1, 1]} : vector<256x24xf32> to vector<8x24xf32>
    %47 = vector.extract_strided_slice %11 {offsets = [120, 0], sizes = [8, 24], strides = [1, 1]} : vector<256x24xf32> to vector<8x24xf32>
    %48 = tpu.concatenate %40, %41, %42, %43, %44, %45, %46, %47 in 0 : vector<8x24xf32>, vector<8x24xf32>, vector<8x24xf32>, vector<8x24xf32>, vector<8x24xf32>, vector<8x24xf32>, vector<8x24xf32>, vector<8x24xf32> -> vector<64x24xf32>
    %49 = vector.extract_strided_slice %48 {offsets = [0, 0], sizes = [64, 4], strides = [1, 1]} : vector<64x24xf32> to vector<64x4xf32>
    %50 = arith.truncf %49 : vector<64x4xf32> to vector<64x4xbf16>
    %51 = vector.extract_strided_slice %48 {offsets = [0, 4], sizes = [64, 4], strides = [1, 1]} : vector<64x24xf32> to vector<64x4xf32>
    %52 = arith.truncf %51 : vector<64x4xf32> to vector<64x4xbf16>
    %53 = vector.extract_strided_slice %48 {offsets = [0, 8], sizes = [64, 16], strides = [1, 1]} : vector<64x24xf32> to vector<64x16xf32>
    %54 = arith.truncf %53 : vector<64x16xf32> to vector<64x16xbf16>
    %cst_15 = arith.constant dense<0.000000e+00> : vector<64x64xf32>
    %55 = tpu.matmul %50, %52, %cst_15 {dimension_numbers = #tpu.dot_dimension_numbers<[1], [1], [0], [0], [0, 0, 1, 0], [], []>} : vector<64x4xbf16>, vector<64x4xbf16>, vector<64x64xf32> -> vector<64x64xf32>
    %cst_16 = arith.constant dense<0xFF800000> : vector<64xf32>
    %56 = vector.multi_reduction <maximumf>, %55, %cst_16 [1] : vector<64x64xf32> to vector<64xf32>
    %57 = vector.shape_cast %56 : vector<64xf32> to vector<64x1xf32>
    %58 = vector.broadcast %57 : vector<64x1xf32> to vector<64x64xf32>
    %59 = arith.subf %55, %58 : vector<64x64xf32>
    %60 = math.exp %59 : vector<64x64xf32>
    %cst_17 = arith.constant dense<0.000000e+00> : vector<64xf32>
    %61 = vector.multi_reduction <add>, %60, %cst_17 [1] : vector<64x64xf32> to vector<64xf32>
    %62 = vector.shape_cast %61 : vector<64xf32> to vector<64x1xf32>
    %63 = tpu.reciprocal %62 {approx = true} : vector<64x1xf32> -> vector<64x1xf32>
    %64 = vector.broadcast %63 : vector<64x1xf32> to vector<64x64xf32>
    %65 = arith.mulf %60, %64 : vector<64x64xf32>
    %66 = arith.truncf %65 : vector<64x64xf32> to vector<64x64xbf16>
    %cst_18 = arith.constant dense<0.000000e+00> : vector<64x16xf32>
    %67 = tpu.matmul %66, %54, %cst_18 {dimension_numbers = #tpu.dot_dimension_numbers<[1], [0], [0], [1], [0, 0, 1, 1], [], []>} : vector<64x64xbf16>, vector<64x16xbf16>, vector<64x16xf32> -> vector<64x16xf32>
    %68 = vector.extract_strided_slice %39 {offsets = [0, 0], sizes = [8, 16], strides = [1, 1]} : vector<64x16xf32> to vector<8x16xf32>
    %69 = vector.extract_strided_slice %67 {offsets = [0, 0], sizes = [8, 16], strides = [1, 1]} : vector<64x16xf32> to vector<8x16xf32>
    %70 = tpu.concatenate %68, %69 in 0 : vector<8x16xf32>, vector<8x16xf32> -> vector<16x16xf32>
    %cst_19 = arith.constant 5.000000e-01 : f32
    %71 = vector.broadcast %cst_19 : f32 to vector<16x16xf32>
    %72 = arith.mulf %71, %70 : vector<16x16xf32>
    %73 = vector.extract_strided_slice %5 {offsets = [0, 0], sizes = [16, 16], strides = [1, 1]} : vector<256x16xf32> to vector<16x16xf32>
    %74 = arith.addf %72, %73 : vector<16x16xf32>
    %c16 = arith.constant 16 : index
    %c0_20 = arith.constant 0 : index
    %75 = vector.load %arg9[%c16, %c0_20] : memref<288x16xf32, #tpu.memory_space<vmem>>, vector<16x16xf32>
    tpu.vector_store %arg9[%c16, %c0_20], %74 {strides = array<i32>} : memref<288x16xf32, #tpu.memory_space<vmem>>, vector<16x16xf32>,
    %76 = vector.extract_strided_slice %39 {offsets = [8, 0], sizes = [8, 16], strides = [1, 1]} : vector<64x16xf32> to vector<8x16xf32>
    %77 = vector.extract_strided_slice %67 {offsets = [8, 0], sizes = [8, 16], strides = [1, 1]} : vector<64x16xf32> to vector<8x16xf32>
    %78 = tpu.concatenate %76, %77 in 0 : vector<8x16xf32>, vector<8x16xf32> -> vector<16x16xf32>
    %cst_21 = arith.constant 5.000000e-01 : f32
    %79 = vector.broadcast %cst_21 : f32 to vector<16x16xf32>
    %80 = arith.mulf %79, %78 : vector<16x16xf32>
    %81 = vector.extract_strided_slice %5 {offsets = [16, 0], sizes = [16, 16], strides = [1, 1]} : vector<256x16xf32> to vector<16x16xf32>
    %82 = arith.addf %80, %81 : vector<16x16xf32>
    %c32 = arith.constant 32 : index
    %c0_22 = arith.constant 0 : index
    %83 = vector.load %arg9[%c32, %c0_22] : memref<288x16xf32, #tpu.memory_space<vmem>>, vector<16x16xf32>
    tpu.vector_store %arg9[%c32, %c0_22], %82 {strides = array<i32>} : memref<288x16xf32, #tpu.memory_space<vmem>>, vector<16x16xf32>,
    %84 = vector.extract_strided_slice %39 {offsets = [16, 0], sizes = [8, 16], strides = [1, 1]} : vector<64x16xf32> to vector<8x16xf32>
    %85 = vector.extract_strided_slice %67 {offsets = [16, 0], sizes = [8, 16], strides = [1, 1]} : vector<64x16xf32> to vector<8x16xf32>
    %86 = tpu.concatenate %84, %85 in 0 : vector<8x16xf32>, vector<8x16xf32> -> vector<16x16xf32>
    %cst_23 = arith.constant 5.000000e-01 : f32
    %87 = vector.broadcast %cst_23 : f32 to vector<16x16xf32>
    %88 = arith.mulf %87, %86 : vector<16x16xf32>
    %89 = vector.extract_strided_slice %5 {offsets = [32, 0], sizes = [16, 16], strides = [1, 1]} : vector<256x16xf32> to vector<16x16xf32>
    %90 = arith.addf %88, %89 : vector<16x16xf32>
    %c48 = arith.constant 48 : index
    %c0_24 = arith.constant 0 : index
    %91 = vector.load %arg9[%c48, %c0_24] : memref<288x16xf32, #tpu.memory_space<vmem>>, vector<16x16xf32>
    tpu.vector_store %arg9[%c48, %c0_24], %90 {strides = array<i32>} : memref<288x16xf32, #tpu.memory_space<vmem>>, vector<16x16xf32>,
    %92 = vector.extract_strided_slice %39 {offsets = [24, 0], sizes = [8, 16], strides = [1, 1]} : vector<64x16xf32> to vector<8x16xf32>
    %93 = vector.extract_strided_slice %67 {offsets = [24, 0], sizes = [8, 16], strides = [1, 1]} : vector<64x16xf32> to vector<8x16xf32>
    %94 = tpu.concatenate %92, %93 in 0 : vector<8x16xf32>, vector<8x16xf32> -> vector<16x16xf32>
    %cst_25 = arith.constant 5.000000e-01 : f32
    %95 = vector.broadcast %cst_25 : f32 to vector<16x16xf32>
    %96 = arith.mulf %95, %94 : vector<16x16xf32>
    %97 = vector.extract_strided_slice %5 {offsets = [48, 0], sizes = [16, 16], strides = [1, 1]} : vector<256x16xf32> to vector<16x16xf32>
    %98 = arith.addf %96, %97 : vector<16x16xf32>
    %c64 = arith.constant 64 : index
    %c0_26 = arith.constant 0 : index
    %99 = vector.load %arg9[%c64, %c0_26] : memref<288x16xf32, #tpu.memory_space<vmem>>, vector<16x16xf32>
    tpu.vector_store %arg9[%c64, %c0_26], %98 {strides = array<i32>} : memref<288x16xf32, #tpu.memory_space<vmem>>, vector<16x16xf32>,
    %100 = vector.extract_strided_slice %39 {offsets = [32, 0], sizes = [8, 16], strides = [1, 1]} : vector<64x16xf32> to vector<8x16xf32>
    %101 = vector.extract_strided_slice %67 {offsets = [32, 0], sizes = [8, 16], strides = [1, 1]} : vector<64x16xf32> to vector<8x16xf32>
    %102 = tpu.concatenate %100, %101 in 0 : vector<8x16xf32>, vector<8x16xf32> -> vector<16x16xf32>
    %cst_27 = arith.constant 5.000000e-01 : f32
    %103 = vector.broadcast %cst_27 : f32 to vector<16x16xf32>
    %104 = arith.mulf %103, %102 : vector<16x16xf32>
    %105 = vector.extract_strided_slice %5 {offsets = [64, 0], sizes = [16, 16], strides = [1, 1]} : vector<256x16xf32> to vector<16x16xf32>
    %106 = arith.addf %104, %105 : vector<16x16xf32>
    %c80 = arith.constant 80 : index
    %c0_28 = arith.constant 0 : index
    %107 = vector.load %arg9[%c80, %c0_28] : memref<288x16xf32, #tpu.memory_space<vmem>>, vector<16x16xf32>
    tpu.vector_store %arg9[%c80, %c0_28], %106 {strides = array<i32>} : memref<288x16xf32, #tpu.memory_space<vmem>>, vector<16x16xf32>,
    %108 = vector.extract_strided_slice %39 {offsets = [40, 0], sizes = [8, 16], strides = [1, 1]} : vector<64x16xf32> to vector<8x16xf32>
    %109 = vector.extract_strided_slice %67 {offsets = [40, 0], sizes = [8, 16], strides = [1, 1]} : vector<64x16xf32> to vector<8x16xf32>
    %110 = tpu.concatenate %108, %109 in 0 : vector<8x16xf32>, vector<8x16xf32> -> vector<16x16xf32>
    %cst_29 = arith.constant 5.000000e-01 : f32
    %111 = vector.broadcast %cst_29 : f32 to vector<16x16xf32>
    %112 = arith.mulf %111, %110 : vector<16x16xf32>
    %113 = vector.extract_strided_slice %5 {offsets = [80, 0], sizes = [16, 16], strides = [1, 1]} : vector<256x16xf32> to vector<16x16xf32>
    %114 = arith.addf %112, %113 : vector<16x16xf32>
    %c96 = arith.constant 96 : index
    %c0_30 = arith.constant 0 : index
    %115 = vector.load %arg9[%c96, %c0_30] : memref<288x16xf32, #tpu.memory_space<vmem>>, vector<16x16xf32>
    tpu.vector_store %arg9[%c96, %c0_30], %114 {strides = array<i32>} : memref<288x16xf32, #tpu.memory_space<vmem>>, vector<16x16xf32>,
    %116 = vector.extract_strided_slice %39 {offsets = [48, 0], sizes = [8, 16], strides = [1, 1]} : vector<64x16xf32> to vector<8x16xf32>
    %117 = vector.extract_strided_slice %67 {offsets = [48, 0], sizes = [8, 16], strides = [1, 1]} : vector<64x16xf32> to vector<8x16xf32>
    %118 = tpu.concatenate %116, %117 in 0 : vector<8x16xf32>, vector<8x16xf32> -> vector<16x16xf32>
    %cst_31 = arith.constant 5.000000e-01 : f32
    %119 = vector.broadcast %cst_31 : f32 to vector<16x16xf32>
    %120 = arith.mulf %119, %118 : vector<16x16xf32>
    %121 = vector.extract_strided_slice %5 {offsets = [96, 0], sizes = [16, 16], strides = [1, 1]} : vector<256x16xf32> to vector<16x16xf32>
    %122 = arith.addf %120, %121 : vector<16x16xf32>
    %c112 = arith.constant 112 : index
    %c0_32 = arith.constant 0 : index
    %123 = vector.load %arg9[%c112, %c0_32] : memref<288x16xf32, #tpu.memory_space<vmem>>, vector<16x16xf32>
    tpu.vector_store %arg9[%c112, %c0_32], %122 {strides = array<i32>} : memref<288x16xf32, #tpu.memory_space<vmem>>, vector<16x16xf32>,
    %124 = vector.extract_strided_slice %39 {offsets = [56, 0], sizes = [8, 16], strides = [1, 1]} : vector<64x16xf32> to vector<8x16xf32>
    %125 = vector.extract_strided_slice %67 {offsets = [56, 0], sizes = [8, 16], strides = [1, 1]} : vector<64x16xf32> to vector<8x16xf32>
    %126 = tpu.concatenate %124, %125 in 0 : vector<8x16xf32>, vector<8x16xf32> -> vector<16x16xf32>
    %cst_33 = arith.constant 5.000000e-01 : f32
    %127 = vector.broadcast %cst_33 : f32 to vector<16x16xf32>
    %128 = arith.mulf %127, %126 : vector<16x16xf32>
    %129 = vector.extract_strided_slice %5 {offsets = [112, 0], sizes = [16, 16], strides = [1, 1]} : vector<256x16xf32> to vector<16x16xf32>
    %130 = arith.addf %128, %129 : vector<16x16xf32>
    %c128 = arith.constant 128 : index
    %c0_34 = arith.constant 0 : index
    %131 = vector.load %arg9[%c128, %c0_34] : memref<288x16xf32, #tpu.memory_space<vmem>>, vector<16x16xf32>
    tpu.vector_store %arg9[%c128, %c0_34], %130 {strides = array<i32>} : memref<288x16xf32, #tpu.memory_space<vmem>>, vector<16x16xf32>,
    %132 = vector.extract_strided_slice %11 {offsets = [128, 0], sizes = [8, 24], strides = [1, 1]} : vector<256x24xf32> to vector<8x24xf32>
    %133 = vector.extract_strided_slice %11 {offsets = [144, 0], sizes = [8, 24], strides = [1, 1]} : vector<256x24xf32> to vector<8x24xf32>
    %134 = vector.extract_strided_slice %11 {offsets = [160, 0], sizes = [8, 24], strides = [1, 1]} : vector<256x24xf32> to vector<8x24xf32>
    %135 = vector.extract_strided_slice %11 {offsets = [176, 0], sizes = [8, 24], strides = [1, 1]} : vector<256x24xf32> to vector<8x24xf32>
    %136 = vector.extract_strided_slice %11 {offsets = [192, 0], sizes = [8, 24], strides = [1, 1]} : vector<256x24xf32> to vector<8x24xf32>
    %137 = vector.extract_strided_slice %11 {offsets = [208, 0], sizes = [8, 24], strides = [1, 1]} : vector<256x24xf32> to vector<8x24xf32>
    %138 = vector.extract_strided_slice %11 {offsets = [224, 0], sizes = [8, 24], strides = [1, 1]} : vector<256x24xf32> to vector<8x24xf32>
    %139 = vector.extract_strided_slice %11 {offsets = [240, 0], sizes = [8, 24], strides = [1, 1]} : vector<256x24xf32> to vector<8x24xf32>
    %140 = tpu.concatenate %132, %133, %134, %135, %136, %137, %138, %139 in 0 : vector<8x24xf32>, vector<8x24xf32>, vector<8x24xf32>, vector<8x24xf32>, vector<8x24xf32>, vector<8x24xf32>, vector<8x24xf32>, vector<8x24xf32> -> vector<64x24xf32>
    %141 = vector.extract_strided_slice %140 {offsets = [0, 0], sizes = [64, 4], strides = [1, 1]} : vector<64x24xf32> to vector<64x4xf32>
    %142 = arith.truncf %141 : vector<64x4xf32> to vector<64x4xbf16>
    %143 = vector.extract_strided_slice %140 {offsets = [0, 4], sizes = [64, 4], strides = [1, 1]} : vector<64x24xf32> to vector<64x4xf32>
    %144 = arith.truncf %143 : vector<64x4xf32> to vector<64x4xbf16>
    %145 = vector.extract_strided_slice %140 {offsets = [0, 8], sizes = [64, 16], strides = [1, 1]} : vector<64x24xf32> to vector<64x16xf32>
    %146 = arith.truncf %145 : vector<64x16xf32> to vector<64x16xbf16>
    %cst_35 = arith.constant dense<0.000000e+00> : vector<64x64xf32>
    %147 = tpu.matmul %142, %144, %cst_35 {dimension_numbers = #tpu.dot_dimension_numbers<[1], [1], [0], [0], [0, 0, 1, 0], [], []>} : vector<64x4xbf16>, vector<64x4xbf16>, vector<64x64xf32> -> vector<64x64xf32>
    %cst_36 = arith.constant dense<0xFF800000> : vector<64xf32>
    %148 = vector.multi_reduction <maximumf>, %147, %cst_36 [1] : vector<64x64xf32> to vector<64xf32>
    %149 = vector.shape_cast %148 : vector<64xf32> to vector<64x1xf32>
    %150 = vector.broadcast %149 : vector<64x1xf32> to vector<64x64xf32>
    %151 = arith.subf %147, %150 : vector<64x64xf32>
    %152 = math.exp %151 : vector<64x64xf32>
    %cst_37 = arith.constant dense<0.000000e+00> : vector<64xf32>
    %153 = vector.multi_reduction <add>, %152, %cst_37 [1] : vector<64x64xf32> to vector<64xf32>
    %154 = vector.shape_cast %153 : vector<64xf32> to vector<64x1xf32>
    %155 = tpu.reciprocal %154 {approx = true} : vector<64x1xf32> -> vector<64x1xf32>
    %156 = vector.broadcast %155 : vector<64x1xf32> to vector<64x64xf32>
    %157 = arith.mulf %152, %156 : vector<64x64xf32>
    %158 = arith.truncf %157 : vector<64x64xf32> to vector<64x64xbf16>
    %cst_38 = arith.constant dense<0.000000e+00> : vector<64x16xf32>
    %159 = tpu.matmul %158, %146, %cst_38 {dimension_numbers = #tpu.dot_dimension_numbers<[1], [0], [0], [1], [0, 0, 1, 1], [], []>} : vector<64x64xbf16>, vector<64x16xbf16>, vector<64x16xf32> -> vector<64x16xf32>
    %160 = vector.extract_strided_slice %11 {offsets = [136, 0], sizes = [8, 24], strides = [1, 1]} : vector<256x24xf32> to vector<8x24xf32>
    %161 = vector.extract_strided_slice %11 {offsets = [152, 0], sizes = [8, 24], strides = [1, 1]} : vector<256x24xf32> to vector<8x24xf32>
    %162 = vector.extract_strided_slice %11 {offsets = [168, 0], sizes = [8, 24], strides = [1, 1]} : vector<256x24xf32> to vector<8x24xf32>
    %163 = vector.extract_strided_slice %11 {offsets = [184, 0], sizes = [8, 24], strides = [1, 1]} : vector<256x24xf32> to vector<8x24xf32>
    %164 = vector.extract_strided_slice %11 {offsets = [200, 0], sizes = [8, 24], strides = [1, 1]} : vector<256x24xf32> to vector<8x24xf32>
    %165 = vector.extract_strided_slice %11 {offsets = [216, 0], sizes = [8, 24], strides = [1, 1]} : vector<256x24xf32> to vector<8x24xf32>
    %166 = vector.extract_strided_slice %11 {offsets = [232, 0], sizes = [8, 24], strides = [1, 1]} : vector<256x24xf32> to vector<8x24xf32>
    %167 = vector.extract_strided_slice %11 {offsets = [248, 0], sizes = [8, 24], strides = [1, 1]} : vector<256x24xf32> to vector<8x24xf32>
    %168 = tpu.concatenate %160, %161, %162, %163, %164, %165, %166, %167 in 0 : vector<8x24xf32>, vector<8x24xf32>, vector<8x24xf32>, vector<8x24xf32>, vector<8x24xf32>, vector<8x24xf32>, vector<8x24xf32>, vector<8x24xf32> -> vector<64x24xf32>
    %169 = vector.extract_strided_slice %168 {offsets = [0, 0], sizes = [64, 4], strides = [1, 1]} : vector<64x24xf32> to vector<64x4xf32>
    %170 = arith.truncf %169 : vector<64x4xf32> to vector<64x4xbf16>
    %171 = vector.extract_strided_slice %168 {offsets = [0, 4], sizes = [64, 4], strides = [1, 1]} : vector<64x24xf32> to vector<64x4xf32>
    %172 = arith.truncf %171 : vector<64x4xf32> to vector<64x4xbf16>
    %173 = vector.extract_strided_slice %168 {offsets = [0, 8], sizes = [64, 16], strides = [1, 1]} : vector<64x24xf32> to vector<64x16xf32>
    %174 = arith.truncf %173 : vector<64x16xf32> to vector<64x16xbf16>
    %cst_39 = arith.constant dense<0.000000e+00> : vector<64x64xf32>
    %175 = tpu.matmul %170, %172, %cst_39 {dimension_numbers = #tpu.dot_dimension_numbers<[1], [1], [0], [0], [0, 0, 1, 0], [], []>} : vector<64x4xbf16>, vector<64x4xbf16>, vector<64x64xf32> -> vector<64x64xf32>
    %cst_40 = arith.constant dense<0xFF800000> : vector<64xf32>
    %176 = vector.multi_reduction <maximumf>, %175, %cst_40 [1] : vector<64x64xf32> to vector<64xf32>
    %177 = vector.shape_cast %176 : vector<64xf32> to vector<64x1xf32>
    %178 = vector.broadcast %177 : vector<64x1xf32> to vector<64x64xf32>
    %179 = arith.subf %175, %178 : vector<64x64xf32>
    %180 = math.exp %179 : vector<64x64xf32>
    %cst_41 = arith.constant dense<0.000000e+00> : vector<64xf32>
    %181 = vector.multi_reduction <add>, %180, %cst_41 [1] : vector<64x64xf32> to vector<64xf32>
    %182 = vector.shape_cast %181 : vector<64xf32> to vector<64x1xf32>
    %183 = tpu.reciprocal %182 {approx = true} : vector<64x1xf32> -> vector<64x1xf32>
    %184 = vector.broadcast %183 : vector<64x1xf32> to vector<64x64xf32>
    %185 = arith.mulf %180, %184 : vector<64x64xf32>
    %186 = arith.truncf %185 : vector<64x64xf32> to vector<64x64xbf16>
    %cst_42 = arith.constant dense<0.000000e+00> : vector<64x16xf32>
    %187 = tpu.matmul %186, %174, %cst_42 {dimension_numbers = #tpu.dot_dimension_numbers<[1], [0], [0], [1], [0, 0, 1, 1], [], []>} : vector<64x64xbf16>, vector<64x16xbf16>, vector<64x16xf32> -> vector<64x16xf32>
    %188 = vector.extract_strided_slice %159 {offsets = [0, 0], sizes = [8, 16], strides = [1, 1]} : vector<64x16xf32> to vector<8x16xf32>
    %189 = vector.extract_strided_slice %187 {offsets = [0, 0], sizes = [8, 16], strides = [1, 1]} : vector<64x16xf32> to vector<8x16xf32>
    %190 = tpu.concatenate %188, %189 in 0 : vector<8x16xf32>, vector<8x16xf32> -> vector<16x16xf32>
    %cst_43 = arith.constant 5.000000e-01 : f32
    %191 = vector.broadcast %cst_43 : f32 to vector<16x16xf32>
    %192 = arith.mulf %191, %190 : vector<16x16xf32>
    %193 = vector.extract_strided_slice %5 {offsets = [128, 0], sizes = [16, 16], strides = [1, 1]} : vector<256x16xf32> to vector<16x16xf32>
    %194 = arith.addf %192, %193 : vector<16x16xf32>
    %c144 = arith.constant 144 : index
    %c0_44 = arith.constant 0 : index
    %195 = vector.load %arg9[%c144, %c0_44] : memref<288x16xf32, #tpu.memory_space<vmem>>, vector<16x16xf32>
    tpu.vector_store %arg9[%c144, %c0_44], %194 {strides = array<i32>} : memref<288x16xf32, #tpu.memory_space<vmem>>, vector<16x16xf32>,
    %196 = vector.extract_strided_slice %159 {offsets = [8, 0], sizes = [8, 16], strides = [1, 1]} : vector<64x16xf32> to vector<8x16xf32>
    %197 = vector.extract_strided_slice %187 {offsets = [8, 0], sizes = [8, 16], strides = [1, 1]} : vector<64x16xf32> to vector<8x16xf32>
    %198 = tpu.concatenate %196, %197 in 0 : vector<8x16xf32>, vector<8x16xf32> -> vector<16x16xf32>
    %cst_45 = arith.constant 5.000000e-01 : f32
    %199 = vector.broadcast %cst_45 : f32 to vector<16x16xf32>
    %200 = arith.mulf %199, %198 : vector<16x16xf32>
    %201 = vector.extract_strided_slice %5 {offsets = [144, 0], sizes = [16, 16], strides = [1, 1]} : vector<256x16xf32> to vector<16x16xf32>
    %202 = arith.addf %200, %201 : vector<16x16xf32>
    %c160 = arith.constant 160 : index
    %c0_46 = arith.constant 0 : index
    %203 = vector.load %arg9[%c160, %c0_46] : memref<288x16xf32, #tpu.memory_space<vmem>>, vector<16x16xf32>
    tpu.vector_store %arg9[%c160, %c0_46], %202 {strides = array<i32>} : memref<288x16xf32, #tpu.memory_space<vmem>>, vector<16x16xf32>,
    %204 = vector.extract_strided_slice %159 {offsets = [16, 0], sizes = [8, 16], strides = [1, 1]} : vector<64x16xf32> to vector<8x16xf32>
    %205 = vector.extract_strided_slice %187 {offsets = [16, 0], sizes = [8, 16], strides = [1, 1]} : vector<64x16xf32> to vector<8x16xf32>
    %206 = tpu.concatenate %204, %205 in 0 : vector<8x16xf32>, vector<8x16xf32> -> vector<16x16xf32>
    %cst_47 = arith.constant 5.000000e-01 : f32
    %207 = vector.broadcast %cst_47 : f32 to vector<16x16xf32>
    %208 = arith.mulf %207, %206 : vector<16x16xf32>
    %209 = vector.extract_strided_slice %5 {offsets = [160, 0], sizes = [16, 16], strides = [1, 1]} : vector<256x16xf32> to vector<16x16xf32>
    %210 = arith.addf %208, %209 : vector<16x16xf32>
    %c176 = arith.constant 176 : index
    %c0_48 = arith.constant 0 : index
    %211 = vector.load %arg9[%c176, %c0_48] : memref<288x16xf32, #tpu.memory_space<vmem>>, vector<16x16xf32>
    tpu.vector_store %arg9[%c176, %c0_48], %210 {strides = array<i32>} : memref<288x16xf32, #tpu.memory_space<vmem>>, vector<16x16xf32>,
    %212 = vector.extract_strided_slice %159 {offsets = [24, 0], sizes = [8, 16], strides = [1, 1]} : vector<64x16xf32> to vector<8x16xf32>
    %213 = vector.extract_strided_slice %187 {offsets = [24, 0], sizes = [8, 16], strides = [1, 1]} : vector<64x16xf32> to vector<8x16xf32>
    %214 = tpu.concatenate %212, %213 in 0 : vector<8x16xf32>, vector<8x16xf32> -> vector<16x16xf32>
    %cst_49 = arith.constant 5.000000e-01 : f32
    %215 = vector.broadcast %cst_49 : f32 to vector<16x16xf32>
    %216 = arith.mulf %215, %214 : vector<16x16xf32>
    %217 = vector.extract_strided_slice %5 {offsets = [176, 0], sizes = [16, 16], strides = [1, 1]} : vector<256x16xf32> to vector<16x16xf32>
    %218 = arith.addf %216, %217 : vector<16x16xf32>
    %c192 = arith.constant 192 : index
    %c0_50 = arith.constant 0 : index
    %219 = vector.load %arg9[%c192, %c0_50] : memref<288x16xf32, #tpu.memory_space<vmem>>, vector<16x16xf32>
    tpu.vector_store %arg9[%c192, %c0_50], %218 {strides = array<i32>} : memref<288x16xf32, #tpu.memory_space<vmem>>, vector<16x16xf32>,
    %220 = vector.extract_strided_slice %159 {offsets = [32, 0], sizes = [8, 16], strides = [1, 1]} : vector<64x16xf32> to vector<8x16xf32>
    %221 = vector.extract_strided_slice %187 {offsets = [32, 0], sizes = [8, 16], strides = [1, 1]} : vector<64x16xf32> to vector<8x16xf32>
    %222 = tpu.concatenate %220, %221 in 0 : vector<8x16xf32>, vector<8x16xf32> -> vector<16x16xf32>
    %cst_51 = arith.constant 5.000000e-01 : f32
    %223 = vector.broadcast %cst_51 : f32 to vector<16x16xf32>
    %224 = arith.mulf %223, %222 : vector<16x16xf32>
    %225 = vector.extract_strided_slice %5 {offsets = [192, 0], sizes = [16, 16], strides = [1, 1]} : vector<256x16xf32> to vector<16x16xf32>
    %226 = arith.addf %224, %225 : vector<16x16xf32>
    %c208 = arith.constant 208 : index
    %c0_52 = arith.constant 0 : index
    %227 = vector.load %arg9[%c208, %c0_52] : memref<288x16xf32, #tpu.memory_space<vmem>>, vector<16x16xf32>
    tpu.vector_store %arg9[%c208, %c0_52], %226 {strides = array<i32>} : memref<288x16xf32, #tpu.memory_space<vmem>>, vector<16x16xf32>,
    %228 = vector.extract_strided_slice %159 {offsets = [40, 0], sizes = [8, 16], strides = [1, 1]} : vector<64x16xf32> to vector<8x16xf32>
    %229 = vector.extract_strided_slice %187 {offsets = [40, 0], sizes = [8, 16], strides = [1, 1]} : vector<64x16xf32> to vector<8x16xf32>
    %230 = tpu.concatenate %228, %229 in 0 : vector<8x16xf32>, vector<8x16xf32> -> vector<16x16xf32>
    %cst_53 = arith.constant 5.000000e-01 : f32
    %231 = vector.broadcast %cst_53 : f32 to vector<16x16xf32>
    %232 = arith.mulf %231, %230 : vector<16x16xf32>
    %233 = vector.extract_strided_slice %5 {offsets = [208, 0], sizes = [16, 16], strides = [1, 1]} : vector<256x16xf32> to vector<16x16xf32>
    %234 = arith.addf %232, %233 : vector<16x16xf32>
    %c224 = arith.constant 224 : index
    %c0_54 = arith.constant 0 : index
    %235 = vector.load %arg9[%c224, %c0_54] : memref<288x16xf32, #tpu.memory_space<vmem>>, vector<16x16xf32>
    tpu.vector_store %arg9[%c224, %c0_54], %234 {strides = array<i32>} : memref<288x16xf32, #tpu.memory_space<vmem>>, vector<16x16xf32>,
    %236 = vector.extract_strided_slice %159 {offsets = [48, 0], sizes = [8, 16], strides = [1, 1]} : vector<64x16xf32> to vector<8x16xf32>
    %237 = vector.extract_strided_slice %187 {offsets = [48, 0], sizes = [8, 16], strides = [1, 1]} : vector<64x16xf32> to vector<8x16xf32>
    %238 = tpu.concatenate %236, %237 in 0 : vector<8x16xf32>, vector<8x16xf32> -> vector<16x16xf32>
    %cst_55 = arith.constant 5.000000e-01 : f32
    %239 = vector.broadcast %cst_55 : f32 to vector<16x16xf32>
    %240 = arith.mulf %239, %238 : vector<16x16xf32>
    %241 = vector.extract_strided_slice %5 {offsets = [224, 0], sizes = [16, 16], strides = [1, 1]} : vector<256x16xf32> to vector<16x16xf32>
    %242 = arith.addf %240, %241 : vector<16x16xf32>
    %c240 = arith.constant 240 : index
    %c0_56 = arith.constant 0 : index
    %243 = vector.load %arg9[%c240, %c0_56] : memref<288x16xf32, #tpu.memory_space<vmem>>, vector<16x16xf32>
    tpu.vector_store %arg9[%c240, %c0_56], %242 {strides = array<i32>} : memref<288x16xf32, #tpu.memory_space<vmem>>, vector<16x16xf32>,
    %244 = vector.extract_strided_slice %159 {offsets = [56, 0], sizes = [8, 16], strides = [1, 1]} : vector<64x16xf32> to vector<8x16xf32>
    %245 = vector.extract_strided_slice %187 {offsets = [56, 0], sizes = [8, 16], strides = [1, 1]} : vector<64x16xf32> to vector<8x16xf32>
    %246 = tpu.concatenate %244, %245 in 0 : vector<8x16xf32>, vector<8x16xf32> -> vector<16x16xf32>
    %cst_57 = arith.constant 5.000000e-01 : f32
    %247 = vector.broadcast %cst_57 : f32 to vector<16x16xf32>
    %248 = arith.mulf %247, %246 : vector<16x16xf32>
    %249 = vector.extract_strided_slice %5 {offsets = [240, 0], sizes = [16, 16], strides = [1, 1]} : vector<256x16xf32> to vector<16x16xf32>
    %250 = arith.addf %248, %249 : vector<16x16xf32>
    %c256 = arith.constant 256 : index
    %c0_58 = arith.constant 0 : index
    %251 = vector.load %arg9[%c256, %c0_58] : memref<288x16xf32, #tpu.memory_space<vmem>>, vector<16x16xf32>
    tpu.vector_store %arg9[%c256, %c0_58], %250 {strides = array<i32>} : memref<288x16xf32, #tpu.memory_space<vmem>>, vector<16x16xf32>,
    %252 = tpu.iota {dimensions = array<i32: 0>} : vector<256x16xi32>
    %c15_i32 = arith.constant 15 : i32
    %253 = vector.broadcast %c15_i32 : i32 to vector<256x16xi32>
    %254 = arith.andi %252, %253 : vector<256x16xi32>
    %c1_i32 = arith.constant 1 : i32
    %255 = vector.broadcast %c1_i32 : i32 to vector<256x16xi32>
    %256 = arith.cmpi sge, %254, %255 : vector<256x16xi32>
    %c14_i32 = arith.constant 14 : i32
    %257 = vector.broadcast %c14_i32 : i32 to vector<256x16xi32>
    %258 = arith.cmpi sle, %254, %257 : vector<256x16xi32>
    %cst_59 = arith.constant 0.000000e+00 : f32
    %259 = vector.broadcast %cst_59 : f32 to vector<256x16xf32>
    %c0_60 = arith.constant 0 : index
    %c0_61 = arith.constant 0 : index
    %260 = vector.load %arg9[%c0_60, %c0_61] : memref<288x16xf32, #tpu.memory_space<vmem>>, vector<256x16xf32>
    %c1_i32_62 = arith.constant 1 : i32
    %261 = tpu.dynamic_rotate %260 by %c1_i32_62 dim 0 : vector<256x16xf32>, i32 -> vector<256x16xf32>
    %cst_63 = arith.constant 0.000000e+00 : f32
    %262 = vector.broadcast %cst_63 : f32 to vector<256x16xf32>
    %263 = arith.select %256, %261, %262 : vector<256x16xi1>, vector<256x16xf32>
    %c255_i32 = arith.constant 255 : i32
    %264 = tpu.dynamic_rotate %260 by %c255_i32 dim 0 : vector<256x16xf32>, i32 -> vector<256x16xf32>
    %cst_64 = arith.constant 0.000000e+00 : f32
    %265 = vector.broadcast %cst_64 : f32 to vector<256x16xf32>
    %266 = arith.select %258, %264, %265 : vector<256x16xi1>, vector<256x16xf32>
    %267 = arith.truncf %263 : vector<256x16xf32> to vector<256x16xbf16>
    %c0_65 = arith.constant 0 : index
    %c0_66 = arith.constant 0 : index
    %c0_67 = arith.constant 0 : index
    %268 = vector.load %arg4[%c0_65, %c0_66, %c0_67] : memref<9x16x16xbf16, #tpu.memory_space<vmem>>, vector<1x16x16xbf16>
    %269 = vector.shape_cast %268 : vector<1x16x16xbf16> to vector<16x16xbf16>
    %cst_68 = arith.constant dense<0.000000e+00> : vector<256x16xf32>
    %270 = tpu.matmul %267, %269, %cst_68 {dimension_numbers = #tpu.dot_dimension_numbers<[1], [0], [0], [1], [0, 0, 1, 1], [], []>} : vector<256x16xbf16>, vector<16x16xbf16>, vector<256x16xf32> -> vector<256x16xf32>
    %271 = arith.addf %259, %270 : vector<256x16xf32>
    %272 = arith.truncf %260 : vector<256x16xf32> to vector<256x16xbf16>
    %c1 = arith.constant 1 : index
    %c0_69 = arith.constant 0 : index
    %c0_70 = arith.constant 0 : index
    %273 = vector.load %arg4[%c1, %c0_69, %c0_70] : memref<9x16x16xbf16, #tpu.memory_space<vmem>>, vector<1x16x16xbf16>
    %274 = vector.shape_cast %273 : vector<1x16x16xbf16> to vector<16x16xbf16>
    %cst_71 = arith.constant dense<0.000000e+00> : vector<256x16xf32>
    %275 = tpu.matmul %272, %274, %cst_71 {dimension_numbers = #tpu.dot_dimension_numbers<[1], [0], [0], [1], [0, 0, 1, 1], [], []>} : vector<256x16xbf16>, vector<16x16xbf16>, vector<256x16xf32> -> vector<256x16xf32>
    %276 = arith.addf %271, %275 : vector<256x16xf32>
    %277 = arith.truncf %266 : vector<256x16xf32> to vector<256x16xbf16>
    %c2 = arith.constant 2 : index
    %c0_72 = arith.constant 0 : index
    %c0_73 = arith.constant 0 : index
    %278 = vector.load %arg4[%c2, %c0_72, %c0_73] : memref<9x16x16xbf16, #tpu.memory_space<vmem>>, vector<1x16x16xbf16>
    %279 = vector.shape_cast %278 : vector<1x16x16xbf16> to vector<16x16xbf16>
    %cst_74 = arith.constant dense<0.000000e+00> : vector<256x16xf32>
    %280 = tpu.matmul %277, %279, %cst_74 {dimension_numbers = #tpu.dot_dimension_numbers<[1], [0], [0], [1], [0, 0, 1, 1], [], []>} : vector<256x16xbf16>, vector<16x16xbf16>, vector<256x16xf32> -> vector<256x16xf32>
    %281 = arith.addf %276, %280 : vector<256x16xf32>
    %c16_75 = arith.constant 16 : index
    %c0_76 = arith.constant 0 : index
    %282 = vector.load %arg9[%c16_75, %c0_76] : memref<288x16xf32, #tpu.memory_space<vmem>>, vector<256x16xf32>
    %c1_i32_77 = arith.constant 1 : i32
    %283 = tpu.dynamic_rotate %282 by %c1_i32_77 dim 0 : vector<256x16xf32>, i32 -> vector<256x16xf32>
    %cst_78 = arith.constant 0.000000e+00 : f32
    %284 = vector.broadcast %cst_78 : f32 to vector<256x16xf32>
    %285 = arith.select %256, %283, %284 : vector<256x16xi1>, vector<256x16xf32>
    %c255_i32_79 = arith.constant 255 : i32
    %286 = tpu.dynamic_rotate %282 by %c255_i32_79 dim 0 : vector<256x16xf32>, i32 -> vector<256x16xf32>
    %cst_80 = arith.constant 0.000000e+00 : f32
    %287 = vector.broadcast %cst_80 : f32 to vector<256x16xf32>
    %288 = arith.select %258, %286, %287 : vector<256x16xi1>, vector<256x16xf32>
    %289 = arith.truncf %285 : vector<256x16xf32> to vector<256x16xbf16>
    %c3 = arith.constant 3 : index
    %c0_81 = arith.constant 0 : index
    %c0_82 = arith.constant 0 : index
    %290 = vector.load %arg4[%c3, %c0_81, %c0_82] : memref<9x16x16xbf16, #tpu.memory_space<vmem>>, vector<1x16x16xbf16>
    %291 = vector.shape_cast %290 : vector<1x16x16xbf16> to vector<16x16xbf16>
    %cst_83 = arith.constant dense<0.000000e+00> : vector<256x16xf32>
    %292 = tpu.matmul %289, %291, %cst_83 {dimension_numbers = #tpu.dot_dimension_numbers<[1], [0], [0], [1], [0, 0, 1, 1], [], []>} : vector<256x16xbf16>, vector<16x16xbf16>, vector<256x16xf32> -> vector<256x16xf32>
    %293 = arith.addf %281, %292 : vector<256x16xf32>
    %294 = arith.truncf %282 : vector<256x16xf32> to vector<256x16xbf16>
    %c4 = arith.constant 4 : index
    %c0_84 = arith.constant 0 : index
    %c0_85 = arith.constant 0 : index
    %295 = vector.load %arg4[%c4, %c0_84, %c0_85] : memref<9x16x16xbf16, #tpu.memory_space<vmem>>, vector<1x16x16xbf16>
    %296 = vector.shape_cast %295 : vector<1x16x16xbf16> to vector<16x16xbf16>
    %cst_86 = arith.constant dense<0.000000e+00> : vector<256x16xf32>
    %297 = tpu.matmul %294, %296, %cst_86 {dimension_numbers = #tpu.dot_dimension_numbers<[1], [0], [0], [1], [0, 0, 1, 1], [], []>} : vector<256x16xbf16>, vector<16x16xbf16>, vector<256x16xf32> -> vector<256x16xf32>
    %298 = arith.addf %293, %297 : vector<256x16xf32>
    %299 = arith.truncf %288 : vector<256x16xf32> to vector<256x16xbf16>
    %c5 = arith.constant 5 : index
    %c0_87 = arith.constant 0 : index
    %c0_88 = arith.constant 0 : index
    %300 = vector.load %arg4[%c5, %c0_87, %c0_88] : memref<9x16x16xbf16, #tpu.memory_space<vmem>>, vector<1x16x16xbf16>
    %301 = vector.shape_cast %300 : vector<1x16x16xbf16> to vector<16x16xbf16>
    %cst_89 = arith.constant dense<0.000000e+00> : vector<256x16xf32>
    %302 = tpu.matmul %299, %301, %cst_89 {dimension_numbers = #tpu.dot_dimension_numbers<[1], [0], [0], [1], [0, 0, 1, 1], [], []>} : vector<256x16xbf16>, vector<16x16xbf16>, vector<256x16xf32> -> vector<256x16xf32>
    %303 = arith.addf %298, %302 : vector<256x16xf32>
    %c32_90 = arith.constant 32 : index
    %c0_91 = arith.constant 0 : index
    %304 = vector.load %arg9[%c32_90, %c0_91] : memref<288x16xf32, #tpu.memory_space<vmem>>, vector<256x16xf32>
    %c1_i32_92 = arith.constant 1 : i32
    %305 = tpu.dynamic_rotate %304 by %c1_i32_92 dim 0 : vector<256x16xf32>, i32 -> vector<256x16xf32>
    %cst_93 = arith.constant 0.000000e+00 : f32
    %306 = vector.broadcast %cst_93 : f32 to vector<256x16xf32>
    %307 = arith.select %256, %305, %306 : vector<256x16xi1>, vector<256x16xf32>
    %c255_i32_94 = arith.constant 255 : i32
    %308 = tpu.dynamic_rotate %304 by %c255_i32_94 dim 0 : vector<256x16xf32>, i32 -> vector<256x16xf32>
    %cst_95 = arith.constant 0.000000e+00 : f32
    %309 = vector.broadcast %cst_95 : f32 to vector<256x16xf32>
    %310 = arith.select %258, %308, %309 : vector<256x16xi1>, vector<256x16xf32>
    %311 = arith.truncf %307 : vector<256x16xf32> to vector<256x16xbf16>
    %c6 = arith.constant 6 : index
    %c0_96 = arith.constant 0 : index
    %c0_97 = arith.constant 0 : index
    %312 = vector.load %arg4[%c6, %c0_96, %c0_97] : memref<9x16x16xbf16, #tpu.memory_space<vmem>>, vector<1x16x16xbf16>
    %313 = vector.shape_cast %312 : vector<1x16x16xbf16> to vector<16x16xbf16>
    %cst_98 = arith.constant dense<0.000000e+00> : vector<256x16xf32>
    %314 = tpu.matmul %311, %313, %cst_98 {dimension_numbers = #tpu.dot_dimension_numbers<[1], [0], [0], [1], [0, 0, 1, 1], [], []>} : vector<256x16xbf16>, vector<16x16xbf16>, vector<256x16xf32> -> vector<256x16xf32>
    %315 = arith.addf %303, %314 : vector<256x16xf32>
    %316 = arith.truncf %304 : vector<256x16xf32> to vector<256x16xbf16>
    %c7 = arith.constant 7 : index
    %c0_99 = arith.constant 0 : index
    %c0_100 = arith.constant 0 : index
    %317 = vector.load %arg4[%c7, %c0_99, %c0_100] : memref<9x16x16xbf16, #tpu.memory_space<vmem>>, vector<1x16x16xbf16>
    %318 = vector.shape_cast %317 : vector<1x16x16xbf16> to vector<16x16xbf16>
    %cst_101 = arith.constant dense<0.000000e+00> : vector<256x16xf32>
    %319 = tpu.matmul %316, %318, %cst_101 {dimension_numbers = #tpu.dot_dimension_numbers<[1], [0], [0], [1], [0, 0, 1, 1], [], []>} : vector<256x16xbf16>, vector<16x16xbf16>, vector<256x16xf32> -> vector<256x16xf32>
    %320 = arith.addf %315, %319 : vector<256x16xf32>
    %321 = arith.truncf %310 : vector<256x16xf32> to vector<256x16xbf16>
    %c8 = arith.constant 8 : index
    %c0_102 = arith.constant 0 : index
    %c0_103 = arith.constant 0 : index
    %322 = vector.load %arg4[%c8, %c0_102, %c0_103] : memref<9x16x16xbf16, #tpu.memory_space<vmem>>, vector<1x16x16xbf16>
    %323 = vector.shape_cast %322 : vector<1x16x16xbf16> to vector<16x16xbf16>
    %cst_104 = arith.constant dense<0.000000e+00> : vector<256x16xf32>
    %324 = tpu.matmul %321, %323, %cst_104 {dimension_numbers = #tpu.dot_dimension_numbers<[1], [0], [0], [1], [0, 0, 1, 1], [], []>} : vector<256x16xbf16>, vector<16x16xbf16>, vector<256x16xf32> -> vector<256x16xf32>
    %325 = arith.addf %320, %324 : vector<256x16xf32>
    %c0_105 = arith.constant 0 : index
    %c0_106 = arith.constant 0 : index
    %326 = vector.load %arg5[%c0_105, %c0_106] : memref<1x16xf32, #tpu.memory_space<vmem>>, vector<1x16xf32>
    %327 = vector.broadcast %326 : vector<1x16xf32> to vector<256x16xf32>
    %328 = arith.addf %325, %327 : vector<256x16xf32>
    %c0_107 = arith.constant 0 : index
    %c0_108 = arith.constant 0 : index
    %329 = vector.load %arg6[%c0_107, %c0_108] : memref<1x16xf32, #tpu.memory_space<vmem>>, vector<1x16xf32>
    %330 = vector.broadcast %329 : vector<1x16xf32> to vector<256x16xf32>
    %331 = arith.mulf %328, %330 : vector<256x16xf32>
    %c0_109 = arith.constant 0 : index
    %c0_110 = arith.constant 0 : index
    %332 = vector.load %arg7[%c0_109, %c0_110] : memref<1x16xf32, #tpu.memory_space<vmem>>, vector<1x16xf32>
    %333 = vector.broadcast %332 : vector<1x16xf32> to vector<256x16xf32>
    %334 = arith.addf %331, %333 : vector<256x16xf32>
    %cst_111 = arith.constant 2.500000e-01 : f32
    %335 = vector.broadcast %cst_111 : f32 to vector<256x16xf32>
    %336 = arith.mulf %335, %334 : vector<256x16xf32>
    %337 = arith.addf %336, %5 : vector<256x16xf32>
    %cst_112 = arith.constant 0.000000e+00 : f32
    %338 = vector.broadcast %cst_112 : f32 to vector<256x16xf32>
    %339 = arith.maximumf %337, %338 : vector<256x16xf32>
    %c0_113 = arith.constant 0 : index
    %c0_114 = arith.constant 0 : index
    %c0_115 = arith.constant 0 : index
    %340 = vector.load %arg8[%c0_113, %c0_114, %c0_115] : memref<1x256x16xf32, #tpu.memory_space<vmem>>, vector<1x256x16xf32>
    %341 = vector.shape_cast %340 : vector<1x256x16xf32> to vector<256x16xf32>
    %342 = vector.shape_cast %339 : vector<256x16xf32> to vector<1x256x16xf32>
    tpu.vector_store %arg8[%c0_113, %c0_114, %c0_115], %342 {strides = array<i32>} : memref<1x256x16xf32, #tpu.memory_space<vmem>>, vector<1x256x16xf32>,
    return
  }
  func.func @transform_0(%arg0: i32) -> (i32, i32, i32) {
    %c0_i32 = arith.constant 0 : i32
    %c0_i32_0 = arith.constant 0 : i32
    %c0_i32_1 = arith.constant 0 : i32
    return %arg0, %c0_i32, %c0_i32_0 : i32, i32, i32
  }
  func.func @transform_1(%arg0: i32) -> (i32, i32) {
    %c0_i32 = arith.constant 0 : i32
    %c0_i32_0 = arith.constant 0 : i32
    %c0_i32_1 = arith.constant 0 : i32
    return %c0_i32, %c0_i32_0 : i32, i32
  }
  func.func @transform_2(%arg0: i32) -> (i32, i32) {
    %c0_i32 = arith.constant 0 : i32
    %c0_i32_0 = arith.constant 0 : i32
    %c0_i32_1 = arith.constant 0 : i32
    return %c0_i32, %c0_i32_0 : i32, i32
  }
  func.func @transform_3(%arg0: i32) -> (i32, i32, i32) {
    %c0_i32 = arith.constant 0 : i32
    %c0_i32_0 = arith.constant 0 : i32
    %c0_i32_1 = arith.constant 0 : i32
    %c0_i32_2 = arith.constant 0 : i32
    return %c0_i32, %c0_i32_0, %c0_i32_1 : i32, i32, i32
  }
  func.func @transform_4(%arg0: i32) -> (i32, i32) {
    %c0_i32 = arith.constant 0 : i32
    %c0_i32_0 = arith.constant 0 : i32
    %c0_i32_1 = arith.constant 0 : i32
    return %c0_i32, %c0_i32_0 : i32, i32
  }
  func.func @transform_5(%arg0: i32) -> (i32, i32) {
    %c0_i32 = arith.constant 0 : i32
    %c0_i32_0 = arith.constant 0 : i32
    %c0_i32_1 = arith.constant 0 : i32
    return %c0_i32, %c0_i32_0 : i32, i32
  }
  func.func @transform_6(%arg0: i32) -> (i32, i32) {
    %c0_i32 = arith.constant 0 : i32
    %c0_i32_0 = arith.constant 0 : i32
    %c0_i32_1 = arith.constant 0 : i32
    return %c0_i32, %c0_i32_0 : i32, i32
  }
  func.func @transform_7(%arg0: i32) -> (i32, i32, i32) {
    %c0_i32 = arith.constant 0 : i32
    %c0_i32_0 = arith.constant 0 : i32
    %c0_i32_1 = arith.constant 0 : i32
    return %arg0, %c0_i32, %c0_i32_0 : i32, i32, i32
  }
}

</mosaic_0001>

<bundles_post_ra>
// kernel: tpu_custom_call.1
= control target key start
LH: loop header
LB: loop body
LE: loop exit
PB: predicated region body
PF: predicated region fallthrough
CT: control target
= control target key end

     0   :  { %s6462_s24 = smov 0   ;;  %s9610_s0 = inlined_call_operand.vmem [shape: f32[2,256,16], index: 0, kind: input, shape index: {}]   ;;  %s9611_s1 = inlined_call_operand.vmem [shape: bf16[16,24], index: 1, kind: input, shape index: {}]   ;;  %s9612_s2 = inlined_call_operand.vmem [shape: f32[1,24], index: 2, kind: input, shape index: {}]   ;;  %s9613_s3 = inlined_call_operand.vmem [shape: bf16[9,16,16], index: 3, kind: input, shape index: {}]   ;;  %s9614_s4 = inlined_call_operand.vmem [shape: f32[1,16], index: 4, kind: input, shape index: {}]   ;;  %s9615_s5 = inlined_call_operand.vmem [shape: f32[1,16], index: 5, kind: input, shape index: {}]   ;;  %s9616_s6 = inlined_call_operand.vmem [shape: f32[1,16], index: 6, kind: input, shape index: {}]   ;;  %s9617_s7 = inlined_call_operand.vmem [shape: f32[2,256,16], index: 7, kind: output, shape index: {}]  }
   0x1 LB: > { %s5231_s25 = sadd.s32 4294967295, %s6417_s24   ;;  %p5235_p0 = scmp.ge.s32.totalorder %s6417_s24, 1  ;;  %s6417_s24 = sphi %s6462_s24, %s17_s24  }
   0x2   : > { %p237_p1 = scmp.lt.s32.totalorder %s6417_s24, 3 }
   0x4   : > { %p238_p2 = pnand %p5235_p0, %p237_p1 }
   0x6   : > { %241 = sbr.rel (%p238_p2) target bundleno = 2839 (0xb17), region = 48 }
   0xb   : > { %v6195_v0 = vld [vmem:[%s9611_s1] sm:$0xff]   ;;  %p269_p3 = scmp.lt.s32.totalorder %s5231_s25, 1  ;;  %vm9629_vm0 = vcmask 130048   ;;  %vm9631_vm1 = vcmask 31744   ;;  %s6419_s11 = smov 124   ;;  %vm9638_vm2 = vcmask 523264  }
   0xc   : > { %5700 = vmatprep.subr.bf16.mxu0 %v6195_v0  ;;  %v6558_v50 = vld [vmem:[%s9612_s2] ss:$0 sm:$0xff]  ;;  %s6420_s12 = smov 120  }
   0xd   : > { %s10442_s25 = smov (!%p269_p3, %s5231_s25), 1  ;;  %5701 = vmatpush3.bf16.msra.mxu0 %v6195_v0 }
   0xe   : > { %s5464_s28 = sshll.u32 %s10442_s25, 8 }
   0xf   : > { %s6481_s8 = scalar_lea.vmem %s9610_s0, %s5464_s28  ;;  %s9355_s22 = scalar_lea.vmem %s9617_s7, %s5464_s28 }
  0x10   : > { %v6484_v1 = vld [vmem:[%s6481_s8] sm:$0xff]  ;;  %v286_v2 = vld [vmem:[%s6481_s8 + $0x8] sm:$0xff]  ;;  %v6488_v3 = vld [vmem:[%s6481_s8 + $0x10] sm:$0xff] }
  0x11   : > { %v317_v4 = vpack.c.bf16 %v286_v2, %v6484_v1  ;;  %v288_v5 = vld [vmem:[%s6481_s8 + $0x18] sm:$0xff]  ;;  %v6493_v6 = vld [vmem:[%s6481_s8 + $0x20] sm:$0xff]  ;;  %v290_v7 = vld [vmem:[%s6481_s8 + $0x28] sm:$0xff] }
  0x12   : > { %v318_v8 = vpack.c.bf16 %v288_v5, %v6488_v3  ;;  %v319_v9 = vpack.c.bf16 %v290_v7, %v6493_v6  ;;  %v6502_v10 = vld [vmem:[%s6481_s8 + $0x30] sm:$0xff]  ;;  %v292_v11 = vld [vmem:[%s6481_s8 + $0x38] sm:$0xff]  ;;  %v6506_v12 = vld [vmem:[%s6481_s8 + $0x40] sm:$0xff] }
  0x13   : > { %5702 = vmatprep.mubr.msk.bf16.mxu0 %vm9629_vm0, %v317_v4  ;;  %v294_v13 = vld [vmem:[%s6481_s8 + $0x48] sm:$0xff]  ;;  %v320_v14 = vpack.c.bf16 %v292_v11, %v6502_v10  ;;  %v6514_v16 = vld [vmem:[%s6481_s8 + $0x50] sm:$0xff]  ;;  %v296_v17 = vld [vmem:[%s6481_s8 + $0x58] sm:$0xff] }
  0x14   : > { %5703 = vmatmul.mubr.msk.bf16.vlgmr.msra.gmra.mxu0 %vm9629_vm0, %v318_v8  ;;  %v321_v15 = vpack.c.bf16 %v294_v13, %v6506_v12  ;;  %v6518_v18 = vld [vmem:[%s6481_s8 + $0x60] sm:$0xff]  ;;  %v298_v19 = vld [vmem:[%s6481_s8 + $0x68] sm:$0xff]  ;;  %v322_v20 = vpack.c.bf16 %v296_v17, %v6514_v16  ;;  %v6526_v22 = vld [vmem:[%s6481_s8 + $0x70] sm:$0xff] }
  0x15   : > { %5706 = vmatprep.mubr.msk.bf16.mxu0 %vm9629_vm0, %v319_v9  ;;  %v323_v21 = vpack.c.bf16 %v298_v19, %v6518_v18  ;;  %v300_v23 = vld [vmem:[%s6481_s8 + $0x78] sm:$0xff]  ;;  %v301_v24 = vld [vmem:[%s6481_s8 + $0x80] sm:$0xff]  ;;  %v302_v25 = vld [vmem:[%s6481_s8 + $0x88] sm:$0xff] }
  0x16   : > { %v324_v26 = vpack.c.bf16 %v300_v23, %v6526_v22  ;;  %v325_v27 = vpack.c.bf16 %v302_v25, %v301_v24  ;;  %v303_v28 = vld [vmem:[%s6481_s8 + $0x90] sm:$0xff]  ;;  %v304_v29 = vld [vmem:[%s6481_s8 + $0x98] sm:$0xff]  ;;  %v305_v30 = vld [vmem:[%s6481_s8 + $0xa0] sm:$0xff] }
  0x17   : > { %v306_v31 = vld [vmem:[%s6481_s8 + $0xa8] sm:$0xff]  ;;  %v326_v32 = vpack.c.bf16 %v304_v29, %v303_v28  ;;  %v307_v34 = vld [vmem:[%s6481_s8 + $0xb0] sm:$0xff]  ;;  %v308_v35 = vld [vmem:[%s6481_s8 + $0xb8] sm:$0xff] }
  0x18   : > { %v327_v33 = vpack.c.bf16 %v306_v31, %v305_v30  ;;  %v309_v36 = vld [vmem:[%s6481_s8 + $0xc0] sm:$0xff]  ;;  %v310_v37 = vld [vmem:[%s6481_s8 + $0xc8] sm:$0xff]  ;;  %v328_v38 = vpack.c.bf16 %v308_v35, %v307_v34  ;;  %v311_v40 = vld [vmem:[%s6481_s8 + $0xd0] sm:$0xff] }
  0x19   : > { %v329_v39 = vpack.c.bf16 %v310_v37, %v309_v36  ;;  %v312_v41 = vld [vmem:[%s6481_s8 + $0xd8] sm:$0xff]  ;;  %v313_v43 = vld [vmem:[%s6481_s8 + $0xe0] sm:$0xff]  ;;  %v314_v44 = vld [vmem:[%s6481_s8 + $0xe8] sm:$0xff] }
  0x1a   : > { %v330_v42 = vpack.c.bf16 %v312_v41, %v311_v40  ;;  %v331_v45 = vpack.c.bf16 %v314_v44, %v313_v43  ;;  %v315_v46 = vld [vmem:[%s6481_s8 + $0xf0] sm:$0xff]  ;;  %v316_v47 = vld [vmem:[%s6481_s8 + $0xf8] sm:$0xff] }
  0x1b   : > { %v332_v48 = vpack.c.bf16 %v316_v47, %v315_v46 }
  0x1c   : > { %5707 = vmatmul.mubr.msk.bf16.gmra.mxu0 %vm9629_vm0, %v320_v14 }
  0x1d   : > { %5710 = vmatprep.mubr.msk.bf16.mxu0 %vm9629_vm0, %v321_v15 }
  0x24   : > { %5711 = vmatmul.mubr.msk.bf16.gmra.mxu0 %vm9629_vm0, %v322_v20 }
  0x25   : > { %5714 = vmatprep.mubr.msk.bf16.mxu0 %vm9629_vm0, %v323_v21 }
  0x2c   : > { %5715 = vmatmul.mubr.msk.bf16.gmra.mxu0 %vm9629_vm0, %v324_v26 }
  0x2d   : > { %5718 = vmatprep.mubr.msk.bf16.mxu0 %vm9629_vm0, %v325_v27 }
  0x34   : > { %5719 = vmatmul.mubr.msk.bf16.gmra.mxu0 %vm9629_vm0, %v326_v32 }
  0x35   : > { %5722 = vmatprep.mubr.msk.bf16.mxu0 %vm9629_vm0, %v327_v33 }
  0x3c   : > { %5723 = vmatmul.mubr.msk.bf16.gmra.mxu0 %vm9629_vm0, %v328_v38 }
  0x3d   : > { %5726 = vmatprep.mubr.msk.bf16.mxu0 %vm9629_vm0, %v329_v39 }
  0x44   : > { %5727 = vmatmul.mubr.msk.bf16.gmra.mxu0 %vm9629_vm0, %v330_v42 }
  0x45   : > { %5730 = vmatprep.mubr.msk.bf16.mxu0 %vm9629_vm0, %v331_v45 }
  0x4c   : > { %5731 = vmatmul.mubr.msk.bf16.gmra.mxu0 %vm9629_vm0, %v332_v48 }
  0xd4   : > { %v5704_v49 = vpop.f32.mrf.mxu0 }
  0xd5   : > { %v439_v52 = vadd.f32 %v5704_v49, %v6558_v50 }
  0xd6   : > { %v430_v51 = vpop.f32.mrf.mxu0 }
  0xd7   : > { %v431_v53 = vadd.f32 %v6558_v50, %v430_v51 }
  0xd8   : > { %v5705_v54 = vpop.f32.mrf.mxu0 }
  0xd9   : > { %v6562_v55 = vpack.c.bf16 %v439_v52, %v431_v53  ;;  %v442_v15 = vadd.f32 %v5705_v54, %v6558_v50 }
  0xda   : > { %v433_v56 = vpop.f32.mrf.mxu0 }
  0xdb   : > { %5742 = vmatprep.mubr.msk.bf16.mxu0 %vm9631_vm1, %v6562_v55  ;;  %v434_v11 = vadd.f32 %v6558_v50, %v433_v56 }
  0xdc   : > { %v5708_v57 = vpop.f32.mrf.mxu0 }
  0xdd   : > { %v455_v59 = vadd.f32 %v5708_v57, %v6558_v50  ;;  %v6584_v21 = vpack.c.bf16 %v442_v15, %v434_v11 }
  0xde   : > { %v446_v58 = vpop.f32.mrf.mxu0 }
  0xdf   : > { %v447_v60 = vadd.f32 %v6558_v50, %v446_v58 }
  0xe0   : > { %v5709_v61 = vpop.f32.mrf.mxu0 }
  0xe1   : > { %v6568_v62 = vpack.c.bf16 %v455_v59, %v447_v60  ;;  %v458_v32 = vadd.f32 %v5709_v61, %v6558_v50 }
  0xe2   : > { %v449_v63 = vpop.f32.mrf.mxu0 }
  0xe3   : > { %567 = vrot.lane.b32.xlu1 %v6568_v62, %s6419_s11  ;;  %v450_v30 = vadd.f32 %v6558_v50, %v449_v63 }
  0xe4   : > { %v5712_v0 = vpop.f32.mrf.mxu0 }
  0xe5   : > { %v471_v26 = vadd.f32 %v5712_v0, %v6558_v50  ;;  %v6610_v33 = vpack.c.bf16 %v458_v32, %v450_v30 }
  0xe6   : > { %v462_v2 = vpop.f32.mrf.mxu0 }
  0xe7   : > { %565 = vrot.lane.b32.xlu1 %v6562_v55, %s6419_s11  ;;  %v463_v23 = vadd.f32 %v6558_v50, %v462_v2 }
  0xe8   : > { %v5713_v4 = vpop.f32.mrf.mxu0 }
  0xe9   : > { %v474_v7 = vadd.f32 %v5713_v4, %v6558_v50  ;;  %v6594_v27 = vpack.c.bf16 %v471_v26, %v463_v23 }
  0xea   : > { %v465_v5 = vpop.f32.mrf.mxu0 }
  0xeb   : > { %v466_v8 = vadd.f32 %v6558_v50, %v465_v5 }
  0xec   : > { %v5716_v9 = vpop.f32.mrf.mxu0 }
  0xed   : > { %v6577_v13 = vpack.c.bf16 %v474_v7, %v466_v8  ;;  %v487_v17 = vadd.f32 %v5716_v9, %v6558_v50 }
  0xee   : > { %v478_v14 = vpop.f32.mrf.mxu0 }
  0xef   : > { %v479_v19 = vadd.f32 %v6558_v50, %v478_v14  ;;  %857 = vrot.lane.b32.xlu1 %v6577_v13, %s6419_s11 }
  0xf0   : > { %v5717_v20 = vpop.f32.mrf.mxu0 }
  0xf1   : > { %v6587_v24 = vpack.c.bf16 %v487_v17, %v479_v19  ;;  %v490_v29 = vadd.f32 %v5717_v20, %v6558_v50 }
  0xf2   : > { %v481_v25 = vpop.f32.mrf.mxu0 }
  0xf3   : > { %571 = vrot.lane.b32.xlu0 %v6587_v24, %s6419_s11  ;;  %853 = vrot.lane.b32.xlu1 %v6584_v21, %s6419_s11  ;;  %v482_v28 = vadd.f32 %v6558_v50, %v481_v25 }
  0xf4   : > { %v5720_v34 = vpop.f32.mrf.mxu0 }
  0xf5   : > { %v6603_v31 = vpack.c.bf16 %v490_v29, %v482_v28  ;;  %v503_v35 = vadd.f32 %v5720_v34, %v6558_v50 }
  0xf6   : > { %v494_v36 = vpop.f32.mrf.mxu0 }
  0xf7   : > { %569 = vrot.lane.b32.xlu0 %v6594_v27, %s6419_s11  ;;  %762 = vrot.lane.b32.xlu1 %v6587_v24, %s6420_s12  ;;  %v495_v37 = vadd.f32 %v6558_v50, %v494_v36 }
  0xf8   : > { %v6616_v38 = vpop.f32.mrf.mxu0 }
  0xf9   : > { %v6618_v39 = vpack.c.bf16 %v503_v35, %v495_v37 }
  0xfa   : > { %v6620_v40 = vpop.f32.mrf.mxu0 }
  0xfb   : > { %859 = vrot.lane.b32.xlu0 %v6603_v31, %s6419_s11  ;;  %760 = vrot.lane.b32.xlu1 %v6594_v27, %s6420_s12 }
  0xfc   : > { %v5724_v41 = vpop.f32.mrf.mxu0 }
  0xfd   : > { %v519_v42 = vadd.f32 %v5724_v41, %v6558_v50 }
  0xfe   : > { %v510_v43 = vpop.f32.mrf.mxu0 }
  0xff   : > { %855 = vrot.lane.b32.xlu0 %v6610_v33, %s6419_s11  ;;  %v511_v44 = vadd.f32 %v6558_v50, %v510_v43 }
 0x100   : > { %v6624_v45 = vpop.f32.mrf.mxu0 }
 0x101   : > { %v6626_v46 = vpack.c.bf16 %v519_v42, %v511_v44 }
 0x102   : > { %v6628_v47 = vpop.f32.mrf.mxu0 }
 0x104   : > { %v5728_v48 = vpop.f32.mrf.mxu0 }
 0x105   : > { %v535_v49 = vadd.f32 %v5728_v48, %v6558_v50 }
 0x106   : > { %v526_v51 = vpop.f32.mrf.mxu0 }
 0x107   : > { %v527_v52 = vadd.f32 %v6558_v50, %v526_v51 }
 0x108   : > { %v6632_v53 = vpop.f32.mrf.mxu0 }
 0x109   : > { %v6634_v54 = vpack.c.bf16 %v535_v49, %v527_v52 }
 0x10a   : > { %v6636_v56 = vpop.f32.mrf.mxu0 }
 0x10c   : > { %v5732_v57 = vpop.f32.mrf.mxu0 }
 0x10d   : > { %v551_v58 = vadd.f32 %v5732_v57, %v6558_v50 }
 0x10e   : > { %v542_v59 = vpop.f32.mrf.mxu0 }
 0x10f   : > { %v543_v60 = vadd.f32 %v6558_v50, %v542_v59 }
 0x111   : > { %v6640_v61 = vpack.c.bf16 %v551_v58, %v543_v60 }
 0x155   : > { %v568_v63 = vpop.permute.xlu1 %567 }
 0x156   : > { %v590_v14 = vsel %vm9631_vm1, %v568_v63, 0 }
 0x159   : > { %v566_v0 = vpop.permute.xlu1 %565 }
 0x15a   : > { %v587_v15 = vsel %vm9631_vm1, %v566_v0, 0 }
 0x161   : > { %v858_v2 = vpop.permute.xlu1 %857 }
 0x162   : > { %v880_v20 = vsel %vm9631_vm1, %v858_v2, 0 }
 0x165   : > { %v572_v4 = vpop.permute.xlu0 %571  ;;  %v854_v5 = vpop.permute.xlu1 %853 }
 0x166   : > { %6168 = vmatprep.subr.msk.bf16.mxu0 %vm9631_vm1, %v572_v4  ;;  %v596_v7 = vsel %vm9631_vm1, %v572_v4, 0  ;;  %v874_v26 = vsel %vm9631_vm1, %v854_v5, 0 }
 0x167   : > { %5735 = vmatpush3.bf16.xpose.msra.mxu0 %v596_v7 }
 0x169   : > { %v570_v8 = vpop.permute.xlu0 %569  ;;  %v763_v9 = vpop.permute.xlu1 %762 }
 0x16a   : > { %6169 = vmatprep.subr.msk.bf16.mxu0 %vm9631_vm1, %v570_v8  ;;  %5750 = vmatprep.subr.bf16.mxu1 %v763_v9  ;;  %v593_v50 = vsel %vm9631_vm1, %v570_v8, 0 }
 0x16b   : > { %5751 = vmatpush3.bf16.msra.mxu1 %v763_v9 }
 0x16d   : > { %v761_v11 = vpop.permute.xlu1 %760  ;;  %v860_v17 = vpop.permute.xlu0 %859 }
 0x16e   : > { %5752 = vmatprep.subr.bf16.mxu1 %v761_v11  ;;  %v883_v19 = vsel %vm9631_vm1, %v860_v17, 0 }
 0x16f   : > { %5737 = vmatpush3.bf16.xpose.msra.mxu0 %v593_v50  ;;  %5753 = vmatpush3.bf16.msra.mxu1 %v761_v11 }
 0x170   : > { %6170 = vmatprep.subr.msk.bf16.mxu0 %vm9631_vm1, %v568_v63 }
 0x171   : > { %v856_v23 = vpop.permute.xlu0 %855 }
 0x172   : > { %v877_v25 = vsel %vm9631_vm1, %v856_v23, 0 }
 0x177   : > { %5739 = vmatpush3.bf16.xpose.msra.mxu0 %v590_v14 }
 0x178   : > { %6171 = vmatprep.subr.msk.bf16.mxu0 %vm9631_vm1, %v566_v0 }
 0x17f   : > { %5741 = vmatpush3.bf16.xpose.msra.mxu0 %v587_v15 }
 0x180   : > { %6172 = vmatprep.subr.msk.bf16.mxu0 %vm9631_vm1, %v860_v17 }
 0x186   : > { %5743 = vmatmul.mubr.msk.bf16.vlgmr.msra.gmra.mxu0 %vm9631_vm1, %v6568_v62 }
 0x187   : > { %5746 = vmatprep.mubr.msk.bf16.mxu0 %vm9631_vm1, %v6594_v27  ;;  %5767 = vmatpush3.bf16.xpose.msra.mxu0 %v883_v19 }
 0x188   : > { %6173 = vmatprep.subr.msk.bf16.mxu0 %vm9631_vm1, %v858_v2 }
 0x18e   : > { %5747 = vmatmul.mubr.msk.bf16.gmra.mxu0 %vm9631_vm1, %v6587_v24  ;;  %v6672_v24 = vpop.f32.mrf.mxu0 }
 0x18f   : > { %5769 = vmatpush3.bf16.xpose.msra.mxu0 %v880_v20  ;;  %5774 = vmatprep.mubr.msk.bf16.mxu0 %vm9631_vm1, %v6584_v21 }
 0x190   : > { %6174 = vmatprep.subr.msk.bf16.mxu0 %vm9631_vm1, %v856_v23  ;;  %v6674_v27 = vpop.f32.mrf.mxu0 }
 0x197   : > { %5771 = vmatpush3.bf16.xpose.msra.mxu0 %v877_v25 }
 0x198   : > { %6175 = vmatprep.subr.msk.bf16.mxu0 %vm9631_vm1, %v854_v5 }
 0x19f   : > { %5773 = vmatpush3.bf16.xpose.msra.mxu0 %v874_v26 }
 0x1a6   : > { %5775 = vmatmul.mubr.msk.bf16.vlgmr.msra.gmra.mxu0 %vm9631_vm1, %v6610_v33 }
 0x1a7   : > { %5778 = vmatprep.mubr.msk.bf16.mxu0 %vm9631_vm1, %v6577_v13 }
 0x1ae   : > { %5779 = vmatmul.mubr.msk.bf16.gmra.mxu0 %vm9631_vm1, %v6603_v31 }
 0x246   : > { %v5744_v28 = vpop.f32.mrf.mxu0 }
 0x247   : > { %v670_v29 = vsel %vm9638_vm2, %v5744_v28, -inf }
 0x248   : > { %671 = vmax.xlane.f32.xlu0 %v670_v29  ;;  %v632_v30 = vpop.f32.mrf.mxu0 }
 0x249   : > { %v664_v34 = vsel %vm9638_vm2, %v632_v30, -inf }
 0x24a   : > { %v6677_v32 = vpop.f32.mrf.mxu0 }
 0x24b   : > { %v673_v41 = vsel %vm9638_vm2, %v6677_v32, -inf }
 0x24c   : > { %665 = vmax.xlane.f32.xlu0 %v664_v34  ;;  %v635_v35 = vpop.f32.mrf.mxu0 }
 0x24d   : > { %v667_v36 = vsel %vm9638_vm2, %v635_v35, -inf }
 0x24e   : > { %668 = vmax.xlane.f32.xlu1 %v667_v36  ;;  %v5748_v37 = vpop.f32.mrf.mxu0 }
 0x24f   : > { %v682_v43 = vsel %vm9638_vm2, %v5748_v37, -inf }
 0x250   : > { %674 = vmax.xlane.f32.xlu0 %v673_v41  ;;  %v6683_v42 = vpop.f32.mrf.mxu0 }
 0x251   : > { %v676_v51 = vsel %vm9638_vm2, %v6683_v42, -inf }
 0x252   : > { %683 = vmax.xlane.f32.xlu1 %v682_v43  ;;  %v5749_v44 = vpop.f32.mrf.mxu0 }
 0x253   : > { %v685_v48 = vsel %vm9638_vm2, %v5749_v44, -inf }
 0x254   : > { %686 = vmax.xlane.f32.xlu0 %v685_v48  ;;  %v6687_v49 = vpop.f32.mrf.mxu0 }
 0x255   : > { %v679_v52 = vsel %vm9638_vm2, %v6687_v49, -inf }
 0x256   : > { %677 = vmax.xlane.f32.xlu1 %v676_v51 }
 0x258   : > { %680 = vmax.xlane.f32.xlu0 %v679_v52 }
 0x266   : > { %v6693_v57 = vpop.f32.mrf.mxu0 }
 0x267   : > { %v956_v58 = vsel %vm9638_vm2, %v6693_v57, -inf }
 0x268   : > { %957 = vmax.xlane.f32.xlu1 %v956_v58  ;;  %v6697_v59 = vpop.f32.mrf.mxu0 }
 0x269   : > { %v950_v63 = vsel %vm9638_vm2, %v6697_v59, -inf }
 0x26a   : > { %v6699_v60 = vpop.f32.mrf.mxu0 }
 0x26b   : > { %v959_v0 = vsel %vm9638_vm2, %v6699_v60, -inf }
 0x26c   : > { %951 = vmax.xlane.f32.xlu1 %v950_v63  ;;  %v6705_v2 = vpop.f32.mrf.mxu0  ;;  %960 = vmax.xlane.f32.xlu0 %v959_v0 }
 0x26d   : > { %v953_v4 = vsel %vm9638_vm2, %v6705_v2, -inf }
 0x26e   : > { %v6717_v5 = vpop.f32.mrf.mxu0 }
 0x270   : > { %954 = vmax.xlane.f32.xlu0 %v953_v4  ;;  %v6719_v7 = vpop.f32.mrf.mxu0 }
 0x272   : > { %v6721_v8 = vpop.f32.mrf.mxu0 }
 0x273   : > { %v971_v9 = vsel %vm9638_vm2, %v6721_v8, -inf }
 0x274   : > { %v6725_v11 = vpop.f32.mrf.mxu0 }
 0x27d   : > { %756 = vrot.lane.b32.xlu1 %v6562_v55, %s6420_s12  ;;  %v968_v55 = vsel %vm9638_vm2, %v6717_v5, -inf }
 0x281   : > { %1048 = vrot.lane.b32.xlu1 %v6603_v31, %s6420_s12 }
 0x285   : > { %1046 = vrot.lane.b32.xlu1 %v6577_v13, %s6420_s12  ;;  %v965_v13 = vsel %vm9638_vm2, %v6725_v11, -inf }
 0x286   : > { %758 = vrot.lane.b32.xlu0 %v6568_v62, %s6420_s12  ;;  %v962_v62 = vsel %vm9638_vm2, %v6719_v7, -inf }
 0x2a5   : > { %972 = vmax.xlane.f32.xlu0 %v971_v9 }
 0x2a9   : > { %969 = vmax.xlane.f32.xlu1 %v968_v55  ;;  %966 = vmax.xlane.f32.xlu0 %v965_v13 }
 0x2ad   : > { %963 = vmax.xlane.f32.xlu1 %v962_v62 }
 0x2be   : > { %1044 = vrot.lane.b32.xlu1 %v6610_v33, %s6420_s12 }
 0x2d1   : > { %v672_v31 = vpop.xlane.xlu0 %671 }
 0x2d2   : > { %v690_v50 = vsub.f32 %v5744_v28, %v672_v31 }
 0x2d4   : > { %v700_v14 = vmul.f32 1.442695, %v690_v50 }
 0x2d5   : > { %v666_v15 = vpop.xlane.xlu0 %665 }
 0x2d6   : > { %6205 = vpow2.f32 %v700_v14  ;;  %v688_v17 = vsub.f32 %v632_v30, %v666_v15 }
 0x2d7   : > { %v669_v19 = vpop.xlane.xlu1 %668 }
 0x2d8   : > { %v696_v20 = vmul.f32 1.442695, %v688_v17  ;;  %v689_v23 = vsub.f32 %v635_v35, %v669_v19 }
 0x2d9   : > { %v675_v25 = vpop.xlane.xlu0 %674 }
 0x2da   : > { %6207 = vpow2.f32 %v696_v20  ;;  %v691_v26 = vsub.f32 %v6677_v32, %v675_v25  ;;  %v698_v29 = vmul.f32 1.442695, %v689_v23 }
 0x2db   : > { %v684_v34 = vpop.xlane.xlu1 %683 }
 0x2dc   : > { %v702_v36 = vmul.f32 1.442695, %v691_v26  ;;  %v694_v41 = vsub.f32 %v5748_v37, %v684_v34 }
 0x2dd   : > { %v687_v43 = vpop.xlane.xlu0 %686 }
 0x2de   : > { %6209 = vpow2.f32 %v702_v36  ;;  %v708_v33 = vmul.f32 1.442695, %v694_v41  ;;  %v695_v48 = vsub.f32 %v5749_v44, %v687_v43 }
 0x2df   : > { %6211 = vpow2.f32 %v698_v29  ;;  %v678_v28 = vpop.xlane.xlu1 %677 }
 0x2e0   : > { %6213 = vpow2.f32 %v708_v33  ;;  %v710_v51 = vmul.f32 1.442695, %v695_v48  ;;  %v692_v30 = vsub.f32 %v6683_v42, %v678_v28 }
 0x2e1   : > { %v681_v52 = vpop.xlane.xlu0 %680 }
 0x2e2   : > { %v704_v35 = vmul.f32 1.442695, %v692_v30  ;;  %v693_v58 = vsub.f32 %v6687_v49, %v681_v52  ;;  %6215 = vpow2.f32 %v710_v51 }
 0x2e3   : > { %v6738_v63 = vpop.eup %6205 }
 0x2e4   : > { %6217 = vpow2.f32 %v704_v35  ;;  %v706_v32 = vmul.f32 1.442695, %v693_v58  ;;  %v718_v37 = vsel %vm9638_vm2, %v6738_v63, 0.0 }
 0x2e5   : > { %719 = vadd.xlane.f32.xlu1 %v718_v37 }
 0x2e6   : > { %6219 = vpow2.f32 %v706_v32 }
 0x2e7   : > { %v6742_v44 = vpop.eup %6207 }
 0x2e8   : > { %v712_v0 = vsel %vm9638_vm2, %v6742_v44, 0.0 }
 0x2e9   : > { %713 = vadd.xlane.f32.xlu1 %v712_v0 }
 0x2eb   : > { %v6746_v42 = vpop.eup %6209 }
 0x2ec   : > { %v6748_v4 = vpop.eup %6211  ;;  %v721_v49 = vsel %vm9638_vm2, %v6746_v42, 0.0 }
 0x2ed   : > { %v6752_v9 = vpop.eup %6213  ;;  %722 = vadd.xlane.f32.xlu0 %v721_v49  ;;  %v715_v62 = vsel %vm9638_vm2, %v6748_v4, 0.0 }
 0x2ee   : > { %v730_v55 = vsel %vm9638_vm2, %v6752_v9, 0.0 }
 0x2ef   : > { %731 = vadd.xlane.f32.xlu1 %v730_v55  ;;  %v6756_v13 = vpop.eup %6215 }
 0x2f0   : > { %v733_v19 = vsel %vm9638_vm2, %v6756_v13, 0.0 }
 0x2f1   : > { %v6760_v31 = vpop.eup %6217  ;;  %v958_v50 = vpop.xlane.xlu1 %957  ;;  %716 = vadd.xlane.f32.xlu0 %v715_v62 }
 0x2f2   : > { %v976_v14 = vsub.f32 %v6693_v57, %v958_v50  ;;  %v724_v15 = vsel %vm9638_vm2, %v6760_v31, 0.0 }
 0x2f3   : > { %725 = vadd.xlane.f32.xlu1 %v724_v15  ;;  %v6767_v20 = vpop.eup %6219 }
 0x2f4   : > { %v986_v17 = vmul.f32 1.442695, %v976_v14  ;;  %v727_v36 = vsel %vm9638_vm2, %v6767_v20, 0.0 }
 0x2f5   : > { %v952_v23 = vpop.xlane.xlu1 %951  ;;  %734 = vadd.xlane.f32.xlu0 %v733_v19  ;;  %v961_v25 = vpop.xlane.xlu0 %960 }
 0x2f6   : > { %6221 = vpow2.f32 %v986_v17  ;;  %v974_v26 = vsub.f32 %v6697_v59, %v952_v23  ;;  %v977_v29 = vsub.f32 %v6699_v60, %v961_v25 }
 0x2f8   : > { %v982_v34 = vmul.f32 1.442695, %v974_v26  ;;  %v988_v57 = vmul.f32 1.442695, %v977_v29 }
 0x2f9   : > { %728 = vadd.xlane.f32.xlu0 %v727_v36  ;;  %v955_v41 = vpop.xlane.xlu0 %954  ;;  %v757_v48 = vpop.permute.xlu1 %756 }
 0x2fa   : > { %6223 = vpow2.f32 %v982_v34  ;;  %v975_v43 = vsub.f32 %v6705_v2, %v955_v41 }
 0x2fb   : > { %6225 = vpow2.f32 %v988_v57 }
 0x2fc   : > { %v984_v33 = vmul.f32 1.442695, %v975_v43 }
 0x2fd   : > { %v759_v28 = vpop.permute.xlu0 %758  ;;  %v6776_v60 = vpop.permute.xlu1 %1048 }
 0x2fe   : > { %5754 = vmatprep.subr.bf16.mxu1 %v759_v28  ;;  %6227 = vpow2.f32 %v984_v33 }
 0x2ff   : > { %5755 = vmatpush3.bf16.msra.mxu1 %v759_v28 }
 0x300   : > { %5756 = vmatprep.subr.bf16.mxu1 %v757_v48 }
 0x301   : > { %v6799_v37 = vpop.permute.xlu1 %1046 }
 0x303   : > { %v6774_v59 = vpop.eup %6221  ;;  %5757 = vmatpush3.bf16.msra.mxu1 %v757_v48 }
 0x304   : > { %1193 = vrot.lane.b32.xlu1 %v6640_v61, %s6419_s11  ;;  %5782 = vmatprep.subr.bf16.mxu1 %v6776_v60  ;;  %v1004_v2 = vsel %vm9638_vm2, %v6774_v59, 0.0 }
 0x305   : > { %1005 = vadd.xlane.f32.xlu0 %v1004_v2 }
 0x307   : > { %v6783_v51 = vpop.eup %6223 }
 0x308   : > { %1191 = vrot.lane.b32.xlu1 %v6634_v54, %s6419_s11  ;;  %v998_v30 = vsel %vm9638_vm2, %v6783_v51, 0.0  ;;  %v6789_v52 = vpop.eup %6225 }
 0x309   : > { %999 = vadd.xlane.f32.xlu0 %v998_v30  ;;  %v1007_v35 = vsel %vm9638_vm2, %v6789_v52, 0.0 }
 0x30b   : > { %v6793_v58 = vpop.eup %6227 }
 0x30c   : > { %v1001_v32 = vsel %vm9638_vm2, %v6793_v58, 0.0 }
 0x30d   : > { %1008 = vadd.xlane.f32.xlu0 %v1007_v35 }
 0x311   : > { %1002 = vadd.xlane.f32.xlu0 %v1001_v32 }
 0x327   : > { %1042 = vrot.lane.b32.xlu0 %v6584_v21, %s6420_s12 }
 0x32e   : > { %v973_v0 = vpop.xlane.xlu0 %972 }
 0x32f   : > { %v981_v14 = vsub.f32 %v6721_v8, %v973_v0 }
 0x331   : > { %v996_v25 = vmul.f32 1.442695, %v981_v14 }
 0x332   : > { %v970_v49 = vpop.xlane.xlu1 %969  ;;  %v967_v55 = vpop.xlane.xlu0 %966 }
 0x333   : > { %v980_v62 = vsub.f32 %v6717_v5, %v970_v49  ;;  %v979_v50 = vsub.f32 %v6725_v11, %v967_v55 }
 0x335   : > { %v994_v15 = vmul.f32 1.442695, %v980_v62  ;;  %v992_v17 = vmul.f32 1.442695, %v979_v50 }
 0x336   : > { %v964_v19 = vpop.xlane.xlu1 %963 }
 0x337   : > { %6229 = vpow2.f32 %v994_v15  ;;  %v978_v23 = vsub.f32 %v6719_v7, %v964_v19 }
 0x338   : > { %6231 = vpow2.f32 %v992_v17 }
 0x339   : > { %v990_v21 = vmul.f32 1.442695, %v978_v23 }
 0x33a   : > { %v1045_v36 = vpop.permute.xlu1 %1044 }
 0x33b   : > { %6233 = vpow2.f32 %v990_v21 }
 0x33c   : > { %6235 = vpow2.f32 %v996_v25 }
 0x344   : > { %v6805_v26 = vpop.eup %6229 }
 0x345   : > { %v1016_v5 = vsel %vm9638_vm2, %v6805_v26, 0.0  ;;  %v6809_v29 = vpop.eup %6231 }
 0x346   : > { %1017 = vadd.xlane.f32.xlu0 %v1016_v5  ;;  %v1013_v7 = vsel %vm9638_vm2, %v6809_v29, 0.0 }
 0x348   : > { %v6811_v8 = vpop.eup %6233 }
 0x349   : > { %v1010_v11 = vsel %vm9638_vm2, %v6811_v8, 0.0  ;;  %v6817_v34 = vpop.eup %6235 }
 0x34a   : > { %1011 = vadd.xlane.f32.xlu1 %v1010_v11  ;;  %1014 = vadd.xlane.f32.xlu0 %v1013_v7  ;;  %v1019_v57 = vsel %vm9638_vm2, %v6817_v34, 0.0 }
 0x34e   : > { %1020 = vadd.xlane.f32.xlu1 %v1019_v57 }
 0x35f   : > { %1187 = vrot.lane.b32.xlu1 %v6618_v39, %s6419_s11 }
 0x360   : > { %1189 = vrot.lane.b32.xlu0 %v6626_v46, %s6419_s11 }
 0x363   : > { %1382 = vrot.lane.b32.xlu1 %v6640_v61, %s6420_s12 }
 0x36e   : > { %v720_v41 = vpop.xlane.xlu1 %719 }
 0x372   : > { %v714_v43 = vpop.xlane.xlu1 %713 }
 0x376   : > { %v723_v33 = vpop.xlane.xlu0 %722 }
 0x377   : > { %6237 = vrcp.f32 %v723_v33 }
 0x378   : > { %v732_v48 = vpop.xlane.xlu1 %731  ;;  %6239 = vrcp.f32 %v714_v43 }
 0x379   : > { %6241 = vrcp.f32 %v720_v41 }
 0x37a   : > { %v717_v28 = vpop.xlane.xlu0 %716 }
 0x37b   : > { %6243 = vrcp.f32 %v717_v28 }
 0x37c   : > { %v726_v2 = vpop.xlane.xlu1 %725 }
 0x37e   : > { %v735_v30 = vpop.xlane.xlu0 %734 }
 0x37f   : > { %6245 = vrcp.f32 %v735_v30 }
 0x380   : > { %6247 = vrcp.f32 %v726_v2 }
 0x381   : > { %6249 = vrcp.f32 %v732_v48 }
 0x382   : > { %v729_v35 = vpop.xlane.xlu0 %728 }
 0x383   : > { %6251 = vrcp.f32 %v729_v35 }
 0x384   : > { %v6238_v32 = vpop.eup %6237 }
 0x385   : > { %v6240_v0 = vpop.eup %6239  ;;  %v747_v62 = vmul.f32 %v6238_v32, %v6746_v42 }
 0x386   : > { %v6242_v49 = vpop.eup %6241  ;;  %v744_v50 = vmul.f32 %v6240_v0, %v6742_v44 }
 0x387   : > { %v746_v15 = vmul.f32 %v6242_v49, %v6738_v63 }
 0x388   : > { %v6244_v55 = vpop.eup %6243 }
 0x389   : > { %v745_v14 = vmul.f32 %v6244_v55, %v6748_v4  ;;  %v753_v19 = vpack.c.bf16 %v747_v62, %v746_v15 }
 0x38b   : > { %v752_v17 = vpack.c.bf16 %v745_v14, %v744_v50 }
 0x38c   : > { %v6246_v23 = vpop.eup %6245 }
 0x38d   : > { %5758 = vmatprep.mubr.msk.bf16.mxu1 %vm9638_vm2, %v752_v17  ;;  %v6248_v25 = vpop.eup %6247  ;;  %v751_v44 = vmul.f32 %v6246_v23, %v6756_v13 }
 0x38e   : > { %5759 = vmatmul.mubr.msk.bf16.vlgmr.msra.gmra.mxu1 %vm9638_vm2, %v753_v19  ;;  %v1006_v21 = vpop.xlane.xlu0 %1005  ;;  %v6250_v5 = vpop.eup %6249  ;;  %v748_v42 = vmul.f32 %v6248_v25, %v6760_v31 }
 0x38f   : > { %5783 = vmatpush3.bf16.msra.mxu1 %v6776_v60  ;;  %v750_v7 = vmul.f32 %v6250_v5, %v6752_v9 }
 0x390   : > { %v6252_v11 = vpop.eup %6251  ;;  %5784 = vmatprep.subr.bf16.mxu1 %v6799_v37 }
 0x391   : > { %v749_v63 = vmul.f32 %v6252_v11, %v6767_v20  ;;  %v755_v41 = vpack.c.bf16 %v751_v44, %v750_v7  ;;  %v1194_v20 = vpop.permute.xlu1 %1193 }
 0x392   : > { %v1000_v4 = vpop.xlane.xlu0 %999  ;;  %v1217_v32 = vsel %vm9631_vm1, %v1194_v20, 0 }
 0x393   : > { %5785 = vmatpush3.bf16.msra.mxu1 %v6799_v37  ;;  %v754_v57 = vpack.c.bf16 %v749_v63, %v748_v42 }
 0x394   : > { %5786 = vmatprep.subr.bf16.mxu1 %v1045_v36 }
 0x395   : > { %5762 = vmatprep.mubr.msk.bf16.mxu1 %vm9638_vm2, %v754_v57  ;;  %v1192_v0 = vpop.permute.xlu1 %1191 }
 0x396   : > { %5763 = vmatmul.mubr.msk.bf16.gmra.mxu1 %vm9638_vm2, %v755_v41  ;;  %v1009_v60 = vpop.xlane.xlu0 %1008 }
 0x397   : > { %5787 = vmatpush3.bf16.msra.mxu1 %v1045_v36  ;;  %6253 = vrcp.f32 %v1009_v60 }
 0x398   : > { %6255 = vrcp.f32 %v1000_v4 }
 0x399   : > { %6257 = vrcp.f32 %v1006_v21 }
 0x39a   : > { %v1003_v13 = vpop.xlane.xlu0 %1002 }
 0x39b   : > { %6259 = vrcp.f32 %v1003_v13 }
 0x39e   : > { %v1043_v31 = vpop.permute.xlu0 %1042 }
 0x39f   : > { %5788 = vmatprep.subr.bf16.mxu1 %v1043_v31 }
 0x3a0   : > { %5789 = vmatpush3.bf16.msra.mxu1 %v1043_v31 }
 0x3a1   : > { %6176 = vmatprep.subr.msk.bf16.mxu1 %vm9631_vm1, %v1194_v20 }
 0x3a4   : > { %v6254_v9 = vpop.eup %6253 }
 0x3a5   : > { %v6256_v37 = vpop.eup %6255  ;;  %v1033_v48 = vmul.f32 %v6254_v9, %v6789_v52  ;;  %v1214_v52 = vsel %vm9631_vm1, %v1192_v0, 0 }
 0x3a6   : > { %v6258_v43 = vpop.eup %6257  ;;  %v1030_v28 = vmul.f32 %v6256_v37, %v6783_v51 }
 0x3a7   : > { %v1032_v2 = vmul.f32 %v6258_v43, %v6774_v59  ;;  %v6421_v59 = vmov 0.0  }
 0x3a8   : > { %v6260_v33 = vpop.eup %6259  ;;  %281 = vst.msk [vmem:[#allocation2] sm:$0xff] %vm9629_vm0, %v6421_v59  ;;  %282 = vst.msk [vmem:[#allocation2 + $0x8] sm:$0xff] %vm9629_vm0, %v6421_v59 }
 0x3a9   : > { %v1031_v36 = vmul.f32 %v6260_v33, %v6793_v58  ;;  %v1039_v35 = vpack.c.bf16 %v1033_v48, %v1032_v2  ;;  %283 = vst.msk [vmem:[#allocation2 + $0x110] sm:$0xff] %vm9629_vm0, %v6421_v59  ;;  %284 = vst.msk [vmem:[#allocation2 + $0x118] sm:$0xff] %vm9629_vm0, %v6421_v59 }
 0x3ab   : > { %v1038_v30 = vpack.c.bf16 %v1031_v36, %v1030_v28 }
 0x3ad   : > { %5790 = vmatprep.mubr.msk.bf16.mxu1 %vm9638_vm2, %v1038_v30 }
 0x3ae   : > { %5791 = vmatmul.mubr.msk.bf16.vlgmr.msra.gmra.mxu1 %vm9638_vm2, %v1039_v35 }
 0x3af   : > { %5799 = vmatpush3.bf16.xpose.msra.mxu1 %v1217_v32 }
 0x3b0   : > { %6177 = vmatprep.subr.msk.bf16.mxu1 %vm9631_vm1, %v1192_v0 }
 0x3b7   : > { %5801 = vmatpush3.bf16.xpose.msra.mxu1 %v1214_v52  ;;  %v6333_v52 = vld [vmem:[%s6481_s8 + $0x28] sm:$0xff] }
 0x3cf   : > { %v1018_v51 = vpop.xlane.xlu0 %1017 }
 0x3d3   : > { %v1012_v49 = vpop.xlane.xlu1 %1011  ;;  %v1015_v58 = vpop.xlane.xlu0 %1014 }
 0x3d4   : > { %6261 = vrcp.f32 %v1012_v49 }
 0x3d5   : > { %6263 = vrcp.f32 %v1015_v58 }
 0x3d6   : > { %6265 = vrcp.f32 %v1018_v51 }
 0x3d7   : > { %v1021_v55 = vpop.xlane.xlu1 %1020  ;;  %v1190_v62 = vpop.permute.xlu0 %1189 }
 0x3d8   : > { %6267 = vrcp.f32 %v1021_v55  ;;  %v1211_v50 = vsel %vm9631_vm1, %v1190_v62, 0  ;;  %6178 = vmatprep.subr.msk.bf16.mxu1 %vm9631_vm1, %v1190_v62 }
 0x3d9   : > { %5803 = vmatpush3.bf16.xpose.msra.mxu1 %v1211_v50 }
 0x3db   : > { %v1188_v14 = vpop.permute.xlu1 %1187 }
 0x3dc   : > { %6179 = vmatprep.subr.msk.bf16.mxu1 %vm9631_vm1, %v1188_v14  ;;  %v1208_v17 = vsel %vm9631_vm1, %v1188_v14, 0  ;;  %v6334_v14 = vld [vmem:[%s6481_s8 + $0x8] sm:$0xff] }
 0x3df   : > { %v1383_v15 = vpop.permute.xlu1 %1382 }
 0x3e0   : > { %5814 = vmatprep.subr.bf16.mxu0 %v1383_v15 }
 0x3e1   : > { %v6262_v19 = vpop.eup %6261  ;;  %5805 = vmatpush3.bf16.xpose.msra.mxu1 %v1208_v17  ;;  %5815 = vmatpush3.bf16.msra.mxu0 %v1383_v15 }
 0x3e2   : > { %v6264_v23 = vpop.eup %6263  ;;  %v1034_v25 = vmul.f32 %v6262_v19, %v6811_v8 }
 0x3e3   : > { %v6266_v21 = vpop.eup %6265  ;;  %v1035_v5 = vmul.f32 %v6264_v23, %v6809_v29 }
 0x3e4   : > { %v1036_v42 = vmul.f32 %v6266_v21, %v6805_v26 }
 0x3e5   : > { %v6268_v11 = vpop.eup %6267  ;;  %v1040_v44 = vpack.c.bf16 %v1035_v5, %v1034_v25 }
 0x3e6   : > { %v1037_v63 = vmul.f32 %v6268_v11, %v6817_v34 }
 0x3e7   : > { %5794 = vmatprep.mubr.msk.bf16.mxu1 %vm9638_vm2, %v1040_v44 }
 0x3e8   : > { %v1041_v4 = vpack.c.bf16 %v1037_v63, %v1036_v42  ;;  %v6335_v42 = vld [vmem:[%s6481_s8 + $0x38] sm:$0xff] }
 0x3ea   : > { %5795 = vmatmul.mubr.msk.bf16.gmra.mxu1 %vm9638_vm2, %v1041_v4 }
 0x3eb   : > { %5806 = vmatprep.mubr.msk.bf16.mxu1 %vm9631_vm1, %v6618_v39 }
 0x3f2   : > { %5807 = vmatmul.mubr.msk.bf16.vlgmr.msra.gmra.mxu1 %vm9631_vm1, %v6626_v46 }
 0x3f3   : > { %5810 = vmatprep.mubr.msk.bf16.mxu1 %vm9631_vm1, %v6634_v54 }
 0x3fa   : > { %5811 = vmatmul.mubr.msk.bf16.gmra.mxu1 %vm9631_vm1, %v6640_v61 }
 0x44e   : > { %v5760_v26 = vpop.f32.mrf.mxu1 }
 0x44f   : > { %v1143_v29 = vmul.f32 0.5, %v5760_v26 }
 0x450   : > { %v814_v8 = vpop.f32.mrf.mxu1 }
 0x451   : > { %v1145_v34 = vadd.f32 %v1143_v29, %v6493_v6  ;;  %v1131_v7 = vmul.f32 0.5, %v814_v8 }
 0x452   : > { %v5761_v57 = vpop.f32.mrf.mxu1 }
 0x453   : > { %1147 = vst.msk [vmem:[#allocation2 + $0x30] sm:$0xff] %vm9629_vm0, %v1145_v34  ;;  %v1133_v41 = vadd.f32 %v1131_v7, %v6484_v1  ;;  %v1149_v60 = vmul.f32 0.5, %v5761_v57  ;;  %v6336_v57 = vld [vmem:[%s6481_s8 + $0x18] sm:$0xff] }
 0x454   : > { %v817_v13 = vpop.f32.mrf.mxu1 }
 0x455   : > { %1135 = vst.msk [vmem:[#allocation2 + $0x10] sm:$0xff] %vm9629_vm0, %v1133_v41  ;;  %v1151_v31 = vadd.f32 %v1149_v60, %v6502_v10  ;;  %v1137_v20 = vmul.f32 0.5, %v817_v13 }
 0x456   : > { %v5764_v9 = vpop.f32.mrf.mxu1 }
 0x457   : > { %1153 = vst.msk [vmem:[#allocation2 + $0x40] sm:$0xff] %vm9629_vm0, %v1151_v31  ;;  %v1139_v61 = vadd.f32 %v1137_v20, %v6488_v3  ;;  %v1167_v37 = vmul.f32 0.5, %v5764_v9  ;;  %v9723_v9 = vmov 0 }
 0x458   : > { %v830_v6 = vpop.f32.mrf.mxu1 }
 0x459   : > { %1141 = vst.msk [vmem:[#allocation2 + $0x20] sm:$0xff] %vm9629_vm0, %v1139_v61  ;;  %v1169_v43 = vadd.f32 %v1167_v37, %v6518_v18  ;;  %v1155_v33 = vmul.f32 0.5, %v830_v6  ;;  %v1799_v18 = vlaneseq  ;;  %v9726_v37 = vmov 0 }
 0x45a   : > { %v5765_v1 = vpop.f32.mrf.mxu1  ;;  %v1934_v60 = vld [vmem:[#allocation2 + $0x30] sm:$0xff] }
 0x45b   : > { %1171 = vst.msk [vmem:[#allocation2 + $0x70] sm:$0xff] %vm9629_vm0, %v1169_v43  ;;  %v1157_v48 = vadd.f32 %v1155_v33, %v6506_v12  ;;  %v1173_v10 = vmul.f32 0.5, %v5765_v1  ;;  %v6890_v30 = vshrl.u32 %v1799_v18, 7 }
 0x45c   : > { %v833_v28 = vpop.f32.mrf.mxu1 }
 0x45d   : > { %1159 = vst.msk [vmem:[#allocation2 + $0x50] sm:$0xff] %vm9629_vm0, %v1157_v48  ;;  %v1175_v36 = vadd.f32 %v1173_v10, %v6526_v22  ;;  %v1161_v3 = vmul.f32 0.5, %v833_v28  ;;  %v1802_v0 = vadd.s32 16, %v6890_v30  ;;  %v6894_v22 = vld [vmem:[#allocation2 + $0x8] sm:$0xff]  ;;  %v1803_v58 = vadd.s32 24, %v6890_v30 }
 0x45e   : > { %v1804_v55 = vadd.s32 32, %v6890_v30  ;;  %v1808_v62 = vadd.s32 64, %v6890_v30  ;;  %v1807_v50 = vadd.s32 56, %v6890_v30  ;;  %v1806_v19 = vadd.s32 48, %v6890_v30  ;;  %v1936_v6 = vld [vmem:[#allocation2 + $0x40] sm:$0xff] }
 0x45f   : > { %1177 = vst.msk [vmem:[#allocation2 + $0x80] sm:$0xff] %vm9629_vm0, %v1175_v36  ;;  %v1163_v2 = vadd.f32 %v1161_v3, %v6514_v16  ;;  %v1930_v16 = vld [vmem:[#allocation2 + $0x10] sm:$0xff]  ;;  %v6904_v23 = vadd.s32 8, %v6890_v30  ;;  %v1834_v21 = vand.u32 15, %v1802_v0  ;;  %v9620_v5 = vrot.slane %v6894_v22, 7 }
 0x460   : > { %v1805_v11 = vadd.s32 40, %v6890_v30  ;;  %v1809_v44 = vadd.s32 72, %v6890_v30  ;;  %v6911_v26 = vrot.slane %v1930_v16, 7  ;;  %v1835_v29 = vand.u32 15, %v1803_v58  ;;  %v1932_v33 = vld [vmem:[#allocation2 + $0x20] sm:$0xff] }
 0x461   : > { %1165 = vst.msk [vmem:[#allocation2 + $0x60] sm:$0xff] %vm9629_vm0, %v1163_v2  ;;  %vm9637_vm3 = vcmp.lt.s32.totalorder %v6890_v30, 1  ;;  %v1836_v8 = vand.u32 15, %v1804_v55  ;;  %v1840_v34 = vand.u32 15, %v1808_v62  ;;  %v1839_v7 = vand.u32 15, %v1807_v50 }
 0x462   : > { %v1838_v13 = vand.u32 15, %v1806_v19  ;;  %vm9634_vm4 = vcmp.lt.s32.totalorder %v6890_v30, 7  ;;  %v1837_v31 = vand.u32 15, %v1805_v11  ;;  %v1841_v20 = vand.u32 15, %v1809_v44 }
 0x463   : > { %vm6918_vm5 = vcmp.ge.s32.totalorder %v1834_v21, 1  ;;  %v2022_v61 = vsel %vm9637_vm3, %v9620_v5, %v6911_v26  ;;  %vm6927_vm6 = vcmp.le.s32.totalorder %v1835_v29, 14  ;;  %v1833_v43 = vand.u32 15, %v6904_v23 }
 0x464   : > { %v9724_v9 = vsel %vm6918_vm5, 4294967295, %v9723_v9  ;;  %v9727_v37 = vsel %vm6927_vm6, 4294967295, %v9726_v37  ;;  %v1966_v48 = vrot.slane %v1934_v60, 7  ;;  %vm6932_vm7 = vcmp.ge.s32.totalorder %v1836_v8, 1 }
 0x465   : > { %9725 = vst [vmem:[#allocation3_spill] sm:$0xff] %v9724_v9  ;;  %9728 = vst [vmem:[#allocation4_spill] sm:$0xff] %v9727_v37  ;;  %v9729_v10 = vmov 0  ;;  %vm6936_vm8 = vcmp.ge.s32.totalorder %v1840_v34, 1  ;;  %v9732_v28 = vmov 0  ;;  %vm6940_vm9 = vcmp.le.s32.totalorder %v1839_v7, 14 }
 0x466   : > { %v9730_v10 = vsel %vm6932_vm7, 4294967295, %v9729_v10  ;;  %v9733_v28 = vsel %vm6936_vm8, 4294967295, %v9732_v28  ;;  %v9735_v36 = vmov 0  ;;  %v2063_v2 = vrot.slane %v1934_v60, 1 }
 0x467   : > { %9731 = vst [vmem:[#allocation5_spill] sm:$0xff] %v9730_v10  ;;  %9734 = vst [vmem:[#allocation6_spill] sm:$0xff] %v9733_v28  ;;  %v9736_v36 = vsel %vm6940_vm9, 4294967295, %v9735_v36  ;;  %vm6944_vm10 = vcmp.ge.s32.totalorder %v1838_v13, 1  ;;  %vm6954_vm11 = vcmp.le.s32.totalorder %v1837_v31, 14  ;;  %v9742_v58 = vmov 0 }
 0x468   : > { %9737 = vst [vmem:[#allocation7_spill] sm:$0xff] %v9736_v36  ;;  %v9743_v58 = vsel %vm6954_vm11, 4294967295, %v9742_v58  ;;  %vm6958_vm12 = vcmp.le.s32.totalorder %v1841_v20, 14  ;;  %vm7055_vm13 = vcmp.le.s32.totalorder %v1833_v43, 14  ;;  %v1813_v36 = vadd.s32 104, %v6890_v30 }
 0x469   : > { %9744 = vst [vmem:[#allocation10_spill] sm:$0xff] %v9743_v58  ;;  %v9766_v37 = vmov 0  ;;  %v9770_v10 = vmov 0  ;;  %v1811_v9 = vadd.s32 88, %v6890_v30 }
 0x46e   : > { %v5792_v35 = vpop.f32.mrf.mxu1 }
 0x46f   : > { %v1144_v32 = vmul.f32 0.5, %v5792_v35  ;;  %v9738_v35 = vmov 0 }
 0x470   : > { %v1100_v12 = vpop.f32.mrf.mxu1  ;;  %v9739_v35 = vsel %vm6944_vm10, 4294967295, %v9738_v35 }
 0x471   : > { %v1146_v51 = vadd.f32 %v6333_v52, %v1144_v32  ;;  %v1132_v49 = vmul.f32 0.5, %v1100_v12  ;;  %9740 = vst [vmem:[#allocation8_spill] sm:$0xff] %v9739_v35  ;;  %v6948_v32 = vrot.slane %v1930_v16, 1  ;;  %v2027_v12 = vsel %vm6918_vm5, %v2022_v61, 0.0 }
 0x472   : > { %v5793_v59 = vpop.f32.mrf.mxu1  ;;  %v1968_v52 = vrot.slane %v1936_v6, 7  ;;  %v2061_v16 = vrot.slane %v1932_v33, 1 }
 0x473   : > { %1148 = vst.msk [vmem:[#allocation2 + $0x38] sm:$0xff] %vm9629_vm0, %v1146_v51  ;;  %v1134_v15 = vadd.f32 %v6334_v14, %v1132_v49  ;;  %v1150_v17 = vmul.f32 0.5, %v5793_v59  ;;  %9741 = vst [vmem:[#allocation9_spill] sm:$0xff] %v6948_v32  ;;  %v2065_v51 = vrot.slane %v1936_v6, 1  ;;  %v6952_v49 = vld [vmem:[#allocation2 + $0x50] sm:$0xff]  ;;  %v9745_v59 = vmov 0 }
 0x474   : > { %v1103_v25 = vpop.f32.mrf.mxu1  ;;  %v9746_v59 = vsel %vm6958_vm12, 4294967295, %v9745_v59  ;;  %v1964_v14 = vrot.slane %v1932_v33, 7  ;;  %v6976_v44 = vrot.slane %v6952_v49, 1 }
 0x475   : > { %1136 = vst.msk [vmem:[#allocation2 + $0x18] sm:$0xff] %vm9629_vm0, %v1134_v15  ;;  %v1152_v63 = vadd.f32 %v6335_v42, %v1150_v17  ;;  %v1138_v4 = vmul.f32 0.5, %v1103_v25  ;;  %9747 = vst [vmem:[#allocation11_spill] sm:$0xff] %v9746_v59 }
 0x477   : > { %1154 = vst.msk [vmem:[#allocation2 + $0x48] sm:$0xff] %vm9629_vm0, %v1152_v63  ;;  %v1140_v41 = vadd.f32 %v6336_v57, %v1138_v4 }
 0x479   : > { %1142 = vst.msk [vmem:[#allocation2 + $0x28] sm:$0xff] %vm9629_vm0, %v1140_v41 }
 0x47a   : > { %v1935_v1 = vld [vmem:[#allocation2 + $0x38] sm:$0xff] }
 0x47b   : > { %v1967_v3 = vrot.slane %v1935_v1, 7  ;;  %v2064_v18 = vrot.slane %v1935_v1, 1 }
 0x47c   : > { %v1931_v0 = vld [vmem:[#allocation2 + $0x18] sm:$0xff] }
 0x47d   : > { %v1963_v55 = vrot.slane %v1931_v0, 7  ;;  %v2060_v62 = vrot.slane %v1931_v0, 1  ;;  %v2017_v50 = vsel %vm9637_vm3, %v1966_v48, %v1967_v3  ;;  %v2016_v17 = vsel %vm9637_vm3, %v1967_v3, %v1968_v52 }
 0x47e   : > { %v6964_v15 = vld [vmem:[#allocation2 + $0x48] sm:$0xff]  ;;  %v2113_v19 = vsel %vm9634_vm4, %v2064_v18, %v2065_v51  ;;  %v2114_v25 = vsel %vm9634_vm4, %v2063_v2, %v2064_v18  ;;  %v2033_v60 = vsel %vm6936_vm8, %v2016_v17, 0.0 }
 0x47f   : > { %v2117_v21 = vsel %vm9634_vm4, %v2060_v62, %v2061_v16  ;;  %v9621_v11 = vrot.slane %v6964_v15, 7  ;;  %v6983_v63 = vsel %vm9637_vm3, %v6911_v26, %v1963_v55  ;;  %v2020_v4 = vsel %vm9637_vm3, %v1963_v55, %v1964_v14 }
 0x480   : > { %v6978_v42 = vld [vmem:[#allocation2 + $0x28] sm:$0xff]  ;;  %v2125_v34 = vsel %vm6927_vm6, %v2117_v21, 0.0  ;;  %v6992_v7 = vpack.c.bf16 %v6983_v63, %v2027_v12  ;;  %v2066_v57 = vrot.slane %v6964_v15, 1  ;;  %v2118_v13 = vsel %vm9634_vm4, %v6948_v32, %v2060_v62 }
 0x481   : > { %v1965_v29 = vrot.slane %v6978_v42, 7  ;;  %v2062_v8 = vrot.slane %v6978_v42, 1  ;;  %v2015_v41 = vsel %vm9637_vm3, %v1968_v52, %v9621_v11  ;;  %v2029_v20 = vsel %vm6932_vm7, %v2020_v4, 0.0 }
 0x482   : > { %v7010_v6 = vpack.c.bf16 %v2015_v41, %v2033_v60  ;;  %v7016_v3 = vpack.c.bf16 %v2125_v34, %v2118_v13  ;;  %v2129_v52 = vsel %vm6940_vm9, %v2113_v19, 0.0  ;;  %v2989_v34 = vsel %vm6944_vm10, %v2016_v17, 0.0 }
 0x483   : > { %v2019_v31 = vsel %vm9637_vm3, %v1964_v14, %v1965_v29  ;;  %v2018_v61 = vsel %vm9637_vm3, %v1965_v29, %v1966_v48  ;;  %v2115_v18 = vsel %vm9634_vm4, %v2062_v8, %v2063_v2  ;;  %v2116_v0 = vsel %vm9634_vm4, %v2061_v16, %v2062_v8 }
 0x484   : > { %9748 = vst [vmem:[#allocation12_spill] sm:$0xff] %v7010_v6  ;;  %v7012_v33 = vpack.c.bf16 %v2019_v31, %v2029_v20  ;;  %v2031_v1 = vsel %vm6944_vm10, %v2018_v61, 0.0  ;;  %9749 = vst [vmem:[#allocation13_spill] sm:$0xff] %v7016_v3  ;;  %v2127_v48 = vsel %vm6954_vm11, %v2115_v18, 0.0  ;;  %v7030_v62 = vpack.c.bf16 %v2129_v52, %v2114_v25 }
 0x485   : > { %v7020_v12 = vpack.c.bf16 %v2017_v50, %v2031_v1  ;;  %v7028_v55 = vpack.c.bf16 %v2127_v48, %v2116_v0  ;;  %v2111_v14 = vsel %vm9634_vm4, %v2066_v57, %v6976_v44  ;;  %v2112_v2 = vsel %vm9634_vm4, %v2065_v51, %v2066_v57 }
 0x486   : > { %9751 = vst [vmem:[#allocation15_spill] sm:$0xff] %v7030_v62  ;;  %v2131_v16 = vsel %vm6958_vm12, %v2111_v14, 0.0  ;;  %v2985_v29 = vsel %vm6918_vm5, %v2020_v4, 0.0  ;;  %v2987_v8 = vsel %vm6932_vm7, %v2018_v61, 0.0  ;;  %v7051_v48 = vpack.c.bf16 %v2015_v41, %v2989_v34  ;;  %v7075_v61 = vld [vmem:[#allocation2 + $0x20] sm:$0xff]  ;;  %v6337_v34 = vld [vmem:[%s6481_s8 + $0x68] sm:$0xff] }
 0x487   : > { %9750 = vst [vmem:[#allocation14_spill] sm:$0xff] %v7028_v55  ;;  %v7045_v60 = vpack.c.bf16 %v2131_v16, %v2112_v2  ;;  %v7047_v20 = vpack.c.bf16 %v2019_v31, %v2985_v29  ;;  %v7049_v1 = vpack.c.bf16 %v2017_v50, %v2987_v8  ;;  %v3080_v4 = vsel %vm7055_vm13, %v2117_v21, 0.0  ;;  %9762 = vst [vmem:[#allocation24_spill] sm:$0xff] %v7075_v61  ;;  %v3910_v21 = vld [vmem:[#allocation2 + $0x28] sm:$0xff] }
 0x488   : > { %9755 = vst [vmem:[#allocation19_spill] sm:$0xff] %v7051_v48  ;;  %v7061_v57 = vpack.c.bf16 %v3080_v4, %v2118_v13  ;;  %v3084_v17 = vsel %vm6954_vm11, %v2113_v19, 0.0  ;;  %v3082_v50 = vsel %vm6927_vm6, %v2115_v18, 0.0  ;;  %v3086_v23 = vsel %vm6940_vm9, %v2111_v14, 0.0  ;;  %v7077_v13 = vld [vmem:[#allocation2 + $0x30] sm:$0xff] }
 0x489   : > { %9752 = vst [vmem:[#allocation16_spill] sm:$0xff] %v7045_v60  ;;  %9753 = vst [vmem:[#allocation17_spill] sm:$0xff] %v7047_v20  ;;  %v7067_v31 = vpack.c.bf16 %v3084_v17, %v2114_v25  ;;  %v7069_v41 = vpack.c.bf16 %v3082_v50, %v2116_v0  ;;  %v7073_v43 = vpack.c.bf16 %v3086_v23, %v2112_v2  ;;  %v9619_v19 = vrot.slane %v7075_v61, 1  ;;  %v6338_v23 = vld [vmem:[%s6481_s8 + $0x48] sm:$0xff] }
 0x48a   : > { %9754 = vst [vmem:[#allocation18_spill] sm:$0xff] %v7049_v1  ;;  %9758 = vst [vmem:[#allocation20_spill] sm:$0xff] %v7061_v57  ;;  %v4038_v52 = vrot.slane %v3910_v21, 1  ;;  %v9618_v25 = vrot.slane %v7077_v13, 1  ;;  %vm9960_vm7 = vcmp.lt.s32.totalorder %v6890_v30, 1 }
 0x48b   : > { %9759 = vst [vmem:[#allocation21_spill] sm:$0xff] %v7067_v31  ;;  %9760 = vst [vmem:[#allocation22_spill] sm:$0xff] %v7069_v41 }
 0x48c   : > { %9761 = vst [vmem:[#allocation23_spill] sm:$0xff] %v7073_v43  ;;  %9763 = vst [vmem:[#allocation25_spill] sm:$0xff] %v7077_v13  ;;  %v4098_v18 = vsel %vm9634_vm4, %v4038_v52, %v9618_v25  ;;  %v4099_v0 = vsel %vm9634_vm4, %v9619_v19, %v4038_v52  ;;  %v6339_v19 = vld [vmem:[%s6481_s8 + $0x78] sm:$0xff]  ;;  %v7139_v13 = vld [vmem:[#allocation2 + $0x70] sm:$0xff]  ;;  %v9776_v43 = vmov 0 }
 0x48d   : > { %v4102_v14 = vsel %vm7055_vm13, %v4098_v18, 0.0 }
 0x48e   : > { %v7091_v2 = vpack.c.bf16 %v4102_v14, %v4099_v0  ;;  %v1810_v14 = vadd.s32 80, %v6890_v30 }
 0x490   : > { %9764 = vst [vmem:[#allocation26_spill] sm:$0xff] %v7091_v2  ;;  %v9769_v2 = vrot.slane %v6964_v15, 7 }
 0x4aa   : > { %v5796_v16 = vpop.f32.mrf.mxu1 }
 0x4ab   : > { %v1168_v29 = vmul.f32 0.5, %v5796_v16 }
 0x4ac   : > { %v1116_v8 = vpop.f32.mrf.mxu1 }
 0x4ad   : > { %v1170_v4 = vadd.f32 %v6337_v34, %v1168_v29  ;;  %v1156_v17 = vmul.f32 0.5, %v1116_v8  ;;  %v1812_v29 = vadd.s32 96, %v6890_v30  ;;  %v1814_v8 = vadd.s32 112, %v6890_v30  ;;  %v6340_v34 = vld [vmem:[%s6481_s8 + $0x58] sm:$0xff] }
 0x4ae   : > { %v5797_v50 = vpop.f32.mrf.mxu1 }
 0x4af   : > { %1172 = vst.msk [vmem:[#allocation2 + $0x78] sm:$0xff] %vm9629_vm0, %v1170_v4  ;;  %v1158_v21 = vadd.f32 %v6338_v23, %v1156_v17  ;;  %v1174_v25 = vmul.f32 0.5, %v5797_v50  ;;  %v1816_v50 = vadd.s32 128, %v6890_v30  ;;  %v1846_v5 = vand.u32 15, %v1814_v8 }
 0x4b0   : > { %v1119_v52 = vpop.f32.mrf.mxu1 }
 0x4b1   : > { %1160 = vst.msk [vmem:[#allocation2 + $0x58] sm:$0xff] %vm9629_vm0, %v1158_v21  ;;  %v1176_v18 = vadd.f32 %v6339_v19, %v1174_v25  ;;  %v1162_v0 = vmul.f32 0.5, %v1119_v52  ;;  %v1842_v25 = vand.u32 15, %v1810_v14  ;;  %v7115_v52 = vld [vmem:[#allocation2 + $0x80] sm:$0xff]  ;;  %v1848_v11 = vand.u32 15, %v1816_v50 }
 0x4b2   : > { %v7099_v16 = vpop.f32.mrf.mxu1  ;;  %9765 = vst [vmem:[#allocation27_spill] sm:$0xff] %v7115_v52  ;;  %v1976_v58 = vrot.slane %v7115_v52, 7 }
 0x4b3   : > { %1178 = vst.msk [vmem:[#allocation2 + $0x88] sm:$0xff] %vm9629_vm0, %v1176_v18  ;;  %v1164_v4 = vadd.f32 %v6340_v34, %v1162_v0  ;;  %v1290_v17 = vsel %vm9638_vm2, %v7099_v16, -inf  ;;  %v1844_v18 = vand.u32 15, %v1812_v29  ;;  %v7119_v34 = vld [vmem:[#allocation2 + $0x60] sm:$0xff]  ;;  %vm7132_vm14 = vcmp.ge.s32.totalorder %v1842_v25, 1 }
 0x4b4   : > { %1291 = vmax.xlane.f32.xlu0 %v1290_v17  ;;  %v7108_v19 = vpop.f32.mrf.mxu1  ;;  %v9767_v37 = vsel %vm7132_vm14, 4294967295, %v9766_v37  ;;  %v9773_v25 = vmov 0  ;;  %vm7158_vm1 = vcmp.ge.s32.totalorder %v1848_v11, 1  ;;  %v1845_v11 = vand.u32 15, %v1813_v36 }
 0x4b5   : > { %1166 = vst.msk [vmem:[#allocation2 + $0x68] sm:$0xff] %vm9629_vm0, %v1164_v4  ;;  %v1284_v0 = vsel %vm9638_vm2, %v7108_v19, -inf  ;;  %v1970_v4 = vrot.slane %v6952_v49, 7  ;;  %9768 = vst [vmem:[#allocation28_spill] sm:$0xff] %v9767_v37  ;;  %vm7147_vm15 = vcmp.ge.s32.totalorder %v1844_v18, 1  ;;  %vm7151_vm0 = vcmp.ge.s32.totalorder %v1846_v5, 1 }
 0x4b6   : > { %v7111_v23 = vpop.f32.mrf.mxu1  ;;  %v7113_v21 = vld [vmem:[#allocation2 + $0x78] sm:$0xff]  ;;  %v9771_v10 = vsel %vm7147_vm15, 4294967295, %v9770_v10  ;;  %v9774_v25 = vsel %vm7151_vm0, 4294967295, %v9773_v25  ;;  %v9777_v43 = vsel %vm7158_vm1, 4294967295, %v9776_v43  ;;  %vm7217_vm4 = vcmp.le.s32.totalorder %v1845_v11, 14 }
 0x4b7   : > { %v1975_v17 = vrot.slane %v7113_v21, 7  ;;  %v2014_v35 = vsel %vm9637_vm3, %v9769_v2, %v1970_v4  ;;  %9772 = vst [vmem:[#allocation29_spill] sm:$0xff] %v9771_v10  ;;  %9775 = vst [vmem:[#allocation30_spill] sm:$0xff] %v9774_v25 }
 0x4b8   : > { %1285 = vmax.xlane.f32.xlu0 %v1284_v0  ;;  %v7122_v61 = vpop.f32.mrf.mxu1  ;;  %v7124_v14 = vld [vmem:[#allocation2 + $0x58] sm:$0xff]  ;;  %v1972_v0 = vrot.slane %v7119_v34, 7  ;;  %9778 = vst [vmem:[#allocation31_spill] sm:$0xff] %v9777_v43  ;;  %v2035_v48 = vsel %vm7132_vm14, %v2014_v35, 0.0  ;;  %v1843_v43 = vand.u32 15, %v1811_v9 }
 0x4b9   : > { %v1287_v29 = vsel %vm9638_vm2, %v7122_v61, -inf  ;;  %v1971_v8 = vrot.slane %v7124_v14, 7  ;;  %v2008_v15 = vsel %vm9637_vm3, %v1975_v17, %v1976_v58 }
 0x4ba   : > { %1288 = vmax.xlane.f32.xlu1 %v1287_v29  ;;  %v7136_v50 = vpop.f32.mrf.mxu1  ;;  %v7141_v49 = vld [vmem:[#allocation2 + $0x88] sm:$0xff]  ;;  %v1293_v29 = vsel %vm9638_vm2, %v7111_v23, -inf  ;;  %v2041_v60 = vsel %vm7158_vm1, %v2008_v15, 0.0  ;;  %vm7248_vm9 = vcmp.le.s32.totalorder %v1843_v43, 14 }
 0x4bb   : > { %v2013_v5 = vsel %vm9637_vm3, %v1970_v4, %v1971_v8  ;;  %v2012_v31 = vsel %vm9637_vm3, %v1971_v8, %v1972_v0  ;;  %v1302_v41 = vsel %vm9638_vm2, %v7136_v50, -inf  ;;  %v9780_v36 = vrot.slane %v7141_v49, 7 }
 0x4bc   : > { %1294 = vmax.xlane.f32.xlu0 %v1293_v29  ;;  %v7164_v2 = vpop.f32.mrf.mxu1  ;;  %v7166_v18 = vld [vmem:[#allocation2 + $0x68] sm:$0xff]  ;;  %v1974_v29 = vrot.slane %v7139_v13, 7  ;;  %v7181_v4 = vpack.c.bf16 %v2013_v5, %v2035_v48  ;;  %v2037_v8 = vsel %vm7147_vm15, %v2012_v31, 0.0 }
 0x4bd   : > { %v1973_v57 = vrot.slane %v7166_v18, 7  ;;  %v2007_v20 = vsel %vm9637_vm3, %v1976_v58, %v9780_v36  ;;  %v3026_v37 = vrot.slane %v7166_v18, 1 }
 0x4be   : > { %1303 = vmax.xlane.f32.xlu1 %v1302_v41  ;;  %v7179_v1 = vpop.f32.mrf.mxu1  ;;  %9779 = vst [vmem:[#allocation32_spill] sm:$0xff] %v7181_v4  ;;  %v7197_v55 = vpack.c.bf16 %v2007_v20, %v2041_v60  ;;  %v2009_v58 = vsel %vm9637_vm3, %v1974_v29, %v1975_v17  ;;  %v2991_v60 = vsel %vm6936_vm8, %v2014_v35, 0.0  ;;  %v9781_v17 = vmov 0 }
 0x4bf   : > { %v1305_v62 = vsel %vm9638_vm2, %v7179_v1, -inf  ;;  %v2011_v41 = vsel %vm9637_vm3, %v1972_v0, %v1973_v57  ;;  %v2010_v48 = vsel %vm9637_vm3, %v1973_v57, %v1974_v29  ;;  %v1296_v0 = vsel %vm9638_vm2, %v7164_v2, -inf }
 0x4c0   : > { %1306 = vmax.xlane.f32.xlu0 %v1305_v62  ;;  %v7199_v3 = vpop.f32.mrf.mxu1  ;;  %v7201_v4 = vpack.c.bf16 %v2011_v41, %v2037_v8  ;;  %v2039_v36 = vsel %vm7151_vm0, %v2010_v48, 0.0  ;;  %v3028_v62 = vrot.slane %v7113_v21, 1  ;;  %v7215_v57 = vrot.slane %v7139_v13, 1 }
 0x4c1   : > { %v7209_v6 = vpack.c.bf16 %v2009_v58, %v2039_v36  ;;  %v9782_v17 = vsel %vm7217_vm4, 4294967295, %v9781_v17  ;;  %v7221_v29 = vpack.c.bf16 %v2013_v5, %v2991_v60  ;;  %v1299_v8 = vsel %vm9638_vm2, %v7199_v3, -inf }
 0x4c2   : > { %1297 = vmax.xlane.f32.xlu1 %v1296_v0  ;;  %v2993_v35 = vsel %vm7132_vm14, %v2012_v31, 0.0  ;;  %v2995_v36 = vsel %vm7147_vm15, %v2010_v48, 0.0  ;;  %v3025_v0 = vrot.slane %v7119_v34, 1  ;;  %v2997_v5 = vsel %vm7151_vm0, %v2008_v15, 0.0 }
 0x4c3   : > { %9783 = vst [vmem:[#allocation33_spill] sm:$0xff] %v7221_v29  ;;  %v7231_v11 = vpack.c.bf16 %v2011_v41, %v2993_v35  ;;  %v7233_v28 = vpack.c.bf16 %v2009_v58, %v2995_v36  ;;  %v3024_v60 = vrot.slane %v7124_v14, 1  ;;  %v7238_v9 = vpack.c.bf16 %v2007_v20, %v2997_v5 }
 0x4c4   : > { %1300 = vmax.xlane.f32.xlu0 %v1299_v8  ;;  %v9787_v31 = vrot.slane %v7115_v52, 1  ;;  %vm9788_vm3 = vcmp.lt.s32.totalorder %v6890_v30, 7  ;;  %v9790_v58 = vmov 0  ;;  %vm9911_vm15 = vcmask 130048  }
 0x4c5   : > { %9784 = vst [vmem:[#allocation34_spill] sm:$0xff] %v7231_v11  ;;  %9785 = vst [vmem:[#allocation35_spill] sm:$0xff] %v7233_v28  ;;  %v9791_v58 = vsel %vm7248_vm9, 4294967295, %v9790_v58 }
 0x4c6   : > { %9786 = vst [vmem:[#allocation36_spill] sm:$0xff] %v7238_v9  ;;  %v3064_v48 = vsel %vm9788_vm3, %v3028_v62, %v9787_v31  ;;  %vm9789_vm2 = vmmov %vm9788_vm3 }
 0x4c7   : > { %v3065_v41 = vsel %vm9789_vm2, %v7215_v57, %v3028_v62  ;;  %vm9792_vm11 = vmmov %vm9789_vm2  ;;  %v3092_v8 = vsel %vm7217_vm4, %v3064_v48, 0.0  ;;  %v3066_v43 = vsel %vm9789_vm2, %v3026_v37, %v7215_v57 }
 0x4c8   : > { %v3068_v15 = vsel %vm9792_vm11, %v3024_v60, %v3025_v0  ;;  %vm9793_vm6 = vmmov %vm9789_vm2  ;;  %v7266_v36 = vpack.c.bf16 %v3092_v8, %v3065_v41 }
 0x4c9   : > { %v3069_v20 = vsel %vm9793_vm6, %v6976_v44, %v3024_v60  ;;  %v3088_v35 = vsel %vm6958_vm12, %v3068_v15, 0.0  ;;  %vm9794_vm3 = vmmov %vm9789_vm2  ;;  %v3090_v60 = vsel %vm7248_vm9, %v3066_v43, 0.0  ;;  %vm9798_vm6 = vcmask 523264  }
 0x4ca   : > { %v3067_v62 = vsel %vm9794_vm3, %v3025_v0, %v3026_v37  ;;  %9795 = vst [vmem:[#allocation37_spill] sm:$0xff] %v7266_v36  ;;  %v7268_v5 = vpack.c.bf16 %v3088_v35, %v3069_v20  ;;  %vm9799_vm11 = vmmov %vm9798_vm6 }
 0x4cb   : > { %v7272_v31 = vpack.c.bf16 %v3090_v60, %v3067_v62  ;;  %vm9800_vm2 = vmmov %vm9798_vm6 }
 0x4cc   : > { %9796 = vst [vmem:[#allocation38_spill] sm:$0xff] %v7268_v5  ;;  %vm9801_vm3 = vmmov %vm9800_vm2 }
 0x4cd   : > { %9797 = vst [vmem:[#allocation39_spill] sm:$0xff] %v7272_v31  ;;  %v7630_v31 = vld [vmem:[#allocation2 + $0x60] sm:$0xff] }
 0x4d3   : > { %1378 = vrot.lane.b32.xlu1 %v6626_v46, %s6420_s12 }
 0x4da   : > { %1380 = vrot.lane.b32.xlu0 %v6634_v54, %s6420_s12 }
 0x53d   : > { %v1292_v48 = vpop.xlane.xlu0 %1291 }
 0x53e   : > { %v1310_v15 = vsub.f32 %v7099_v16, %v1292_v48 }
 0x540   : > { %v1320_v59 = vmul.f32 1.442695, %v1310_v15 }
 0x541   : > { %v1286_v37 = vpop.xlane.xlu0 %1285 }
 0x542   : > { %6269 = vpow2.f32 %v1320_v59  ;;  %v1308_v0 = vsub.f32 %v7108_v19, %v1286_v37 }
 0x543   : > { %v1289_v41 = vpop.xlane.xlu1 %1288 }
 0x544   : > { %v1316_v20 = vmul.f32 1.442695, %v1308_v0  ;;  %v1309_v8 = vsub.f32 %v7122_v61, %v1289_v41 }
 0x545   : > { %v1295_v35 = vpop.xlane.xlu0 %1294 }
 0x546   : > { %6271 = vpow2.f32 %v1316_v20  ;;  %v1311_v43 = vsub.f32 %v7111_v23, %v1295_v35  ;;  %v1318_v62 = vmul.f32 1.442695, %v1309_v8  ;;  %v6341_v35 = vld [vmem:[%s9612_s2] ss:$0 sm:$0xff] }
 0x547   : > { %v1304_v46 = vpop.xlane.xlu1 %1303 }
 0x548   : > { %v1322_v60 = vmul.f32 1.442695, %v1311_v43  ;;  %v554_v43 = vadd.f32 %v6341_v35, %v6672_v24 }
 0x549   : > { %v1307_v54 = vpop.xlane.xlu0 %1306 }
 0x54a   : > { %6273 = vpow2.f32 %v1322_v60  ;;  %v538_v60 = vadd.f32 %v6341_v35, %v6632_v53  ;;  %v1315_v53 = vsub.f32 %v7179_v1, %v1307_v54  ;;  %v506_v54 = vadd.f32 %v6341_v35, %v6616_v38 }
 0x54b   : > { %6275 = vpow2.f32 %v1318_v62  ;;  %v1298_v16 = vpop.xlane.xlu1 %1297  ;;  %v546_v62 = vadd.f32 %v6341_v35, %v6674_v27  ;;  %v1314_v27 = vsub.f32 %v7136_v50, %v1304_v46 }
 0x54c   : > { %v1312_v24 = vsub.f32 %v7164_v2, %v1298_v16  ;;  %v498_v16 = vadd.f32 %v6341_v35, %v6620_v40 }
 0x54d   : > { %v1301_v48 = vpop.xlane.xlu0 %1300 }
 0x54f   : > { %v7282_v15 = vpop.eup %6269  ;;  %v1379_v37 = vpop.permute.xlu1 %1378 }
 0x550   : > { %v1338_v59 = vsel %vm9798_vm6, %v7282_v15, 0.0  ;;  %vm9802_vm6 = vmmov %vm9800_vm2 }
 0x551   : > { %1339 = vadd.xlane.f32.xlu1 %v1338_v59  ;;  %v1381_v19 = vpop.permute.xlu0 %1380  ;;  %v530_v59 = vadd.f32 %v6341_v35, %v6636_v56  ;;  %v1324_v56 = vmul.f32 1.442695, %v1312_v24  ;;  %v514_v24 = vadd.f32 %v6341_v35, %v6628_v47 }
 0x552   : > { %5816 = vmatprep.subr.bf16.mxu0 %v1381_v19 }
 0x553   : > { %v7286_v61 = vpop.eup %6271  ;;  %5817 = vmatpush3.bf16.msra.mxu0 %v1381_v19  ;;  %v7305_v19 = vpack.c.bf16 %v554_v43, %v546_v62  ;;  %6277 = vpow2.f32 %v1324_v56 }
 0x554   : > { %5818 = vmatprep.subr.bf16.mxu0 %v1379_v37  ;;  %v1332_v23 = vsel %vm9799_vm11, %v7286_v61, 0.0  ;;  %vm9803_vm11 = vmmov %vm9800_vm2 }
 0x555   : > { %1333 = vadd.xlane.f32.xlu1 %v1332_v23  ;;  %v1328_v23 = vmul.f32 1.442695, %v1314_v27 }
 0x557   : > { %v7290_v0 = vpop.eup %6273  ;;  %5819 = vmatpush3.bf16.msra.mxu0 %v1379_v37  ;;  %v7309_v37 = vpack.c.bf16 %v538_v60, %v530_v59  ;;  %6279 = vpow2.f32 %v1328_v23  ;;  %v522_v59 = vadd.f32 %v6341_v35, %v6624_v45 }
 0x558   : > { %v1341_v41 = vsel %vm9800_vm2, %v7290_v0, 0.0  ;;  %v7294_v20 = vpop.eup %6275 }
 0x559   : > { %1342 = vadd.xlane.f32.xlu0 %v1341_v41  ;;  %v1335_v8 = vsel %vm9801_vm3, %v7294_v20, 0.0  ;;  %v1330_v41 = vmul.f32 1.442695, %v1315_v53  ;;  %vm9804_vm3 = vmmov %vm9800_vm2  ;;  %v7343_v27 = vpack.c.bf16 %v522_v59, %v514_v24 }
 0x55b   : > { %6281 = vpow2.f32 %v1330_v41 }
 0x55d   : > { %1336 = vadd.xlane.f32.xlu0 %v1335_v8  ;;  %v1313_v8 = vsub.f32 %v7199_v3, %v1301_v48  ;;  %v7337_v48 = vpack.c.bf16 %v506_v54, %v498_v16 }
 0x55f   : > { %v1326_v43 = vmul.f32 1.442695, %v1313_v8 }
 0x560   : > { %v7319_v62 = vpop.eup %6277 }
 0x561   : > { %6283 = vpow2.f32 %v1326_v43 }
 0x564   : > { %v7321_v60 = vpop.eup %6279 }
 0x565   : > { %v1350_v3 = vsel %vm9800_vm2, %v7321_v60, 0.0 }
 0x566   : > { %1479 = vrot.lane.b32.xlu1 %v7305_v19, %s6419_s11 }
 0x568   : > { %v7325_v50 = vpop.eup %6281 }
 0x569   : > { %v1353_v1 = vsel %vm9803_vm11, %v7325_v50, 0.0  ;;  %vm9806_vm11 = vmmov %vm9800_vm2 }
 0x56a   : > { %1477 = vrot.lane.b32.xlu1 %v7309_v37, %s6419_s11 }
 0x56e   : > { %v7331_v2 = vpop.eup %6283 }
 0x56f   : > { %v1347_v46 = vsel %vm9804_vm3, %v7331_v2, 0.0 }
 0x573   : > { %1376 = vrot.lane.b32.xlu0 %v6618_v39, %s6420_s12  ;;  %v1344_v39 = vsel %vm9802_vm6, %v7319_v62, 0.0  ;;  %vm9805_vm6 = vcmask 31744  }
 0x574   : > { %vm9807_vm2 = vmmov %vm9805_vm6 }
 0x575   : > { %vm9809_vm12 = vmmov %vm9807_vm2 }
 0x576   : > { %vm9817_vm0 = vmmov %vm9807_vm2 }
 0x58e   : > { %1345 = vadd.xlane.f32.xlu1 %v1344_v39 }
 0x592   : > { %1354 = vadd.xlane.f32.xlu1 %v1353_v1  ;;  %1351 = vadd.xlane.f32.xlu0 %v1350_v3 }
 0x596   : > { %1348 = vadd.xlane.f32.xlu0 %v1347_v46 }
 0x5a3   : > { %1473 = vrot.lane.b32.xlu1 %v7337_v48, %s6419_s11 }
 0x5ac   : > { %1475 = vrot.lane.b32.xlu0 %v7343_v27, %s6419_s11 }
 0x5da   : > { %v1340_v53 = vpop.xlane.xlu1 %1339 }
 0x5de   : > { %v1334_v56 = vpop.xlane.xlu1 %1333 }
 0x5e2   : > { %v1343_v23 = vpop.xlane.xlu0 %1342  ;;  %v1480_v41 = vpop.permute.xlu1 %1479 }
 0x5e3   : > { %6285 = vrcp.f32 %v1343_v23  ;;  %v1503_v16 = vsel %vm9807_vm2, %v1480_v41, 0 }
 0x5e4   : > { %6287 = vrcp.f32 %v1334_v56 }
 0x5e5   : > { %6289 = vrcp.f32 %v1340_v53 }
 0x5e6   : > { %v1337_v38 = vpop.xlane.xlu0 %1336  ;;  %v1478_v59 = vpop.permute.xlu1 %1477 }
 0x5e7   : > { %6291 = vrcp.f32 %v1337_v38 }
 0x5ea   : > { %v1377_v40 = vpop.permute.xlu0 %1376 }
 0x5eb   : > { %5820 = vmatprep.subr.bf16.mxu0 %v1377_v40 }
 0x5ec   : > { %5821 = vmatpush3.bf16.msra.mxu0 %v1377_v40 }
 0x5ed   : > { %6180 = vmatprep.subr.msk.bf16.mxu0 %vm9805_vm6, %v1480_v41  ;;  %vm9808_vm6 = vmmov %vm9807_vm2 }
 0x5f0   : > { %v6286_v45 = vpop.eup %6285 }
 0x5f1   : > { %v6288_v47 = vpop.eup %6287  ;;  %v1367_v43 = vmul.f32 %v6286_v45, %v7290_v0  ;;  %v1500_v0 = vsel %vm9809_vm12, %v1478_v59, 0  ;;  %vm9812_vm12 = vmmov %vm9807_vm2 }
 0x5f2   : > { %v6290_v35 = vpop.eup %6289  ;;  %v1364_v39 = vmul.f32 %v6288_v47, %v7286_v61 }
 0x5f3   : > { %v1366_v3 = vmul.f32 %v6290_v35, %v7282_v15 }
 0x5f4   : > { %v6292_v8 = vpop.eup %6291 }
 0x5f5   : > { %v1365_v1 = vmul.f32 %v6292_v8, %v7294_v20  ;;  %v1373_v54 = vpack.c.bf16 %v1367_v43, %v1366_v3 }
 0x5f7   : > { %v1372_v46 = vpack.c.bf16 %v1365_v1, %v1364_v39 }
 0x5f9   : > { %5822 = vmatprep.mubr.msk.bf16.mxu0 %vm9806_vm11, %v1372_v46  ;;  %vm9810_vm11 = vmmov %vm9807_vm2 }
 0x5fa   : > { %5823 = vmatmul.mubr.msk.bf16.vlgmr.msra.gmra.mxu0 %vm9804_vm3, %v1373_v54  ;;  %vm9811_vm3 = vmmov %vm9807_vm2 }
 0x5fb   : > { %5831 = vmatpush3.bf16.xpose.msra.mxu0 %v1503_v16 }
 0x5fc   : > { %6181 = vmatprep.subr.msk.bf16.mxu0 %vm9808_vm6, %v1478_v59  ;;  %vm9813_vm6 = vcmask 523264   ;;  %v6343_v59 = vld [vmem:[%s6481_s8 + $0x80] sm:$0xff] }
 0x603   : > { %5833 = vmatpush3.bf16.xpose.msra.mxu0 %v1500_v0 }
 0x617   : > { %v1346_v61 = vpop.xlane.xlu1 %1345 }
 0x61b   : > { %v1355_v24 = vpop.xlane.xlu1 %1354  ;;  %v1352_v20 = vpop.xlane.xlu0 %1351 }
 0x61c   : > { %6293 = vrcp.f32 %v1355_v24 }
 0x61d   : > { %6295 = vrcp.f32 %v1352_v20  ;;  %v6344_v20 = vld [vmem:[%s6481_s8 + $0xb0] sm:$0xff] }
 0x61e   : > { %6297 = vrcp.f32 %v1346_v61 }
 0x61f   : > { %v1349_v15 = vpop.xlane.xlu0 %1348  ;;  %v1474_v23 = vpop.permute.xlu1 %1473 }
 0x620   : > { %6299 = vrcp.f32 %v1349_v15  ;;  %v1494_v45 = vsel %vm9812_vm12, %v1474_v23, 0  ;;  %vm9816_vm12 = vmmov %vm9807_vm2 }
 0x623   : > { %v1476_v53 = vpop.permute.xlu0 %1475 }
 0x624   : > { %v1497_v56 = vsel %vm9810_vm11, %v1476_v53, 0  ;;  %6182 = vmatprep.subr.msk.bf16.mxu0 %vm9807_vm2, %v1476_v53  ;;  %vm9814_vm11 = vmmov %vm9813_vm6 }
 0x625   : > { %5835 = vmatpush3.bf16.xpose.msra.mxu0 %v1497_v56  ;;  %v6345_v56 = vld [vmem:[%s6481_s8 + $0x90] sm:$0xff] }
 0x626   : > { %6183 = vmatprep.subr.msk.bf16.mxu0 %vm9811_vm3, %v1474_v23  ;;  %vm9815_vm3 = vmmov %vm9807_vm2 }
 0x629   : > { %v6294_v38 = vpop.eup %6293 }
 0x62a   : > { %v6296_v40 = vpop.eup %6295  ;;  %v1371_v8 = vmul.f32 %v6294_v38, %v7325_v50 }
 0x62b   : > { %v6298_v41 = vpop.eup %6297  ;;  %v1370_v35 = vmul.f32 %v6296_v40, %v7321_v60 }
 0x62c   : > { %v1368_v43 = vmul.f32 %v6298_v41, %v7319_v62 }
 0x62d   : > { %v6300_v47 = vpop.eup %6299  ;;  %5837 = vmatpush3.bf16.xpose.msra.mxu0 %v1494_v45  ;;  %v1375_v3 = vpack.c.bf16 %v1371_v8, %v1370_v35  ;;  %v6346_v45 = vld [vmem:[%s6481_s8 + $0xe0] sm:$0xff] }
 0x62e   : > { %v1369_v39 = vmul.f32 %v6300_v47, %v7331_v2  ;;  %v6342_v2 = vld [vmem:[%s6481_s8 + $0xa0] sm:$0xff] }
 0x630   : > { %v1374_v1 = vpack.c.bf16 %v1369_v39, %v1368_v43  ;;  %v6347_v43 = vld [vmem:[%s6481_s8 + $0xc0] sm:$0xff] }
 0x632   : > { %5826 = vmatprep.mubr.msk.bf16.mxu0 %vm9813_vm6, %v1374_v1  ;;  %vm9818_vm6 = vcmask 130048  }
 0x633   : > { %5827 = vmatmul.mubr.msk.bf16.gmra.mxu0 %vm9814_vm11, %v1375_v3  ;;  %vm9819_vm11 = vmmov %vm9818_vm6 }
 0x634   : > { %5838 = vmatprep.mubr.msk.bf16.mxu0 %vm9807_vm2, %v7337_v48 }
 0x63b   : > { %5839 = vmatmul.mubr.msk.bf16.vlgmr.msra.gmra.mxu0 %vm9815_vm3, %v7343_v27 }
 0x63c   : > { %5842 = vmatprep.mubr.msk.bf16.mxu0 %vm9816_vm12, %v7309_v37 }
 0x643   : > { %5843 = vmatmul.mubr.msk.bf16.gmra.mxu0 %vm9817_vm0, %v7305_v19  ;;  %vm9820_vm0 = vmmov %vm9818_vm6 }
 0x644   : > { %vm9821_vm2 = vmmov %vm9820_vm0 }
 0x645   : > { %vm9822_vm3 = vmmov %vm9820_vm0 }
 0x646   : > { %vm9823_vm12 = vmmov %vm9820_vm0 }
 0x6ba   : > { %v5824_v62 = vpop.f32.mrf.mxu0 }
 0x6bb   : > { %v1763_v60 = vmul.f32 0.5, %v5824_v62  ;;  %v6348_v62 = vld [vmem:[%s6481_s8 + $0xf0] sm:$0xff] }
 0x6bc   : > { %v1434_v50 = vpop.f32.mrf.mxu0 }
 0x6bd   : > { %v1765_v46 = vadd.f32 %v6342_v2, %v1763_v60  ;;  %v1751_v54 = vmul.f32 0.5, %v1434_v50 }
 0x6be   : > { %v5825_v16 = vpop.f32.mrf.mxu0 }
 0x6bf   : > { %1767 = vst.msk [vmem:[#allocation2 + $0xb0] sm:$0xff] %vm9818_vm6, %v1765_v46  ;;  %v1753_v0 = vadd.f32 %v6343_v59, %v1751_v54  ;;  %v1769_v61 = vmul.f32 0.5, %v5825_v16  ;;  %vm9824_vm6 = vmmov %vm9820_vm0  ;;  %v6349_v46 = vld [vmem:[%s6481_s8 + $0xd0] sm:$0xff] }
 0x6c0   : > { %v1437_v24 = vpop.f32.mrf.mxu0 }
 0x6c1   : > { %1755 = vst.msk [vmem:[#allocation2 + $0x90] sm:$0xff] %vm9819_vm11, %v1753_v0  ;;  %v1771_v15 = vadd.f32 %v6344_v20, %v1769_v61  ;;  %v1757_v53 = vmul.f32 0.5, %v1437_v24  ;;  %vm9825_vm11 = vmmov %vm9820_vm0 }
 0x6c3   : > { %1773 = vst.msk [vmem:[#allocation2 + $0xc0] sm:$0xff] %vm9820_vm0, %v1771_v15  ;;  %v1759_v23 = vadd.f32 %v6345_v56, %v1757_v53  ;;  %vm9826_vm0 = vcmask 523264  }
 0x6c5   : > { %1761 = vst.msk [vmem:[#allocation2 + $0xa0] sm:$0xff] %vm9821_vm2, %v1759_v23  ;;  %vm9827_vm2 = vmmov %vm9826_vm0 }
 0x6f3   : > { %v5828_v38 = vpop.f32.mrf.mxu0 }
 0x6f4   : > { %v1787_v40 = vmul.f32 0.5, %v5828_v38 }
 0x6f5   : > { %v1450_v41 = vpop.f32.mrf.mxu0 }
 0x6f6   : > { %v1789_v47 = vadd.f32 %v6346_v45, %v1787_v40  ;;  %v1775_v35 = vmul.f32 0.5, %v1450_v41 }
 0x6f7   : > { %v5829_v8 = vpop.f32.mrf.mxu0 }
 0x6f8   : > { %1791 = vst.msk [vmem:[#allocation2 + $0xf0] sm:$0xff] %vm9822_vm3, %v1789_v47  ;;  %v1777_v39 = vadd.f32 %v6347_v43, %v1775_v35  ;;  %v1793_v1 = vmul.f32 0.5, %v5829_v8  ;;  %vm9828_vm3 = vmmov %vm9826_vm0 }
 0x6f9   : > { %v1453_v3 = vpop.f32.mrf.mxu0 }
 0x6fa   : > { %1779 = vst.msk [vmem:[#allocation2 + $0xd0] sm:$0xff] %vm9823_vm12, %v1777_v39  ;;  %v1795_v60 = vadd.f32 %v6348_v62, %v1793_v1  ;;  %v1781_v50 = vmul.f32 0.5, %v1453_v3  ;;  %vm9829_vm12 = vmmov %vm9826_vm0 }
 0x6fb   : > { %v5840_v2 = vpop.f32.mrf.mxu0 }
 0x6fc   : > { %1797 = vst.msk [vmem:[#allocation2 + $0x100] sm:$0xff] %vm9824_vm6, %v1795_v60  ;;  %v1783_v54 = vadd.f32 %v6349_v46, %v1781_v50  ;;  %v1576_v24 = vsel %vm9827_vm2, %v5840_v2, -inf  ;;  %vm9830_vm6 = vmmov %vm9826_vm0 }
 0x6fd   : > { %v1539_v16 = vpop.f32.mrf.mxu0  ;;  %vm9832_vm2 = vmmov %vm9826_vm0 }
 0x6fe   : > { %1785 = vst.msk [vmem:[#allocation2 + $0xe0] sm:$0xff] %vm9825_vm11, %v1783_v54  ;;  %v1570_v59 = vsel %vm9826_vm0, %v1539_v16, -inf  ;;  %vm9831_vm11 = vmmov %vm9826_vm0 }
 0x6ff   : > { %1571 = vmax.xlane.f32.xlu0 %v1570_v59  ;;  %v5841_v0 = vpop.f32.mrf.mxu0  ;;  %v7621_v10 = vld [vmem:[#allocation2 + $0xf0] sm:$0xff] }
 0x700   : > { %v1579_v56 = vsel %vm9829_vm12, %v5841_v0, -inf  ;;  %vm9834_vm12 = vmmov %vm9826_vm0 }
 0x701   : > { %v1542_v61 = vpop.f32.mrf.mxu0 }
 0x702   : > { %v1573_v20 = vsel %vm9828_vm3, %v1542_v61, -inf  ;;  %vm9833_vm3 = vmmov %vm9826_vm0 }
 0x703   : > { %1577 = vmax.xlane.f32.xlu0 %v1576_v24  ;;  %1574 = vmax.xlane.f32.xlu1 %v1573_v20  ;;  %v5844_v15 = vpop.f32.mrf.mxu0 }
 0x704   : > { %v1588_v41 = vsel %vm9831_vm11, %v5844_v15, -inf  ;;  %vm9836_vm11 = vmmov %vm9826_vm0 }
 0x705   : > { %v1555_v53 = vpop.f32.mrf.mxu0 }
 0x706   : > { %v1582_v23 = vsel %vm9830_vm6, %v1555_v53, -inf  ;;  %vm9835_vm6 = vmmov %vm9826_vm0 }
 0x707   : > { %1580 = vmax.xlane.f32.xlu0 %v1579_v56  ;;  %1583 = vmax.xlane.f32.xlu1 %v1582_v23  ;;  %v5845_v38 = vpop.f32.mrf.mxu0 }
 0x708   : > { %v1591_v47 = vsel %vm9832_vm2, %v5845_v38, -inf  ;;  %vm9837_vm2 = vmmov %vm9826_vm0 }
 0x709   : > { %v1558_v40 = vpop.f32.mrf.mxu0 }
 0x70a   : > { %v1585_v45 = vsel %vm9826_vm0, %v1558_v40, -inf }
 0x70b   : > { %1589 = vmax.xlane.f32.xlu1 %v1588_v41  ;;  %1586 = vmax.xlane.f32.xlu0 %v1585_v45 }
 0x70f   : > { %1592 = vmax.xlane.f32.xlu0 %v1591_v47 }
 0x71c   : > { %1668 = vrot.lane.b32.xlu1 %v7305_v19, %s6420_s12 }
 0x720   : > { %1666 = vrot.lane.b32.xlu1 %v7309_v37, %s6420_s12 }
 0x788   : > { %v1572_v35 = vpop.xlane.xlu0 %1571 }
 0x789   : > { %v1594_v8 = vsub.f32 %v1539_v16, %v1572_v35 }
 0x78b   : > { %v1602_v3 = vmul.f32 1.442695, %v1594_v8 }
 0x78c   : > { %v1578_v43 = vpop.xlane.xlu0 %1577  ;;  %v1575_v39 = vpop.xlane.xlu1 %1574 }
 0x78d   : > { %v1596_v1 = vsub.f32 %v5840_v2, %v1578_v43  ;;  %v1595_v60 = vsub.f32 %v1542_v61, %v1575_v39 }
 0x78f   : > { %v1606_v62 = vmul.f32 1.442695, %v1596_v1  ;;  %v1604_v59 = vmul.f32 1.442695, %v1595_v60 }
 0x790   : > { %v1581_v50 = vpop.xlane.xlu0 %1580  ;;  %v1584_v46 = vpop.xlane.xlu1 %1583 }
 0x791   : > { %6301 = vpow2.f32 %v1606_v62  ;;  %v1597_v54 = vsub.f32 %v5841_v0, %v1581_v50  ;;  %v1598_v37 = vsub.f32 %v1555_v53, %v1584_v46 }
 0x792   : > { %6303 = vpow2.f32 %v1602_v3 }
 0x793   : > { %v1608_v24 = vmul.f32 1.442695, %v1597_v54  ;;  %v1610_v2 = vmul.f32 1.442695, %v1598_v37 }
 0x794   : > { %v1590_v20 = vpop.xlane.xlu1 %1589  ;;  %v1587_v19 = vpop.xlane.xlu0 %1586 }
 0x795   : > { %6305 = vpow2.f32 %v1608_v24  ;;  %v1600_v56 = vsub.f32 %v5844_v15, %v1590_v20  ;;  %v1599_v47 = vsub.f32 %v1558_v40, %v1587_v19 }
 0x796   : > { %6307 = vpow2.f32 %v1604_v59 }
 0x797   : > { %v1614_v16 = vmul.f32 1.442695, %v1600_v56  ;;  %v1612_v43 = vmul.f32 1.442695, %v1599_v47 }
 0x798   : > { %v1669_v23 = vpop.permute.xlu1 %1668  ;;  %v1593_v41 = vpop.xlane.xlu0 %1592 }
 0x799   : > { %5846 = vmatprep.subr.bf16.mxu1 %v1669_v23  ;;  %6309 = vpow2.f32 %v1614_v16  ;;  %v1601_v61 = vsub.f32 %v5845_v38, %v1593_v41 }
 0x79a   : > { %5847 = vmatpush3.bf16.msra.mxu1 %v1669_v23  ;;  %6311 = vpow2.f32 %v1610_v2 }
 0x79b   : > { %v1616_v35 = vmul.f32 1.442695, %v1601_v61 }
 0x79c   : > { %v1667_v45 = vpop.permute.xlu1 %1666 }
 0x79d   : > { %5848 = vmatprep.subr.bf16.mxu1 %v1667_v45  ;;  %6313 = vpow2.f32 %v1616_v35 }
 0x79e   : > { %v7403_v0 = vpop.eup %6301  ;;  %5849 = vmatpush3.bf16.msra.mxu1 %v1667_v45  ;;  %6315 = vpow2.f32 %v1612_v43 }
 0x79f   : > { %v1624_v15 = vsel %vm9833_vm3, %v7403_v0, 0.0  ;;  %v6304_v53 = vpop.eup %6303  ;;  %vm9838_vm3 = vmmov %vm9826_vm0 }
 0x7a0   : > { %1625 = vadd.xlane.f32.xlu1 %v1624_v15  ;;  %v1618_v39 = vsel %vm9834_vm12, %v6304_v53, 0.0  ;;  %vm9839_vm12 = vmmov %vm9826_vm0 }
 0x7a2   : > { %v6306_v8 = vpop.eup %6305 }
 0x7a3   : > { %v1627_v38 = vsel %vm9835_vm6, %v6306_v8, 0.0  ;;  %v6308_v1 = vpop.eup %6307  ;;  %vm9840_vm6 = vmmov %vm9826_vm0 }
 0x7a4   : > { %1619 = vadd.xlane.f32.xlu1 %v1618_v39  ;;  %1628 = vadd.xlane.f32.xlu0 %v1627_v38  ;;  %v1621_v3 = vsel %vm9836_vm11, %v6308_v1, 0.0  ;;  %vm9841_vm11 = vmmov %vm9826_vm0 }
 0x7a6   : > { %v6310_v40 = vpop.eup %6309 }
 0x7a7   : > { %v1636_v62 = vsel %vm9826_vm0, %v6310_v40, 0.0  ;;  %v6312_v60 = vpop.eup %6311 }
 0x7a8   : > { %1622 = vadd.xlane.f32.xlu0 %v1621_v3  ;;  %v1630_v50 = vsel %vm9837_vm2, %v6312_v60, 0.0  ;;  %v6196_v3 = vld [vmem:[%s9613_s3 + $0x8] sm:$0xff]   ;;  %vm9843_vm2 = vmmov %vm9826_vm0 }
 0x7aa   : > { %v6314_v46 = vpop.eup %6313 }
 0x7ab   : > { %v1639_v54 = vsel %vm9838_vm3, %v6314_v46, 0.0  ;;  %v6316_v59 = vpop.eup %6315  ;;  %vm9844_vm3 = vcmask 130048  }
 0x7ac   : > { %1637 = vadd.xlane.f32.xlu0 %v1636_v62  ;;  %v1633_v24 = vsel %vm9839_vm12, %v6316_v59, 0.0  ;;  %vm9847_vm12 = vmmov %vm9844_vm3 }
 0x7b0   : > { %1631 = vadd.xlane.f32.xlu0 %v1630_v50 }
 0x7b4   : > { %1640 = vadd.xlane.f32.xlu0 %v1639_v54 }
 0x7b5   : > { %1662 = vrot.lane.b32.xlu1 %v7337_v48, %s6420_s12 }
 0x7b8   : > { %1634 = vadd.xlane.f32.xlu0 %v1633_v24 }
 0x7ce   : > { %1664 = vrot.lane.b32.xlu0 %v7343_v27, %s6420_s12 }
 0x829   : > { %v1626_v20 = vpop.xlane.xlu1 %1625 }
 0x82d   : > { %v1620_v19 = vpop.xlane.xlu1 %1619  ;;  %v1629_v56 = vpop.xlane.xlu0 %1628 }
 0x82e   : > { %6317 = vrcp.f32 %v1620_v19 }
 0x831   : > { %v1623_v37 = vpop.xlane.xlu0 %1622  ;;  %v1663_v39 = vpop.permute.xlu1 %1662 }
 0x832   : > { %6319 = vrcp.f32 %v1623_v37 }
 0x833   : > { %6321 = vrcp.f32 %v1629_v56 }
 0x834   : > { %6323 = vrcp.f32 %v1626_v20 }
 0x835   : > { %v1638_v16 = vpop.xlane.xlu0 %1637 }
 0x839   : > { %v1632_v23 = vpop.xlane.xlu0 %1631 }
 0x83a   : > { %6325 = vrcp.f32 %v1632_v23  ;;  %v7426_v23 = vld [vmem:[#allocation2 + $0x8] sm:$0xff] }
 0x83b   : > { %v6318_v41 = vpop.eup %6317 }
 0x83c   : > { %v1650_v48 = vmul.f32 %v6318_v41, %v6304_v53 }
 0x83d   : > { %v1641_v2 = vpop.xlane.xlu0 %1640 }
 0x83e   : > { %6327 = vrcp.f32 %v1641_v2  ;;  %v6351_v2 = vld [vmem:[#allocation2 + $0x10] sm:$0xff] }
 0x83f   : > { %v6320_v61 = vpop.eup %6319  ;;  %6329 = vrcp.f32 %v1638_v16  ;;  %v7424_v16 = vld [vmem:[#allocation2] sm:$0xff] }
 0x840   : > { %v1651_v45 = vmul.f32 %v6320_v61, %v6308_v1  ;;  %v6322_v35 = vpop.eup %6321  ;;  %9842 = vst [vmem:[#allocation40_spill] sm:$0xff] %v7424_v16  ;;  %v6354_v61 = vld [vmem:[#allocation2 + $0x30] sm:$0xff] }
 0x841   : > { %v1635_v47 = vpop.xlane.xlu0 %1634  ;;  %v6324_v43 = vpop.eup %6323  ;;  %v1653_v38 = vmul.f32 %v6322_v35, %v6306_v8 }
 0x842   : > { %6331 = vrcp.f32 %v1635_v47  ;;  %v1658_v27 = vpack.c.bf16 %v1651_v45, %v1650_v48  ;;  %v1652_v53 = vmul.f32 %v6324_v43, %v7403_v0  ;;  %v2172_v0 = vpack.c.bf16 %v7426_v23, %v7424_v16  ;;  %v6355_v48 = vld [vmem:[#allocation2 + $0x38] sm:$0xff]  ;;  %v6356_v47 = vld [vmem:[#allocation2 + $0x40] sm:$0xff] }
 0x843   : > { %v7442_v45 = vpack.c.bf16 %v6355_v48, %v6354_v61  ;;  %v7455_v43 = vpack.c.bf16 %v7166_v18, %v7119_v34  ;;  %v6197_v34 = vld [vmem:[%s9613_s3 + $0x10] sm:$0xff]   ;;  %v6363_v48 = vld [vmem:[%s6481_s8 + $0xe8] sm:$0xff] }
 0x844   : > { %5854 = vmatprep.mubr.msk.bf16.mxu1 %vm9840_vm6, %v1658_v27  ;;  %v1659_v62 = vpack.c.bf16 %v1653_v38, %v1652_v53  ;;  %vm9848_vm6 = vmmov %vm9844_vm3  ;;  %v6357_v27 = vld [vmem:[#allocation2 + $0x48] sm:$0xff]  ;;  %v7467_v38 = vpack.c.bf16 %v7141_v49, %v7115_v52  ;;  %v7624_v52 = vadd.s32 120, %v6890_v30 }
 0x845   : > { %v1665_v15 = vpop.permute.xlu0 %1664  ;;  %9849 = vst [vmem:[#allocation43_spill] sm:$0xff] %v7442_v45  ;;  %v7444_v35 = vpack.c.bf16 %v6357_v27, %v6356_v47  ;;  %9854 = vst [vmem:[#allocation46_spill] sm:$0xff] %v7455_v43 }
 0x846   : > { %5850 = vmatprep.subr.bf16.mxu1 %v1665_v15  ;;  %9858 = vst [vmem:[#allocation48_spill] sm:$0xff] %v7467_v38 }
 0x847   : > { %5851 = vmatpush3.bf16.msra.mxu1 %v1665_v15  ;;  %v6326_v1 = vpop.eup %6325  ;;  %9850 = vst [vmem:[#allocation44_spill] sm:$0xff] %v7444_v35 }
 0x848   : > { %5852 = vmatprep.subr.bf16.mxu1 %v1663_v39  ;;  %v1654_v20 = vmul.f32 %v6326_v1, %v6312_v60  ;;  %v6352_v60 = vld [vmem:[#allocation2 + $0x18] sm:$0xff]  ;;  %v6359_v1 = vld [vmem:[%s6481_s8 + $0xa8] sm:$0xff] }
 0x84b   : > { %5853 = vmatpush3.bf16.msra.mxu1 %v1663_v39  ;;  %v6328_v50 = vpop.eup %6327  ;;  %v7463_v39 = vpack.c.bf16 %v7113_v21, %v7139_v13  ;;  %v6198_v13 = vld [vmem:[%s9613_s3] sm:$0xff]   ;;  %v7482_v21 = vld [vmem:[%s9613_s3 + $0x18] sm:$0xff]  }
 0x84c   : > { %5862 = vmatprep.subr.bf16.mxu1 %v6196_v3  ;;  %v6330_v54 = vpop.eup %6329  ;;  %v1657_v8 = vmul.f32 %v6328_v50, %v6314_v46  ;;  %v6353_v46 = vld [vmem:[#allocation2 + $0x20] sm:$0xff]  ;;  %5896 = vmatprep.subr.bf16.mxu0 %v6198_v13 }
 0x84d   : > { %v1656_v37 = vmul.f32 %v6330_v54, %v6310_v40  ;;  %v7436_v40 = vpack.c.bf16 %v6978_v42, %v6353_v46  ;;  %v6358_v42 = vld [vmem:[#allocation2 + $0x50] sm:$0xff]  ;;  %9857 = vst [vmem:[#allocation47_spill] sm:$0xff] %v7463_v39  ;;  %5897 = vmatpush3.bf16.msra.mxu0 %v6198_v13 }
 0x84e   : > { %5855 = vmatmul.mubr.msk.bf16.vlgmr.msra.gmra.mxu1 %vm9841_vm11, %v1659_v62  ;;  %vm9851_vm11 = vmmov %vm9844_vm3  ;;  %v7451_v15 = vpack.c.bf16 %v7124_v14, %v6358_v42  ;;  %v7487_v14 = vld [vmem:[%s9613_s3 + $0x20] sm:$0xff]   ;;  %5964 = vmatprep.subr.bf16.mxu0 %v7482_v21 }
 0x84f   : > { %v6332_v24 = vpop.eup %6331  ;;  %5863 = vmatpush3.bf16.msra.mxu1 %v6196_v3  ;;  %v1661_v41 = vpack.c.bf16 %v1657_v8, %v1656_v37  ;;  %9846 = vst [vmem:[#allocation42_spill] sm:$0xff] %v7436_v40 }
 0x850   : > { %v1655_v19 = vmul.f32 %v6332_v24, %v6316_v59  ;;  %v7433_v59 = vpack.c.bf16 %v6352_v60, %v6351_v2  ;;  %9853 = vst [vmem:[#allocation45_spill] sm:$0xff] %v7451_v15  ;;  %5930 = vmatprep.subr.bf16.mxu1 %v6197_v34  ;;  %v6360_v24 = vld [vmem:[%s6481_s8 + $0x88] sm:$0xff]  ;;  %v6362_v2 = vld [vmem:[%s6481_s8 + $0x98] sm:$0xff] }
 0x852   : > { %v1660_v56 = vpack.c.bf16 %v1655_v19, %v1654_v20  ;;  %9845 = vst [vmem:[#allocation41_spill] sm:$0xff] %v7433_v59 }
 0x854   : > { %5858 = vmatprep.mubr.msk.bf16.mxu1 %vm9826_vm0, %v1660_v56  ;;  %vm9852_vm0 = vmmov %vm9844_vm3  ;;  %v6361_v56 = vld [vmem:[%s6481_s8 + $0xb8] sm:$0xff] }
 0x856   : > { %5859 = vmatmul.mubr.msk.bf16.gmra.mxu1 %vm9843_vm2, %v1661_v41  ;;  %vm9855_vm2 = vmmov %vm9852_vm0 }
 0x857   : > { %5864 = vmatprep.mubr.msk.bf16.mxu1 %vm9844_vm3, %v2172_v0  ;;  %vm9856_vm3 = vmmov %vm9852_vm0 }
 0x85e   : > { %5865 = vmatmul.mubr.msk.bf16.vlgmr.msra.gmra.mxu1 %vm9847_vm12, %v7433_v59  ;;  %vm9859_vm12 = vmmov %vm9852_vm0 }
 0x85f   : > { %5868 = vmatprep.mubr.msk.bf16.mxu1 %vm9848_vm6, %v7436_v40  ;;  %vm9860_vm6 = vmmov %vm9852_vm0  ;;  %5931 = vmatpush3.bf16.msra.mxu1 %v6197_v34  ;;  %v6364_v34 = vld [vmem:[%s6481_s8 + $0xc8] sm:$0xff] }
 0x860   : > { %5998 = vmatprep.subr.bf16.mxu1 %v7487_v14 }
 0x866   : > { %5869 = vmatmul.mubr.msk.bf16.gmra.mxu1 %vm9851_vm11, %v7442_v45  ;;  %vm9861_vm11 = vmmov %vm9852_vm0 }
 0x867   : > { %5872 = vmatprep.mubr.msk.bf16.mxu1 %vm9852_vm0, %v7444_v35 }
 0x86e   : > { %5873 = vmatmul.mubr.msk.bf16.gmra.mxu1 %vm9855_vm2, %v7451_v15  ;;  %vm9862_vm2 = vmmov %vm9852_vm0 }
 0x86f   : > { %5876 = vmatprep.mubr.msk.bf16.mxu1 %vm9856_vm3, %v7455_v43  ;;  %vm9863_vm3 = vmmov %vm9852_vm0 }
 0x876   : > { %5877 = vmatmul.mubr.msk.bf16.gmra.mxu1 %vm9859_vm12, %v7463_v39  ;;  %vm9864_vm12 = vmmov %vm9852_vm0  ;;  %v9897_v39 = vmov 0 }
 0x877   : > { %5880 = vmatprep.mubr.msk.bf16.mxu1 %vm9860_vm6, %v7467_v38  ;;  %vm9865_vm6 = vmmov %vm9852_vm0  ;;  %v1829_v38 = vadd.s32 232, %v6890_v30 }
 0x879   : > { %v1861_v28 = vand.u32 15, %v1829_v38 }
 0x90e   : > { %v5856_v18 = vpop.f32.mrf.mxu1 }
 0x90f   : > { %v1764_v3 = vmul.f32 0.5, %v5856_v18 }
 0x910   : > { %v1720_v53 = vpop.f32.mrf.mxu1 }
 0x911   : > { %v1766_v62 = vadd.f32 %v6359_v1, %v1764_v3  ;;  %v1752_v50 = vmul.f32 0.5, %v1720_v53  ;;  %v6365_v1 = vld [vmem:[%s6481_s8 + $0xf8] sm:$0xff] }
 0x912   : > { %v5857_v54 = vpop.f32.mrf.mxu1 }
 0x913   : > { %1768 = vst.msk [vmem:[#allocation2 + $0xb8] sm:$0xff] %vm9861_vm11, %v1766_v62  ;;  %v1754_v20 = vadd.f32 %v6360_v24, %v1752_v50  ;;  %v1770_v19 = vmul.f32 0.5, %v5857_v54  ;;  %v7506_v54 = vld [vmem:[#allocation2 + $0x90] sm:$0xff]  ;;  %vm9867_vm11 = vmmov %vm9852_vm0 }
 0x914   : > { %v1723_v8 = vpop.f32.mrf.mxu1 }
 0x915   : > { %1756 = vst.msk [vmem:[#allocation2 + $0x98] sm:$0xff] %vm9852_vm0, %v1754_v20  ;;  %v1772_v37 = vadd.f32 %v6361_v56, %v1770_v19  ;;  %v1758_v0 = vmul.f32 0.5, %v1723_v8  ;;  %v6366_v20 = vld [vmem:[%s6481_s8 + $0xd8] sm:$0xff]  ;;  %v1960_v8 = vrot.slane %v7424_v16, 7  ;;  %v7517_v56 = vld [vmem:[#allocation2 + $0xa0] sm:$0xff] }
 0x916   : > { %v5860_v41 = vpop.f32.mrf.mxu1 }
 0x917   : > { %1774 = vst.msk [vmem:[#allocation2 + $0xc8] sm:$0xff] %vm9862_vm2, %v1772_v37  ;;  %v1760_v60 = vadd.f32 %v6362_v2, %v1758_v0  ;;  %v1788_v46 = vmul.f32 0.5, %v5860_v41  ;;  %vm9868_vm2 = vmmov %vm9852_vm0  ;;  %v1832_v41 = vand.u32 15, %v6890_v30 }
 0x918   : > { %v1736_v61 = vpop.f32.mrf.mxu1 }
 0x919   : > { %1762 = vst.msk [vmem:[#allocation2 + $0xa8] sm:$0xff] %vm9863_vm3, %v1760_v60  ;;  %v1790_v47 = vadd.f32 %v6363_v48, %v1788_v46  ;;  %v1776_v27 = vmul.f32 0.5, %v1736_v61  ;;  %vm9870_vm3 = vmmov %vm9852_vm0  ;;  %v9871_v48 = vrot.slane %v6894_v22, 7  ;;  %v7556_v22 = vld [vmem:[#allocation2 + $0xc0] sm:$0xff] }
 0x91a   : > { %v5861_v42 = vpop.f32.mrf.mxu1  ;;  %v7531_v60 = vld [vmem:[#allocation2 + $0xb8] sm:$0xff] }
 0x91b   : > { %1792 = vst.msk [vmem:[#allocation2 + $0xf8] sm:$0xff] %vm9864_vm12, %v1790_v47  ;;  %v1778_v13 = vadd.f32 %v6364_v34, %v1776_v27  ;;  %v1794_v18 = vmul.f32 0.5, %v5861_v42  ;;  %vm9872_vm12 = vcmp.lt.s32.totalorder %v6890_v30, 1  ;;  %v2058_v27 = vrot.slane %v7426_v23, 1  ;;  %v7543_v42 = vld [vmem:[#allocation2 + $0xb0] sm:$0xff] }
 0x91c   : > { %v1739_v3 = vpop.f32.mrf.mxu1  ;;  %v7502_v53 = vld [vmem:[#allocation2 + $0x98] sm:$0xff]  ;;  %v2023_v47 = vsel %vm9872_vm12, %v1960_v8, %v9871_v48  ;;  %v9873_v34 = vmov 0  ;;  %v9646_v23 = vrot.slane %v7424_v16, 1  ;;  %v1820_v16 = vadd.s32 160, %v6890_v30 }
 0x91d   : > { %1780 = vst.msk [vmem:[#allocation2 + $0xd8] sm:$0xff] %vm9865_vm6, %v1778_v13  ;;  %v1796_v62 = vadd.f32 %v6365_v1, %v1794_v18  ;;  %v1782_v50 = vmul.f32 0.5, %v1739_v3  ;;  %v7510_v24 = vpack.c.bf16 %v7502_v53, %v7506_v54  ;;  %vm7545_vm6 = vcmp.ge.s32.totalorder %v1832_v41, 1  ;;  %v7585_v41 = vld [vmem:[#allocation2 + $0x118] sm:$0xff] }
 0x91e   : > { %v7536_v61 = vld [vmem:[#allocation2 + $0xc8] sm:$0xff]  ;;  %v9874_v34 = vsel %vm7545_vm6, 4294967295, %v9873_v34  ;;  %v7554_v18 = vpack.c.bf16 %v7531_v60, %v7543_v42  ;;  %9884 = vst [vmem:[#allocation55_spill] sm:$0xff] %v7585_v41 }
 0x91f   : > { %9866 = vst [vmem:[#allocation49_spill] sm:$0xff] %v7510_v24  ;;  %1798 = vst.msk [vmem:[#allocation2 + $0x108] sm:$0xff] %vm9867_vm11, %v1796_v62  ;;  %v1784_v19 = vadd.f32 %v6366_v20, %v1782_v50  ;;  %5881 = vmatmul.mubr.msk.bf16.gmra.mxu1 %vm9852_vm0, %v7510_v24  ;;  %v7563_v1 = vpack.c.bf16 %v7536_v61, %v7556_v22  ;;  %v7572_v20 = vld [vmem:[%s9613_s3 + $0x28] sm:$0xff]   ;;  %v1825_v24 = vadd.s32 200, %v6890_v30  ;;  %v3038_v45 = vrot.slane %v7536_v61, 1 }
 0x920   : > { %v7519_v37 = vld [vmem:[#allocation2 + $0xa8] sm:$0xff]  ;;  %9875 = vst [vmem:[#allocation51_spill] sm:$0xff] %v9874_v34  ;;  %vm9876_vm11 = vmmov %vm9872_vm12  ;;  %vm9882_vm12 = vcmp.lt.s32.totalorder %v6890_v30, 7 }
 0x921   : > { %1786 = vst.msk [vmem:[#allocation2 + $0xe8] sm:$0xff] %vm9868_vm2, %v1784_v19  ;;  %v7524_v0 = vpack.c.bf16 %v7519_v37, %v7517_v56  ;;  %9877 = vst [vmem:[#allocation52_spill] sm:$0xff] %v7554_v18  ;;  %v2119_v19 = vsel %vm9882_vm12, %v2058_v27, %v6948_v32  ;;  %v1821_v32 = vadd.s32 168, %v6890_v30  ;;  %v3034_v15 = vrot.slane %v7519_v37, 1 }
 0x922   : > { %v7527_v2 = vld [vmem:[#allocation2 + $0xf8] sm:$0xff]  ;;  %9878 = vst [vmem:[#allocation53_spill] sm:$0xff] %v7563_v1  ;;  %9879 = vst [vmem:[#allocation54_spill] sm:$0xff] %v7572_v20  ;;  %v1857_v40 = vand.u32 15, %v1825_v24 }
 0x923   : > { %9869 = vst [vmem:[#allocation50_spill] sm:$0xff] %v7524_v0  ;;  %5884 = vmatprep.mubr.msk.bf16.mxu1 %vm9870_vm3, %v7524_v0  ;;  %v7534_v46 = vrot.slane %v7527_v2, 7  ;;  %vm9880_vm2 = vmmov %vm9852_vm0  ;;  %v1853_v36 = vand.u32 15, %v1821_v32 }
 0x924   : > { %vm9881_vm3 = vmmov %vm9852_vm0  ;;  %v7589_v48 = vld [vmem:[#allocation2 + $0xd8] sm:$0xff] }
 0x925   : > { %v2024_v13 = vsel %vm9876_vm11, %v7534_v46, %v1960_v8  ;;  %vm9883_vm11 = vmmov %vm9852_vm0 }
 0x926   : > { %v2025_v3 = vsel %vm7545_vm6, %v2024_v13, 0.0  ;;  %v7565_v50 = vld [vmem:[#allocation2 + $0x108] sm:$0xff]  ;;  %v1830_v13 = vadd.s32 240, %v6890_v30 }
 0x927   : > { %v2154_v62 = vpack.c.bf16 %v2023_v47, %v2025_v3  ;;  %5885 = vmatmul.mubr.msk.bf16.gmra.mxu1 %vm9852_vm0, %v7554_v18  ;;  %v7583_v8 = vrot.slane %v7565_v50, 7  ;;  %v1823_v18 = vadd.s32 184, %v6890_v30 }
 0x928   : > { %5888 = vmatprep.mubr.msk.bf16.mxu1 %vm9880_vm2, %v7563_v1  ;;  %vm9885_vm2 = vmmov %vm9882_vm12  ;;  %v7599_v3 = vld [vmem:[#allocation2 + $0xe8] sm:$0xff]  ;;  %v1862_v5 = vand.u32 15, %v1830_v13  ;;  %v7637_v1 = vld [vmem:[#allocation2 + $0x100] sm:$0xff] }
 0x929   : > { %5898 = vmatprep.mubr.msk.bf16.mxu0 %vm9881_vm3, %v2154_v62  ;;  %v2120_v47 = vsel %vm9885_vm2, %v9646_v23, %v2058_v27  ;;  %v2123_v62 = vsel %vm7055_vm13, %v2119_v19, 0.0  ;;  %vm9887_vm3 = vcmp.lt.s32.totalorder %v6890_v30, 1  ;;  %v7619_v19 = vld [vmem:[#allocation2 + $0xe0] sm:$0xff]  ;;  %9890 = vst [vmem:[#allocation59_spill] sm:$0xff] %v7637_v1  ;;  %vm9891_vm13 = vmmov %vm9852_vm0  ;;  %v7655_v32 = vrot.slane %v7637_v1, 7 }
 0x92a   : > { %5899 = vmatmul.mubr.msk.bf16.vlgmr.msra.gmra.mxu0 %vm9883_vm11, %v6992_v7  ;;  %v7597_v7 = vld [vmem:[#allocation2 + $0x110] sm:$0xff]  ;;  %v2982_v27 = vsel %vm9887_vm3, %v7583_v8, %v6911_v26  ;;  %v7635_v25 = vpack.c.bf16 %v7599_v3, %v7619_v19  ;;  %v2621_v34 = vpack.c.bf16 %v2123_v62, %v2120_v47  ;;  %vm9892_vm12 = vmmov %vm9852_vm0  ;;  %v2087_v47 = vrot.slane %v7621_v10, 1 }
 0x92b   : > { %5902 = vmatprep.mubr.msk.bf16.mxu0 %vm9852_vm0, %v7012_v33  ;;  %5965 = vmatpush3.bf16.msra.mxu0 %v7482_v21  ;;  %9886 = vst [vmem:[#allocation56_spill] sm:$0xff] %v7597_v7  ;;  %v1819_v33 = vadd.s32 152, %v6890_v30  ;;  %v7610_v21 = vld [vmem:[#allocation2 + $0xd0] sm:$0xff]  ;;  %v2983_v23 = vsel %vm7545_vm6, %v2982_v27, 0.0  ;;  %v2079_v27 = vrot.slane %v7543_v42, 1  ;;  %v3037_v62 = vrot.slane %v7556_v22, 1  ;;  %vm9893_vm11 = vmmov %vm9852_vm0 }
 0x92c   : > { %6032 = vmatprep.subr.bf16.mxu0 %v7572_v20  ;;  %v7617_v51 = vpack.c.bf16 %v7589_v48, %v7610_v21  ;;  %v7627_v26 = vpack.c.bf16 %v6983_v63, %v2983_v23  ;;  %9889 = vst [vmem:[#allocation58_spill] sm:$0xff] %v7635_v25  ;;  %v7642_v63 = vadd.s32 144, %v6890_v30  ;;  %v7659_v0 = vrot.slane %v7637_v1, 1  ;;  %vm9968_vm6 = vmmov %vm9960_vm7 }
 0x92d   : > { %v1851_v23 = vand.u32 15, %v1819_v33  ;;  %v3036_v33 = vrot.slane %v7531_v60, 1  ;;  %vm7663_vm2 = vcmp.ge.s32.totalorder %v1862_v5, 1  ;;  %v9900_v1 = vmov 0 }
 0x92e   : > { %9888 = vst [vmem:[#allocation57_spill] sm:$0xff] %v7617_v51  ;;  %v1855_v43 = vand.u32 15, %v1823_v18  ;;  %v7686_v5 = vpack.c.bf16 %v7527_v2, %v7621_v10 }
 0x92f   : > { %5889 = vmatmul.mubr.msk.bf16.gmra.mxu1 %vm9891_vm13, %v7617_v51  ;;  %v2083_v51 = vrot.slane %v7610_v21, 1  ;;  %vm7670_vm3 = vcmp.le.s32.totalorder %v1851_v23, 14  ;;  %vm7674_vm13 = vcmp.le.s32.totalorder %v1853_v36, 14  ;;  %v1827_v23 = vadd.s32 216, %v6890_v30 }
 0x930   : > { %5892 = vmatprep.mubr.msk.bf16.mxu1 %vm9892_vm12, %v7635_v25  ;;  %v9894_v25 = vld [vmem:[#allocation12_spill] sm:$0xff]  ;;  %v9898_v39 = vsel %vm7670_vm3, 4294967295, %v9897_v39  ;;  %v9901_v1 = vsel %vm7674_vm13, 4294967295, %v9900_v1  ;;  %vm9903_vm12 = vcmp.lt.s32.totalorder %v6890_v30, 1  ;;  %9904 = vst [vmem:[#allocation61_spill] sm:$0xff] %v7686_v5 }
 0x931   : > { %9899 = vst [vmem:[#allocation12_spill] sm:$0xff] %v9898_v39  ;;  %9902 = vst [vmem:[#allocation60_spill] sm:$0xff] %v9901_v1 }
 0x932   : > { %5903 = vmatmul.mubr.msk.bf16.gmra.mxu0 %vm9893_vm11, %v7020_v12  ;;  %v3041_v12 = vrot.slane %v7619_v19, 1  ;;  %vm9905_vm11 = vmmov %vm9903_vm12 }
 0x933   : > { %5906 = vmatprep.mubr.msk.bf16.mxu0 %vm9852_vm0, %v9894_v25  ;;  %v7682_v25 = vsel %vm9903_vm12, %v7655_v32, %v7583_v8  ;;  %v2952_v36 = vsel %vm9905_vm11, %v7534_v46, %v7655_v32  ;;  %vm9906_vm0 = vcmp.lt.s32.totalorder %v6890_v30, 7 }
 0x934   : > { %v3013_v18 = vsel %vm7663_vm2, %v2952_v36, 0.0  ;;  %v7698_v35 = vsel %vm9906_vm0, %v3036_v33, %v3037_v62  ;;  %vm9907_vm12 = vmmov %vm9906_vm0  ;;  %v7715_v36 = vrot.slane %v7527_v2, 1 }
 0x935   : > { %v7702_v9 = vsel %vm9907_vm12, %v2079_v27, %v3036_v33  ;;  %v7706_v11 = vpack.c.bf16 %v7682_v25, %v3013_v18  ;;  %vm9910_vm11 = vmmov %vm9906_vm0  ;;  %v9913_v33 = vrot.slane %v7517_v56, 1  ;;  %v3100_v24 = vsel %vm7674_vm13, %v7698_v35, 0.0 }
 0x936   : > { %9908 = vst [vmem:[#allocation62_spill] sm:$0xff] %v7702_v9  ;;  %v7710_v59 = vsel %vm9910_vm11, %v3034_v15, %v2079_v27  ;;  %9912 = vst [vmem:[#allocation64_spill] sm:$0xff] %v7715_v36  ;;  %v9915_v27 = vmov 0 }
 0x937   : > { %9909 = vst [vmem:[#allocation63_spill] sm:$0xff] %v7706_v11  ;;  %5893 = vmatmul.mubr.msk.bf16.gmra.mxu1 %vm9911_vm15, %v7686_v5  ;;  %v7721_v29 = vsel %vm9906_vm0, %v9913_v33, %v3034_v15  ;;  %v3098_v38 = vsel %vm7670_vm3, %v7710_v59, 0.0  ;;  %vm9914_vm12 = vmmov %vm9911_vm15  ;;  %vm7730_vm15 = vcmp.le.s32.totalorder %v1855_v43, 14  ;;  %v7738_v15 = vpack.c.bf16 %v3100_v24, %v7702_v9  ;;  %v9921_v33 = vld [vmem:[#allocation32_spill] sm:$0xff]  ;;  %v7800_v11 = vld [vmem:[%s9613_s3 + $0x30] sm:$0xff]  }
 0x938   : > { %5932 = vmatprep.mubr.msk.bf16.mxu1 %vm9914_vm12, %v2621_v34  ;;  %v9916_v27 = vsel %vm7730_vm15, 4294967295, %v9915_v27  ;;  %v7735_v2 = vpack.c.bf16 %v3098_v38, %v7721_v29  ;;  %vm9920_vm11 = vmmov %vm9906_vm0  ;;  %v1859_v5 = vand.u32 15, %v1827_v23  ;;  %v3040_v38 = vrot.slane %v7589_v48, 1  ;;  %9941 = vst [vmem:[#allocation74_spill] sm:$0xff] %v7800_v11 }
 0x939   : > { %9917 = vst [vmem:[#allocation65_spill] sm:$0xff] %v9916_v27  ;;  %9919 = vst [vmem:[#allocation67_spill] sm:$0xff] %v7738_v15  ;;  %v7742_v18 = vsel %vm9920_vm11, %v3038_v45, %v2083_v51  ;;  %v1828_v24 = vadd.s32 224, %v6890_v30  ;;  %v9926_v15 = vmov 0  ;;  %v1852_v9 = vand.u32 15, %v1820_v16 }
 0x93a   : > { %9918 = vst [vmem:[#allocation66_spill] sm:$0xff] %v7735_v2  ;;  %vm9922_vm0 = vmmov %vm9914_vm12  ;;  %v3102_v34 = vsel %vm7730_vm15, %v7742_v18, 0.0  ;;  %v9970_v16 = vmov 0 }
 0x93b   : > { %5907 = vmatmul.mubr.msk.bf16.gmra.mxu0 %vm9922_vm0, %v9921_v33  ;;  %vm9923_vm12 = vmmov %vm9920_vm11  ;;  %vm7757_vm11 = vcmp.le.s32.totalorder %v1857_v40, 14 }
 0x93c   : > { %v7748_v43 = vsel %vm9923_vm12, %v3037_v62, %v3038_v45  ;;  %vm9925_vm14 = vmmov %vm9922_vm0  ;;  %v9927_v15 = vsel %vm7757_vm11, 4294967295, %v9926_v15  ;;  %v3042_v45 = vrot.slane %v7599_v3, 1  ;;  %vm7765_vm0 = vcmp.le.s32.totalorder %v1861_v28, 14 }
 0x93d   : > { %9924 = vst [vmem:[#allocation32_spill] sm:$0xff] %v7748_v43  ;;  %5910 = vmatprep.mubr.msk.bf16.mxu0 %vm9925_vm14, %v7201_v4  ;;  %9928 = vst [vmem:[#allocation68_spill] sm:$0xff] %v9927_v15  ;;  %v7762_v23 = vpack.c.bf16 %v3102_v34, %v7748_v43  ;;  %v7771_v33 = vsel %vm9923_vm12, %v3040_v38, %v3041_v12  ;;  %v7781_v34 = vld [vmem:[#allocation2 + $0x58] sm:$0xff]  ;;  %v7828_v43 = vld [vmem:[#allocation2 + $0x80] sm:$0xff]  ;;  %v10048_v62 = vmov 0 }
 0x93e   : > { %9932 = vst [vmem:[#allocation70_spill] sm:$0xff] %v7771_v33  ;;  %vm9933_vm14 = vmmov %vm9923_vm12  ;;  %v9949_v15 = vld [vmem:[#allocation14_spill] sm:$0xff] }
 0x93f   : > { %9929 = vst [vmem:[#allocation69_spill] sm:$0xff] %v7762_v23  ;;  %v7775_v4 = vsel %vm9933_vm14, %v2083_v51, %v3040_v38  ;;  %vm9935_vm8 = vmmov %vm9923_vm12  ;;  %v1850_v23 = vand.u32 15, %v7642_v63  ;;  %v3104_v51 = vsel %vm7757_vm11, %v7771_v33, 0.0  ;;  %vm7793_vm12 = vcmp.le.s32.totalorder %v1859_v5, 14  ;;  %v9945_v33 = vld [vmem:[#allocation13_spill] sm:$0xff]  ;;  %v10029_v13 = vld [vmem:[#allocation62_spill] sm:$0xff] }
 0x940   : > { %9934 = vst [vmem:[#allocation71_spill] sm:$0xff] %v7775_v4  ;;  %v3048_v40 = vsel %vm9935_vm8, %v7715_v36, %v7659_v0  ;;  %vm9936_vm10 = vmmov %vm9935_vm8  ;;  %v9938_v38 = vmov 0  ;;  %v7803_v63 = vpack.c.bf16 %v3104_v51, %v7775_v4  ;;  %v7807_v28 = vsel %vm9935_vm8, %v3042_v45, %v2087_v47 }
 0x941   : > { %v7788_v2 = vsel %vm9936_vm10, %v2087_v47, %v7715_v36  ;;  %v9939_v38 = vsel %vm7793_vm12, 4294967295, %v9938_v38  ;;  %9943 = vst [vmem:[#allocation76_spill] sm:$0xff] %v7807_v28  ;;  %vm9944_vm10 = vmmov %vm9935_vm8  ;;  %v1978_v5 = vrot.slane %v7506_v54, 7  ;;  %v3106_v20 = vsel %vm7793_vm12, %v7807_v28, 0.0 }
 0x942   : > { %9937 = vst [vmem:[#allocation72_spill] sm:$0xff] %v7788_v2  ;;  %9940 = vst [vmem:[#allocation73_spill] sm:$0xff] %v9939_v38  ;;  %v7811_v36 = vsel %vm9944_vm10, %v3041_v12, %v3042_v45  ;;  %v3108_v51 = vsel %vm7765_vm0, %v3048_v40, 0.0  ;;  %vm9946_vm14 = vcmask 130048   ;;  %v1860_v47 = vand.u32 15, %v1828_v24  ;;  %v8406_v38 = vld [vmem:[#allocation2 + $0xa0] sm:$0xff] }
 0x943   : > { %9942 = vst [vmem:[#allocation75_spill] sm:$0xff] %v7803_v63  ;;  %v6369_v63 = vld [vmem:[#allocation2 + $0x68] sm:$0xff]  ;;  %5933 = vmatmul.mubr.msk.bf16.vlgmr.msra.gmra.mxu1 %vm9946_vm14, %v9945_v33  ;;  %v7823_v12 = vpack.c.bf16 %v3106_v20, %v7811_v36  ;;  %v7826_v45 = vpack.c.bf16 %v3108_v51, %v7788_v2  ;;  %v1979_v28 = vrot.slane %v7502_v53, 7  ;;  %vm9950_vm8 = vmmov %vm9946_vm14  ;;  %v1847_v40 = vand.u32 15, %v7624_v52 }
 0x944   : > { %v2070_v4 = vrot.slane %v6369_v63, 1  ;;  %5936 = vmatprep.mubr.msk.bf16.mxu1 %vm9950_vm8, %v9949_v15  ;;  %5999 = vmatpush3.bf16.msra.mxu1 %v7487_v14  ;;  %v3971_v24 = vrot.slane %v7597_v7, 7  ;;  %v1981_v20 = vrot.slane %v7519_v37, 7  ;;  %vm9951_vm10 = vmmov %vm9950_vm8  ;;  %vm7840_vm14 = vcmp.ge.s32.totalorder %v1850_v23, 1  ;;  %v7852_v15 = vld [vmem:[#allocation2 + $0xf8] sm:$0xff] }
 0x945   : > { %9947 = vst [vmem:[#allocation13_spill] sm:$0xff] %v7823_v12  ;;  %9948 = vst [vmem:[#allocation77_spill] sm:$0xff] %v7826_v45  ;;  %5911 = vmatmul.mubr.msk.bf16.gmra.mxu0 %vm9951_vm10, %v7209_v6  ;;  %v9952_v33 = vmov 0  ;;  %v9955_v63 = vrot.slane %v7630_v31, 1  ;;  %v9956_v51 = vrot.slane %v7781_v34, 1  ;;  %vm9957_vm8 = vcmp.lt.s32.totalorder %v6890_v30, 7  ;;  %6066 = vmatprep.subr.bf16.mxu1 %v7800_v11 }
 0x946   : > { %v9953_v33 = vsel %vm7840_vm14, 4294967295, %v9952_v33  ;;  %v1822_v14 = vadd.s32 176, %v6890_v30  ;;  %9958 = vst [vmem:[#allocation78_spill] sm:$0xff] %v7852_v15  ;;  %v1980_v37 = vrot.slane %v7517_v56, 7  ;;  %5914 = vmatprep.mubr.msk.bf16.mxu0 %vm9951_vm10, %v7197_v55  ;;  %v9959_v6 = vrot.slane %v7141_v49, 7  ;;  %vm9964_vm10 = vmmov %vm9960_vm7  ;;  %v10091_v11 = vld [vmem:[#allocation50_spill] sm:$0xff] }
 0x947   : > { %9954 = vst [vmem:[#allocation14_spill] sm:$0xff] %v9953_v33  ;;  %v2109_v52 = vsel %vm9957_vm8, %v9956_v51, %v9955_v63  ;;  %v1824_v63 = vadd.s32 192, %v6890_v30  ;;  %v1982_v51 = vrot.slane %v7543_v42, 7  ;;  %v2107_v45 = vsel %vm9957_vm8, %v2070_v4, %v7215_v57  ;;  %vm9967_vm8 = vmmov %vm9960_vm7 }
 0x948   : > { %v7861_v23 = vsel %vm9960_vm7, %v9959_v6, %v1978_v5  ;;  %v1817_v12 = vadd.s32 136, %v6890_v30  ;;  %vm7869_vm5 = vcmp.ge.s32.totalorder %v1860_v47, 1  ;;  %v7875_v55 = vsel %vm9964_vm10, %v1978_v5, %v1979_v28  ;;  %vm9969_vm10 = vmmov %vm9968_vm6 }
 0x949   : > { %9961 = vst [vmem:[#allocation79_spill] sm:$0xff] %v7861_v23  ;;  %v7879_v49 = vsel %vm9960_vm7, %v1979_v28, %v1980_v37  ;;  %v9966_v42 = vrot.slane %v7585_v41, 7  ;;  %v2043_v47 = vsel %vm7840_vm14, %v7861_v23, 0.0  ;;  %v7891_v2 = vsel %vm9968_vm6, %v1980_v37, %v1981_v20  ;;  %v9974_v23 = vld [vmem:[#allocation15_spill] sm:$0xff] }
 0x94a   : > { %9965 = vst [vmem:[#allocation80_spill] sm:$0xff] %v7879_v49  ;;  %v1854_v5 = vand.u32 15, %v1822_v14  ;;  %v3974_v28 = vsel %vm9969_vm10, %v7583_v8, %v3971_v24  ;;  %vm7896_vm7 = vcmp.ge.s32.totalorder %v1852_v9, 1  ;;  %v1856_v41 = vand.u32 15, %v1824_v63  ;;  %v6371_v63 = vld [vmem:[#allocation2 + $0x78] sm:$0xff] }
 0x94b   : > { %v3973_v6 = vsel %vm9967_vm8, %v3971_v24, %v9966_v42  ;;  %v9971_v16 = vsel %vm7896_vm7, 4294967295, %v9970_v16  ;;  %v9972_v42 = vrot.slane %v7852_v15, 7  ;;  %vm9973_vm8 = vmmov %vm9968_vm6  ;;  %v4035_v37 = vsel %vm7663_vm2, %v3974_v28, 0.0 }
 0x94c   : > { %vm9975_vm6 = vcmask 130048   ;;  %v2163_v14 = vpack.c.bf16 %v7875_v55, %v2043_v47  ;;  %v2045_v9 = vsel %vm7896_vm7, %v7879_v49, 0.0  ;;  %vm7913_vm10 = vcmp.le.s32.totalorder %v1847_v40, 14 }
 0x94d   : > { %v3976_v33 = vsel %vm9973_vm8, %v9972_v42, %v7655_v32  ;;  %5937 = vmatmul.mubr.msk.bf16.gmra.mxu1 %vm9975_vm6, %v9974_v23  ;;  %v9976_v8 = vmov 0  ;;  %v7919_v32 = vpack.c.bf16 %v3973_v6, %v4035_v37  ;;  %v2072_v28 = vrot.slane %v6371_v63, 1  ;;  %v9979_v23 = vld [vmem:[#allocation16_spill] sm:$0xff]  ;;  %vm9980_vm8 = vmmov %vm9975_vm6 }
 0x94e   : > { %v9977_v8 = vsel %vm7913_vm10, 4294967295, %v9976_v8  ;;  %v4033_v24 = vsel %vm7869_vm5, %v3976_v33, 0.0  ;;  %v1983_v42 = vrot.slane %v7531_v60, 7  ;;  %5940 = vmatprep.mubr.msk.bf16.mxu1 %vm9980_vm8, %v9979_v23  ;;  %v2164_v47 = vpack.c.bf16 %v7891_v2, %v2045_v9  ;;  %5915 = vmatmul.mubr.msk.bf16.gmra.mxu0 %vm9975_vm6, %v2163_v14  ;;  %vm9984_vm7 = vmmov %vm9975_vm6 }
 0x94f   : > { %9978 = vst [vmem:[#allocation15_spill] sm:$0xff] %v9977_v8  ;;  %v7926_v49 = vpack.c.bf16 %v7682_v25, %v4033_v24  ;;  %v1985_v40 = vrot.slane %v7536_v61, 7  ;;  %v9981_v33 = vrot.slane %v7781_v34, 1  ;;  %vm9982_vm14 = vcmp.lt.s32.totalorder %v6890_v30, 7 }
 0x950   : > { %v2133_v60 = vsel %vm7248_vm9, %v2109_v52, 0.0  ;;  %vm9983_vm8 = vcmp.lt.s32.totalorder %v6890_v30, 1  ;;  %v1984_v25 = vrot.slane %v7556_v22, 7  ;;  %5918 = vmatprep.mubr.msk.bf16.mxu0 %vm9984_vm7, %v2164_v47  ;;  %v9985_v61 = vrot.slane %v7630_v31, 1  ;;  %vm9986_vm6 = vmmov %vm9982_vm14 }
 0x951   : > { %v2110_v6 = vsel %vm9982_vm14, %v6976_v44, %v9981_v33  ;;  %v7939_v37 = vsel %vm9983_vm8, %v1981_v20, %v1982_v51  ;;  %v2135_v14 = vsel %vm7217_vm4, %v2107_v45, 0.0  ;;  %v1849_v44 = vand.u32 15, %v1817_v12  ;;  %v6372_v45 = vld [vmem:[#allocation2 + $0x88] sm:$0xff] }
 0x952   : > { %v2108_v34 = vsel %vm9986_vm6, %v9985_v61, %v2070_v4  ;;  %v2075_v9 = vrot.slane %v7506_v54, 1  ;;  %vm7950_vm14 = vcmp.ge.s32.totalorder %v1854_v5, 1  ;;  %v9987_v52 = vmov 0 }
 0x953   : > { %v9988_v52 = vsel %vm7950_vm14, 4294967295, %v9987_v52  ;;  %vm7954_vm8 = vcmp.ge.s32.totalorder %v1856_v41, 1  ;;  %v1826_v22 = vadd.s32 208, %v6890_v30  ;;  %v2047_v31 = vsel %vm7950_vm14, %v7939_v37, 0.0 }
 0x954   : > { %vm9991_vm7 = vcmp.lt.s32.totalorder %v6890_v30, 1  ;;  %v7967_v54 = vrot.slane %v7565_v50, 1  ;;  %v9709_v12 = vrot.slane %v7852_v15, 1  ;;  %v7970_v41 = vrot.slane %v6372_v45, 1 }
 0x955   : > { %v7964_v4 = vsel %vm9991_vm7, %v1983_v42, %v1984_v25  ;;  %v2626_v5 = vpack.c.bf16 %v2133_v60, %v2110_v6  ;;  %vm9992_vm6 = vmmov %vm9991_vm7  ;;  %v9993_v63 = vrot.slane %v7828_v43, 1  ;;  %vm9994_vm4 = vcmp.lt.s32.totalorder %v6890_v30, 7 }
 0x956   : > { %v7974_v24 = vsel %vm9992_vm6, %v1984_v25, %v1985_v40  ;;  %v2627_v47 = vpack.c.bf16 %v2135_v14, %v2108_v34  ;;  %vm9995_vm7 = vmmov %vm9992_vm6  ;;  %vm7987_vm14 = vcmp.le.s32.totalorder %v1849_v44, 14  ;;  %v9997_v6 = vmov 0 }
 0x957   : > { %v2105_v23 = vsel %vm9994_vm4, %v2072_v28, %v9993_v63  ;;  %v7982_v33 = vsel %vm9995_vm7, %v1982_v51, %v1983_v42  ;;  %vm9996_vm9 = vmmov %vm9994_vm4  ;;  %v9998_v6 = vsel %vm7987_vm14, 4294967295, %v9997_v6  ;;  %vm10000_vm6 = vcmask 130048  }
 0x958   : > { %v2106_v61 = vsel %vm9996_vm9, %v7215_v57, %v2072_v28  ;;  %9999 = vst [vmem:[#allocation16_spill] sm:$0xff] %v9998_v6  ;;  %5941 = vmatmul.mubr.msk.bf16.gmra.mxu1 %vm10000_vm6, %v2626_v5  ;;  %v2165_v60 = vpack.c.bf16 %v7982_v33, %v2047_v31  ;;  %v2049_v25 = vsel %vm7954_vm8, %v7964_v4, 0.0  ;;  %v7999_v51 = vsel %vm9994_vm4, %v7970_v41, %v2075_v9  ;;  %vm10001_vm9 = vmmov %vm10000_vm6 }
 0x959   : > { %v1858_v42 = vand.u32 15, %v1826_v22  ;;  %v1987_v57 = vrot.slane %v7589_v48, 7  ;;  %5944 = vmatprep.mubr.msk.bf16.mxu1 %vm10001_vm9, %v2627_v47  ;;  %v2166_v28 = vpack.c.bf16 %v7974_v24, %v2049_v25  ;;  %vm10002_vm7 = vmmov %vm9994_vm4  ;;  %v1986_v44 = vrot.slane %v7610_v21, 7 }
 0x95a   : > { %v8008_v34 = vsel %vm10002_vm7, %v7659_v0, %v7967_v54  ;;  %vm10003_vm6 = vmmov %vm9994_vm4  ;;  %v1989_v48 = vrot.slane %v7599_v3, 7  ;;  %v10006_v31 = vrot.slane %v7597_v7, 1  ;;  %v1988_v5 = vrot.slane %v7619_v19, 7 }
 0x95b   : > { %v8015_v14 = vsel %vm10003_vm6, %v9709_v12, %v7659_v0  ;;  %vm10005_vm4 = vmmov %vm10001_vm9  ;;  %v2137_v0 = vsel %vm7913_vm10, %v2105_v23, 0.0  ;;  %v2139_v3 = vsel %vm7987_vm14, %v7999_v51, 0.0  ;;  %v2076_v63 = vrot.slane %v7502_v53, 1  ;;  %v8395_v12 = vld [vmem:[#allocation2 + $0x98] sm:$0xff] }
 0x95c   : > { %10004 = vst [vmem:[#allocation81_spill] sm:$0xff] %v8015_v14  ;;  %5919 = vmatmul.mubr.msk.bf16.gmra.mxu0 %vm10005_vm4, %v2165_v60  ;;  %vm10007_vm9 = vmmov %vm10003_vm6  ;;  %vm8038_vm6 = vcmp.ge.s32.totalorder %v1858_v42, 1  ;;  %v10009_v47 = vmov 0  ;;  %v2628_v53 = vpack.c.bf16 %v2137_v0, %v2106_v61  ;;  %v10015_v42 = vrot.slane %v7828_v43, 1 }
 0x95d   : > { %v4070_v45 = vsel %vm10007_vm9, %v7967_v54, %v10006_v31  ;;  %vm10008_vm7 = vmmov %vm10005_vm4  ;;  %v10010_v47 = vsel %vm8038_vm6, 4294967295, %v10009_v47  ;;  %vm10011_vm4 = vcmp.lt.s32.totalorder %v6890_v30, 1  ;;  %vm10016_vm14 = vcmp.lt.s32.totalorder %v6890_v30, 7 }
 0x95e   : > { %5922 = vmatprep.mubr.msk.bf16.mxu0 %vm10008_vm7, %v2166_v28  ;;  %v4130_v21 = vsel %vm7765_vm0, %v4070_v45, 0.0  ;;  %v8044_v19 = vsel %vm10011_vm4, %v1985_v40, %v1986_v44  ;;  %vm10013_vm9 = vmmov %vm10011_vm4  ;;  %v2104_v28 = vsel %vm10016_vm14, %v10015_v42, %v7970_v41  ;;  %v8064_v40 = vsel %vm10011_vm4, %v1988_v5, %v1989_v48 }
 0x95f   : > { %v8047_v60 = vpack.c.bf16 %v4130_v21, %v8008_v34  ;;  %v8051_v23 = vsel %vm10013_vm9, %v1986_v44, %v1987_v57  ;;  %vm10014_vm7 = vmmov %vm10011_vm4  ;;  %v2629_v31 = vpack.c.bf16 %v2139_v3, %v2104_v28  ;;  %v2051_v44 = vsel %vm8038_vm6, %v8044_v19, 0.0 }
 0x960   : > { %v8055_v25 = vsel %vm10014_vm7, %v1987_v57, %v1988_v5  ;;  %v1990_v45 = vrot.slane %v7621_v10, 7  ;;  %vm10017_vm9 = vcmask 130048   ;;  %v2167_v61 = vpack.c.bf16 %v8051_v23, %v2051_v44  ;;  %vm10023_vm6 = vmmov %vm10016_vm14 }
 0x961   : > { %10012 = vst [vmem:[#allocation82_spill] sm:$0xff] %v8047_v60  ;;  %5945 = vmatmul.mubr.msk.bf16.gmra.mxu1 %vm10017_vm9, %v2628_v53  ;;  %v2053_v43 = vsel %vm7869_vm5, %v8055_v25, 0.0  ;;  %v10018_v57 = vrot.slane %v7517_v56, 1  ;;  %vm10019_vm7 = vmmov %vm10017_vm9  ;;  %vm10021_vm9 = vcmp.lt.s32.totalorder %v6890_v30, 1  ;;  %v8091_v3 = vsel %vm10023_vm6, %v2075_v9, %v2076_v63 }
 0x962   : > { %5948 = vmatprep.mubr.msk.bf16.mxu1 %vm10019_vm7, %v2629_v31  ;;  %v2168_v0 = vpack.c.bf16 %v8064_v40, %v2053_v43  ;;  %vm10020_vm4 = vmmov %vm10019_vm7  ;;  %v8086_v10 = vsel %vm10021_vm9, %v1989_v48, %v1990_v45  ;;  %v2143_v21 = vsel %vm7674_vm13, %v7710_v59, 0.0  ;;  %v10030_v31 = vld [vmem:[#allocation32_spill] sm:$0xff] }
 0x963   : > { %v8079_v5 = vsel %vm10016_vm14, %v2076_v63, %v10018_v57  ;;  %vm10022_vm10 = vmmov %vm10020_vm4  ;;  %v2055_v53 = vsel %vm7663_vm2, %v8086_v10, 0.0  ;;  %v2631_v42 = vpack.c.bf16 %v2143_v21, %v7721_v29  ;;  %v2145_v29 = vsel %vm7730_vm15, %v7698_v35, 0.0  ;;  %v10038_v57 = vld [vmem:[#allocation54_spill] sm:$0xff]  ;;  %v10040_v21 = vld [vmem:[#allocation71_spill] sm:$0xff] }
 0x964   : > { %5923 = vmatmul.mubr.msk.bf16.gmra.mxu0 %vm10020_vm4, %v2167_v61  ;;  %v2141_v56 = vsel %vm7670_vm3, %v8079_v5, 0.0  ;;  %vm10025_vm6 = vmmov %vm10020_vm4  ;;  %v2632_v28 = vpack.c.bf16 %v2145_v29, %v10029_v13  ;;  %v1831_v35 = vadd.s32 248, %v6890_v30  ;;  %v10035_v61 = vld [vmem:[#allocation18_spill] sm:$0xff] }
 0x965   : > { %5926 = vmatprep.mubr.msk.bf16.mxu0 %vm10022_vm10, %v2168_v0  ;;  %v2630_v48 = vpack.c.bf16 %v2141_v56, %v8091_v3  ;;  %vm10024_vm10 = vmmov %vm10021_vm9  ;;  %v10039_v0 = vld [vmem:[#allocation76_spill] sm:$0xff] }
 0x966   : > { %v8107_v9 = vsel %vm10024_vm10, %v1990_v45, %v7534_v46  ;;  %vm10026_vm14 = vmmov %vm10020_vm4  ;;  %v2147_v46 = vsel %vm7757_vm11, %v7742_v18, 0.0  ;;  %v8127_v45 = vld [vmem:[%s9613_s3 + $0x38] sm:$0xff]   ;;  %v2151_v56 = vsel %vm7765_vm0, %v10039_v0, 0.0  ;;  %v10063_v0 = vld [vmem:[#allocation79_spill] sm:$0xff] }
 0x967   : > { %v2169_v63 = vpack.c.bf16 %v8107_v9, %v2055_v53  ;;  %vm10027_vm7 = vmmov %vm10020_vm4  ;;  %v2633_v44 = vpack.c.bf16 %v2147_v46, %v10030_v31  ;;  %v10037_v18 = vld [vmem:[#allocation70_spill] sm:$0xff]  ;;  %v10044_v46 = vld [vmem:[#allocation64_spill] sm:$0xff] }
 0x968   : > { %vm10031_vm2 = vmmov %vm10020_vm4  ;;  %v2149_v43 = vsel %vm7793_vm12, %v10037_v18, 0.0  ;;  %v10051_v31 = vld [vmem:[#allocation33_spill] sm:$0xff]  ;;  %v10059_v18 = vld [vmem:[#allocation35_spill] sm:$0xff] }
 0x969   : > { %5949 = vmatmul.mubr.msk.bf16.gmra.mxu1 %vm10025_vm6, %v2630_v48  ;;  %vm10032_vm9 = vmmov %vm10031_vm2  ;;  %v2634_v53 = vpack.c.bf16 %v2149_v43, %v10040_v21  ;;  %v1863_v48 = vand.u32 15, %v1831_v35  ;;  %v10055_v35 = vld [vmem:[#allocation41_spill] sm:$0xff]  ;;  %v8173_v43 = vld [vmem:[%s9613_s3 + $0x40] sm:$0xff]   ;;  %v2999_v21 = vsel %vm7158_vm1, %v10063_v0, 0.0 }
 0x96a   : > { %5952 = vmatprep.mubr.msk.bf16.mxu1 %vm10026_vm14, %v2631_v42  ;;  %vm10034_vm10 = vmmov %vm10031_vm2  ;;  %v2635_v42 = vpack.c.bf16 %v2151_v56, %v7811_v36  ;;  %v10095_v0 = vld [vmem:[#allocation63_spill] sm:$0xff] }
 0x96b   : > { %vm10036_vm6 = vmmov %vm10031_vm2  ;;  %vm8154_vm0 = vcmp.le.s32.totalorder %v1863_v48, 14  ;;  %v3119_v48 = vpack.c.bf16 %v7875_v55, %v2999_v21 }
 0x96c   : > { %5927 = vmatmul.mubr.msk.bf16.gmra.mxu0 %vm10027_vm7, %v2169_v63  ;;  %vm10041_vm14 = vmmov %vm10031_vm2  ;;  %v10042_v63 = vld [vmem:[#allocation40_spill] sm:$0xff]  ;;  %vm10045_vm7 = vcmp.lt.s32.totalorder %v6890_v30, 7  ;;  %v10049_v62 = vsel %vm8154_vm0, 4294967295, %v10048_v62 }
 0x96d   : > { %5966 = vmatprep.mubr.msk.bf16.mxu0 %vm10020_vm4, %v7627_v26  ;;  %v10033_v26 = vld [vmem:[#allocation17_spill] sm:$0xff]  ;;  %v10043_v29 = vrot.slane %v10042_v63, 1  ;;  %vm10046_vm4 = vmmov %vm10031_vm2  ;;  %10050 = vst [vmem:[#allocation62_spill] sm:$0xff] %v10049_v62  ;;  %v10067_v63 = vld [vmem:[#allocation36_spill] sm:$0xff] }
 0x96e   : > { %vm10081_vm12 = vmmov %vm10031_vm2 }
 0x96f   : > { %v2121_v13 = vsel %vm10045_vm7, %v10044_v46, %v10043_v29  ;;  %vm10060_vm7 = vmmov %vm10031_vm2  ;;  %v10071_v46 = vld [vmem:[#allocation80_spill] sm:$0xff] }
 0x970   : > { %v2153_v36 = vsel %vm8154_vm0, %v2121_v13, 0.0  ;;  %v10072_v13 = vld [vmem:[#allocation14_spill] sm:$0xff]  ;;  %vm10094_vm11 = vmmov %vm10031_vm2 }
 0x971   : > { %5953 = vmatmul.mubr.msk.bf16.gmra.mxu1 %vm10031_vm2, %v2632_v28  ;;  %v10047_v28 = vld [vmem:[#allocation19_spill] sm:$0xff]  ;;  %vm10098_vm15 = vmmov %vm10031_vm2 }
 0x972   : > { %5956 = vmatprep.mubr.msk.bf16.mxu1 %vm10032_vm9, %v2633_v44  ;;  %vm10052_vm9 = vmmov %vm10031_vm2  ;;  %v10053_v44 = vld [vmem:[#allocation72_spill] sm:$0xff] }
 0x974   : > { %5967 = vmatmul.mubr.msk.bf16.vlgmr.msra.gmra.mxu0 %vm10034_vm10, %v10033_v26  ;;  %v2636_v26 = vpack.c.bf16 %v2153_v36, %v10053_v44  ;;  %vm10054_vm10 = vmmov %vm10031_vm2  ;;  %v10076_v36 = vld [vmem:[#allocation45_spill] sm:$0xff] }
 0x975   : > { %5970 = vmatprep.mubr.msk.bf16.mxu0 %vm10036_vm6, %v10035_v61  ;;  %6033 = vmatpush3.bf16.msra.mxu0 %v10038_v57  ;;  %vm10056_vm6 = vmmov %vm10031_vm2  ;;  %v10057_v61 = vld [vmem:[#allocation34_spill] sm:$0xff] }
 0x976   : > { %6100 = vmatprep.subr.bf16.mxu0 %v8127_v45  ;;  %v10061_v57 = vld [vmem:[#allocation42_spill] sm:$0xff] }
 0x979   : > { %5957 = vmatmul.mubr.msk.bf16.gmra.mxu1 %vm10041_vm14, %v2634_v53  ;;  %vm10058_vm14 = vmmov %vm10031_vm2  ;;  %v10065_v53 = vld [vmem:[#allocation43_spill] sm:$0xff] }
 0x97a   : > { %5960 = vmatprep.mubr.msk.bf16.mxu1 %vm10046_vm4, %v2635_v42  ;;  %vm10062_vm4 = vmmov %vm10031_vm2  ;;  %v10066_v42 = vld [vmem:[#allocation74_spill] sm:$0xff] }
 0x97c   : > { %5971 = vmatmul.mubr.msk.bf16.gmra.mxu0 %vm10031_vm2, %v10047_v28 }
 0x97d   : > { %5974 = vmatprep.mubr.msk.bf16.mxu0 %vm10052_vm9, %v10051_v31  ;;  %vm10068_vm9 = vmmov %vm10031_vm2  ;;  %v10074_v31 = vld [vmem:[#allocation44_spill] sm:$0xff] }
 0x981   : > { %5961 = vmatmul.mubr.msk.bf16.gmra.mxu1 %vm10054_vm10, %v2636_v26  ;;  %vm10069_vm10 = vmmov %vm10031_vm2  ;;  %v10080_v26 = vld [vmem:[#allocation46_spill] sm:$0xff] }
 0x982   : > { %6000 = vmatprep.mubr.msk.bf16.mxu1 %vm10056_vm6, %v10055_v35  ;;  %vm10070_vm6 = vnez %v9971_v16 }
 0x983   : > { %v3003_v29 = vsel %vm10070_vm6, %v7939_v37, 0.0 }
 0x984   : > { %5975 = vmatmul.mubr.msk.bf16.gmra.mxu0 %vm10058_vm14, %v10057_v61  ;;  %vm10073_vm14 = vnez %v10072_v13  ;;  %v3121_v44 = vpack.c.bf16 %v7982_v33, %v3003_v29  ;;  %v10082_v61 = vld [vmem:[#allocation47_spill] sm:$0xff] }
 0x985   : > { %5978 = vmatprep.mubr.msk.bf16.mxu0 %vm10060_vm7, %v10059_v18  ;;  %v3001_v28 = vsel %vm10073_vm14, %v10071_v46, 0.0  ;;  %vm10075_vm7 = vmmov %vm10031_vm2  ;;  %v10086_v18 = vld [vmem:[#allocation48_spill] sm:$0xff]  ;;  %v8255_v46 = vld [vmem:[#allocation2 + $0x20] sm:$0xff] }
 0x986   : > { %v3120_v55 = vpack.c.bf16 %v7891_v2, %v3001_v28  ;;  %v3007_v2 = vsel %vm7954_vm8, %v8044_v19, 0.0  ;;  %v3941_v28 = vrot.slane %v8255_v46, 7 }
 0x987   : > { %v3123_v33 = vpack.c.bf16 %v8051_v23, %v3007_v2 }
 0x989   : > { %6001 = vmatmul.mubr.msk.bf16.vlgmr.msra.gmra.mxu1 %vm10062_vm4, %v10061_v57  ;;  %vm10077_vm4 = vmmov %vm10031_vm2  ;;  %v10088_v57 = vld [vmem:[#allocation49_spill] sm:$0xff] }
 0x98a   : > { %6004 = vmatprep.mubr.msk.bf16.mxu1 %vm10031_vm2, %v10065_v53  ;;  %6067 = vmatpush3.bf16.msra.mxu1 %v10066_v42  ;;  %v10101_v53 = vld [vmem:[#allocation57_spill] sm:$0xff]  ;;  %v10103_v42 = vld [vmem:[#allocation22_spill] sm:$0xff] }
 0x98b   : > { %6134 = vmatprep.subr.bf16.mxu1 %v8173_v43 }
 0x98c   : > { %5979 = vmatmul.mubr.msk.bf16.gmra.mxu0 %vm10068_vm9, %v10067_v63  ;;  %vm10078_vm9 = vmmov %vm10031_vm2  ;;  %v10105_v63 = vld [vmem:[#allocation21_spill] sm:$0xff] }
 0x98d   : > { %5982 = vmatprep.mubr.msk.bf16.mxu0 %vm10069_vm10, %v3119_v48  ;;  %vm10079_vm10 = vnez %v9988_v52 }
 0x98e   : > { %v3005_v37 = vsel %vm10079_vm10, %v7964_v4, 0.0  ;;  %v3011_v4 = vsel %vm7869_vm5, %v8086_v10, 0.0  ;;  %vm10092_vm5 = vmmov %vm10031_vm2  ;;  %v10093_v10 = vld [vmem:[#allocation52_spill] sm:$0xff] }
 0x98f   : > { %v3122_v35 = vpack.c.bf16 %v7974_v24, %v3005_v37  ;;  %v3125_v23 = vpack.c.bf16 %v8107_v9, %v3011_v4  ;;  %v10099_v9 = vld [vmem:[#allocation53_spill] sm:$0xff] }
 0x991   : > { %6005 = vmatmul.mubr.msk.bf16.gmra.mxu1 %vm10075_vm7, %v10074_v31  ;;  %vm10083_vm7 = vmmov %vm10031_vm2  ;;  %v10106_v31 = vld [vmem:[#allocation58_spill] sm:$0xff] }
 0x992   : > { %6008 = vmatprep.mubr.msk.bf16.mxu1 %vm10077_vm4, %v10076_v36  ;;  %vm10084_vm4 = vmmov %vm10031_vm2 }
 0x994   : > { %5983 = vmatmul.mubr.msk.bf16.gmra.mxu0 %vm10031_vm2, %v3120_v55  ;;  %v8260_v55 = vld [vmem:[#allocation2 + $0x28] sm:$0xff] }
 0x995   : > { %5986 = vmatprep.mubr.msk.bf16.mxu0 %vm10078_vm9, %v3121_v44  ;;  %vm10087_vm9 = vmmov %vm10031_vm2  ;;  %v3942_v36 = vrot.slane %v8260_v55, 7  ;;  %v10108_v44 = vld [vmem:[#allocation61_spill] sm:$0xff]  ;;  %v4399_v16 = vpack.c.bf16 %v8260_v55, %v8255_v46 }
 0x999   : > { %6009 = vmatmul.mubr.msk.bf16.gmra.mxu1 %vm10081_vm12, %v10080_v26  ;;  %vm10085_vm12 = vnez %v10010_v47  ;;  %v10110_v26 = vld [vmem:[#allocation23_spill] sm:$0xff] }
 0x99a   : > { %6012 = vmatprep.mubr.msk.bf16.mxu1 %vm10083_vm7, %v10082_v61  ;;  %v3009_v24 = vsel %vm10085_vm12, %v8055_v25, 0.0  ;;  %vm10089_vm7 = vmmov %vm10031_vm2  ;;  %v8234_v25 = vpop.f32.mrf.mxu1 }
 0x99b   : > { %v3124_v19 = vpack.c.bf16 %v8064_v40, %v3009_v24  ;;  %v10097_v40 = vld [vmem:[#allocation20_spill] sm:$0xff] }
 0x99c   : > { %5987 = vmatmul.mubr.msk.bf16.gmra.mxu0 %vm10084_vm4, %v3122_v35  ;;  %vm10090_vm4 = vmmov %vm10031_vm2  ;;  %v8240_v21 = vpop.f32.mrf.mxu1  ;;  %v10114_v35 = vld [vmem:[#allocation55_spill] sm:$0xff]  ;;  %v8279_v24 = vld [vmem:[#allocation2 + $0x48] sm:$0xff] }
 0x99d   : > { %5990 = vmatprep.mubr.msk.bf16.mxu0 %vm10031_vm2, %v3123_v33  ;;  %v10115_v2 = vrot.slane %v10114_v35, 7  ;;  %v8275_v33 = vld [vmem:[#allocation2 + $0x38] sm:$0xff] }
 0x99e   : > { %v8246_v48 = vpop.f32.mrf.mxu1 }
 0x9a0   : > { %v8253_v29 = vpop.f32.mrf.mxu1 }
 0x9a1   : > { %6013 = vmatmul.mubr.msk.bf16.gmra.mxu1 %vm10087_vm9, %v10086_v18  ;;  %vm10096_vm9 = vmmov %vm10031_vm2 }
 0x9a2   : > { %6016 = vmatprep.mubr.msk.bf16.mxu1 %vm10089_vm7, %v10088_v57  ;;  %vm10100_vm7 = vmmov %vm10031_vm2  ;;  %v8265_v37 = vpop.f32.mrf.mxu1 }
 0x9a4   : > { %5991 = vmatmul.mubr.msk.bf16.gmra.mxu0 %vm10090_vm4, %v3124_v19  ;;  %vm10102_vm4 = vmmov %vm10031_vm2  ;;  %v8281_v18 = vpop.f32.mrf.mxu1  ;;  %v10118_v19 = vld [vmem:[#allocation59_spill] sm:$0xff] }
 0x9a5   : > { %5994 = vmatprep.mubr.msk.bf16.mxu0 %vm10031_vm2, %v3125_v23  ;;  %v8285_v57 = vpack.c.bf16 %v7565_v50, %v10118_v19  ;;  %v8287_v23 = vld [vmem:[#allocation2 + $0x30] sm:$0xff]  ;;  %v3946_v50 = vrot.slane %v8279_v24, 7 }
 0x9a6   : > { %v8321_v19 = vld [vmem:[#allocation2 + $0x50] sm:$0xff] }
 0x9a7   : > { %10119 = vst [vmem:[#allocation32_spill] sm:$0xff] %v8285_v57 }
 0x9a9   : > { %6017 = vmatmul.mubr.msk.bf16.gmra.mxu1 %vm10092_vm5, %v10091_v11  ;;  %vm10109_vm5 = vmmov %vm10031_vm2  ;;  %v3943_v11 = vrot.slane %v8287_v23, 7 }
 0x9aa   : > { %6020 = vmatprep.mubr.msk.bf16.mxu1 %vm10094_vm11, %v10093_v10  ;;  %vm10104_vm11 = vmmov %vm10031_vm2  ;;  %v10120_v10 = vld [vmem:[#allocation51_spill] sm:$0xff] }
 0x9ac   : > { %5995 = vmatmul.mubr.msk.bf16.gmra.mxu0 %vm10096_vm9, %v10095_v0  ;;  %vm10111_vm9 = vmmov %vm10031_vm2 }
 0x9ad   : > { %6034 = vmatprep.mubr.msk.bf16.mxu0 %vm10098_vm15, %v10097_v40  ;;  %vm10107_vm15 = vmmov %vm10031_vm2  ;;  %v8292_v40 = vld [vmem:[#allocation2 + $0x40] sm:$0xff] }
 0x9b1   : > { %6021 = vmatmul.mubr.msk.bf16.gmra.mxu1 %vm10100_vm7, %v10099_v9  ;;  %vm10113_vm7 = vmmov %vm10031_vm2  ;;  %v3944_v9 = vrot.slane %v8275_v33, 7 }
 0x9b2   : > { %6024 = vmatprep.mubr.msk.bf16.mxu1 %vm10102_vm4, %v10101_v53  ;;  %vm10116_vm4 = vcmp.lt.s32.totalorder %v6890_v30, 1 }
 0x9b3   : > { %v4004_v61 = vsel %vm10116_vm4, %v10115_v2, %v3941_v28  ;;  %v8314_v2 = vld [vmem:[#allocation2 + $0x58] sm:$0xff] }
 0x9b4   : > { %6035 = vmatmul.mubr.msk.bf16.vlgmr.msra.gmra.mxu0 %vm10104_vm11, %v10103_v42  ;;  %vm10117_vm11 = vmmov %vm10116_vm4  ;;  %v3948_v22 = vrot.slane %v8314_v2, 7  ;;  %v4402_v47 = vpack.c.bf16 %v8314_v2, %v8321_v19 }
 0x9b5   : > { %6038 = vmatprep.mubr.msk.bf16.mxu0 %vm10031_vm2, %v10105_v63  ;;  %6101 = vmatpush3.bf16.msra.mxu0 %v8127_v45  ;;  %v10112_v45 = vld [vmem:[#allocation38_spill] sm:$0xff]  ;;  %v4003_v4 = vsel %vm10117_vm11, %v3941_v28, %v3942_v36  ;;  %vm10121_vm2 = vnez %v10120_v10  ;;  %v3945_v63 = vrot.slane %v8292_v40, 7  ;;  %v8302_v28 = vpop.f32.mrf.mxu1  ;;  %vm10129_vm11 = vmmov %vm10113_vm7  ;;  %v8323_v10 = vld [vmem:[#allocation2 + $0x68] sm:$0xff] }
 0x9b6   : > { %v4005_v0 = vsel %vm10121_vm2, %v4004_v61, 0.0 }
 0x9b7   : > { %v4133_v53 = vpack.c.bf16 %v4003_v4, %v4005_v0  ;;  %v8325_v0 = vpop.f32.mrf.mxu1 }
 0x9b9   : > { %6025 = vmatmul.mubr.msk.bf16.gmra.mxu1 %vm10107_vm15, %v10106_v31  ;;  %vm10122_vm15 = vmmov %vm10109_vm5  ;;  %v10125_v31 = vld [vmem:[#allocation39_spill] sm:$0xff] }
 0x9ba   : > { %6028 = vmatprep.mubr.msk.bf16.mxu1 %vm10109_vm5, %v10108_v44  ;;  %vm10123_vm5 = vmmov %vm10116_vm4  ;;  %v10126_v44 = vld [vmem:[#allocation3_spill] sm:$0xff] }
 0x9bb   : > { %v4002_v42 = vsel %vm10123_vm5, %v3942_v36, %v3943_v11  ;;  %vm10127_vm4 = vnez %v10126_v44  ;;  %vm10130_vm2 = vmmov %vm10123_vm5  ;;  %v8332_v44 = vld [vmem:[#allocation2 + $0x60] sm:$0xff] }
 0x9bc   : > { %6039 = vmatmul.mubr.msk.bf16.gmra.mxu0 %vm10111_vm9, %v10110_v26  ;;  %vm10124_vm9 = vmmov %vm10113_vm7  ;;  %v4007_v26 = vsel %vm10127_vm4, %v4002_v42, 0.0  ;;  %v4000_v36 = vsel %vm10130_vm2, %v3944_v9, %v3945_v63  ;;  %v10134_v42 = vld [vmem:[#allocation5_spill] sm:$0xff]  ;;  %vm10136_vm4 = vnez %v9998_v6 }
 0x9bd   : > { %6042 = vmatprep.mubr.msk.bf16.mxu0 %vm10113_vm7, %v10112_v45  ;;  %v10128_v45 = vld [vmem:[#allocation37_spill] sm:$0xff]  ;;  %vm10132_vm5 = vmmov %vm10130_vm2 }
 0x9be   : > { %v4001_v61 = vsel %vm10132_vm5, %v3943_v11, %v3944_v9  ;;  %v10137_v9 = vld [vmem:[#allocation27_spill] sm:$0xff] }
 0x9c1   : > { %6029 = vmatmul.mubr.msk.bf16.gmra.mxu1 %vm10122_vm15, %v8285_v57  ;;  %vm10131_vm15 = vmmov %vm10130_vm2  ;;  %vm10140_vm2 = vcmask 130048   ;;  %v8440_v57 = vld [vmem:[#allocation2 + $0xc0] sm:$0xff] }
 0x9c2   : > { %6068 = vmatprep.mubr.msk.bf16.mxu1 %vm10124_vm9, %v4133_v53  ;;  %v3999_v35 = vsel %vm10131_vm15, %v3945_v63, %v3946_v50  ;;  %vm10133_vm9 = vnez %v9977_v8  ;;  %v4134_v53 = vpack.c.bf16 %v4001_v61, %v4007_v26  ;;  %v3096_v63 = vsel %vm10136_vm4, %v8079_v5, 0.0  ;;  %vm10141_vm15 = vmmov %vm10140_vm2 }
 0x9c3   : > { %v3094_v4 = vsel %vm10133_vm9, %v7999_v51, 0.0  ;;  %v10138_v51 = vrot.slane %v10137_v9, 1  ;;  %v3950_v61 = vrot.slane %v8323_v10, 7  ;;  %v3651_v5 = vpack.c.bf16 %v3096_v63, %v8091_v3  ;;  %vm10142_vm5 = vmmov %vm10140_vm2  ;;  %v8357_v3 = vld [vmem:[#allocation2 + $0x70] sm:$0xff]  ;;  %v10148_v63 = vld [vmem:[#allocation8_spill] sm:$0xff] }
 0x9c4   : > { %6043 = vmatmul.mubr.msk.bf16.gmra.mxu0 %vm10113_vm7, %v10125_v31  ;;  %vm10135_vm7 = vnez %v10134_v42  ;;  %v8347_v42 = vpop.f32.mrf.mxu1  ;;  %v8365_v9 = vld [vmem:[#allocation2 + $0x88] sm:$0xff] }
 0x9c5   : > { %6046 = vmatprep.mubr.msk.bf16.mxu0 %vm10129_vm11, %v10128_v45  ;;  %v4009_v31 = vsel %vm10135_vm7, %v4000_v36, 0.0  ;;  %vm10139_vm11 = vcmp.lt.s32.totalorder %v6890_v30, 7  ;;  %v3947_v36 = vrot.slane %v8321_v19, 7  ;;  %vm10143_vm7 = vcmp.lt.s32.totalorder %v6890_v30, 1 }
 0x9c6   : > { %v4135_v11 = vpack.c.bf16 %v3999_v35, %v4009_v31  ;;  %v3063_v45 = vsel %vm10139_vm11, %v10138_v51, %v7970_v41  ;;  %v3949_v35 = vrot.slane %v8332_v44, 7  ;;  %vm10144_vm11 = vmmov %vm10140_vm2  ;;  %v8361_v31 = vld [vmem:[#allocation2 + $0x78] sm:$0xff] }
 0x9c7   : > { %v3650_v26 = vpack.c.bf16 %v3094_v4, %v3063_v45  ;;  %v3998_v41 = vsel %vm10143_vm7, %v3946_v50, %v3947_v36  ;;  %v8367_v50 = vpop.f32.mrf.mxu1  ;;  %v10150_v45 = vld [vmem:[#allocation6_spill] sm:$0xff] }
 0x9c9   : > { %6069 = vmatmul.mubr.msk.bf16.vlgmr.msra.gmra.mxu1 %vm10140_vm2, %v4134_v53  ;;  %vm10145_vm2 = vmmov %vm10143_vm7  ;;  %vm10151_vm7 = vnez %v10150_v45  ;;  %v10158_v45 = vld [vmem:[#allocation67_spill] sm:$0xff] }
 0x9ca   : > { %6072 = vmatprep.mubr.msk.bf16.mxu1 %vm10141_vm15, %v4135_v11  ;;  %6135 = vmatpush3.bf16.msra.mxu1 %v8173_v43  ;;  %v3997_v4 = vsel %vm10145_vm2, %v3947_v36, %v3948_v22  ;;  %vm10146_vm15 = vmmov %vm10145_vm2  ;;  %v8372_v36 = vld [vmem:[#allocation2 + $0x80] sm:$0xff] }
 0x9cb   : > { %v3996_v53 = vsel %vm10146_vm15, %v3948_v22, %v3949_v35  ;;  %vm10147_vm13 = vmmov %vm10145_vm2  ;;  %v3951_v22 = vrot.slane %v8357_v3, 7 }
 0x9cc   : > { %6047 = vmatmul.mubr.msk.bf16.gmra.mxu0 %vm10142_vm5, %v3650_v26  ;;  %v3995_v43 = vsel %vm10147_vm13, %v3949_v35, %v3950_v61  ;;  %vm10149_vm5 = vnez %v10148_v63  ;;  %v4013_v26 = vsel %vm10151_vm7, %v3996_v53, 0.0  ;;  %v3952_v35 = vrot.slane %v8361_v31, 7  ;;  %vm10152_vm13 = vmmov %vm10144_vm11  ;;  %v10156_v53 = vld [vmem:[#allocation66_spill] sm:$0xff] }
 0x9cd   : > { %6050 = vmatprep.mubr.msk.bf16.mxu0 %vm10144_vm11, %v3651_v5  ;;  %v4011_v11 = vsel %vm10149_vm5, %v3998_v41, 0.0  ;;  %v4137_v5 = vpack.c.bf16 %v3995_v43, %v4013_v26  ;;  %vm10153_vm11 = vmmov %vm10145_vm2  ;;  %v3954_v63 = vrot.slane %v8365_v9, 7  ;;  %v10160_v43 = vld [vmem:[#allocation28_spill] sm:$0xff]  ;;  %v8391_v26 = vld [vmem:[#allocation2 + $0x90] sm:$0xff] }
 0x9ce   : > { %v4136_v51 = vpack.c.bf16 %v3997_v4, %v4011_v11  ;;  %v3994_v41 = vsel %vm10153_vm11, %v3950_v61, %v3951_v22  ;;  %vm10154_vm2 = vmmov %vm10152_vm13  ;;  %v3953_v4 = vrot.slane %v8372_v36, 7  ;;  %v8381_v11 = vpop.f32.mrf.mxu1  ;;  %vm10161_vm7 = vnez %v10160_v43  ;;  %v10165_v43 = vld [vmem:[#allocation29_spill] sm:$0xff] }
 0x9cf   : > { %10155 = vst [vmem:[#allocation17_spill] sm:$0xff] %v8381_v11  ;;  %vm10157_vm15 = vmmov %vm10154_vm2  ;;  %v3955_v14 = vrot.slane %v8391_v26, 7  ;;  %v4046_v11 = vrot.slane %v8323_v10, 1 }
 0x9d0   : > { %vm10159_vm5 = vmmov %vm10154_vm2  ;;  %v8401_v60 = vpop.f32.mrf.mxu1 }
 0x9d1   : > { %6073 = vmatmul.mubr.msk.bf16.gmra.mxu1 %vm10152_vm13, %v4136_v51  ;;  %v4015_v51 = vsel %vm10161_vm7, %v3994_v41, 0.0  ;;  %vm10162_vm13 = vmmov %vm10153_vm11  ;;  %10164 = vst [vmem:[#allocation18_spill] sm:$0xff] %v8401_v60  ;;  %v8479_v60 = vld [vmem:[#allocation2 + $0xe0] sm:$0xff] }
 0x9d2   : > { %6076 = vmatprep.mubr.msk.bf16.mxu1 %vm10154_vm2, %v4137_v5  ;;  %v3992_v61 = vsel %vm10162_vm13, %v3952_v35, %v3953_v4  ;;  %v3991_v5 = vsel %vm10153_vm11, %v3953_v4, %v3954_v63  ;;  %vm10163_vm2 = vmmov %vm10153_vm11  ;;  %v3956_v4 = vrot.slane %v8395_v12, 7 }
 0x9d3   : > { %v3993_v7 = vsel %vm10163_vm2, %v3951_v22, %v3952_v35  ;;  %vm10167_vm7 = vmmov %vm10159_vm5  ;;  %v3957_v22 = vrot.slane %v8406_v38, 7  ;;  %v8413_v35 = vpop.f32.mrf.mxu1 }
 0x9d4   : > { %6051 = vmatmul.mubr.msk.bf16.gmra.mxu0 %vm10157_vm15, %v10156_v53  ;;  %v8399_v53 = vld [vmem:[#allocation2 + $0xa8] sm:$0xff]  ;;  %vm10166_vm15 = vnez %v10165_v43  ;;  %10168 = vst [vmem:[#allocation70_spill] sm:$0xff] %v8413_v35  ;;  %vm10170_vm13 = vmmov %vm10159_vm5 }
 0x9d5   : > { %6054 = vmatprep.mubr.msk.bf16.mxu0 %vm10159_vm5, %v10158_v45  ;;  %v4138_v45 = vpack.c.bf16 %v3993_v7, %v4015_v51  ;;  %v4017_v41 = vsel %vm10166_vm15, %v3992_v61, 0.0  ;;  %v3958_v27 = vrot.slane %v8399_v53, 7  ;;  %v10169_v7 = vld [vmem:[#allocation69_spill] sm:$0xff]  ;;  %vm10171_vm11 = vmmov %vm10163_vm2  ;;  %v10172_v61 = vld [vmem:[#allocation75_spill] sm:$0xff]  ;;  %v8435_v39 = vpop.f32.mrf.mxu1 }
 0x9d6   : > { %v4139_v59 = vpack.c.bf16 %v3991_v5, %v4017_v41  ;;  %v3990_v51 = vsel %vm10171_vm11, %v3954_v63, %v3955_v14  ;;  %vm10173_vm2 = vmmov %vm10159_vm5  ;;  %v8429_v41 = vld [vmem:[#allocation2 + $0xb8] sm:$0xff]  ;;  %v8433_v63 = vld [vmem:[#allocation2 + $0xc8] sm:$0xff]  ;;  %10179 = vst [vmem:[#allocation54_spill] sm:$0xff] %v8435_v39 }
 0x9d7   : > { %vm10174_vm15 = vmmov %vm10171_vm11  ;;  %v8449_v56 = vpop.f32.mrf.mxu1 }
 0x9d8   : > { %v3989_v5 = vsel %vm10174_vm15, %v3955_v14, %v3956_v4  ;;  %10183 = vst [vmem:[#allocation76_spill] sm:$0xff] %v8449_v56  ;;  %v8465_v56 = vld [vmem:[#allocation2 + $0xd8] sm:$0xff] }
 0x9d9   : > { %6077 = vmatmul.mubr.msk.bf16.gmra.mxu1 %vm10159_vm5, %v4138_v45  ;;  %vm10175_vm5 = vmmov %vm10171_vm11  ;;  %v8475_v13 = vpop.f32.mrf.mxu1  ;;  %v3964_v6 = vrot.slane %v8465_v56, 7 }
 0x9da   : > { %6080 = vmatprep.mubr.msk.bf16.mxu1 %vm10167_vm7, %v4139_v59  ;;  %v3988_v45 = vsel %vm10175_vm5, %v3956_v4, %v3957_v22  ;;  %v8425_v59 = vld [vmem:[#allocation2 + $0xb0] sm:$0xff]  ;;  %vm10176_vm7 = vmmov %vm10175_vm5 }
 0x9db   : > { %v3987_v43 = vsel %vm10176_vm7, %v3957_v22, %v3958_v27  ;;  %v4021_v14 = vsel %vm7158_vm1, %v3988_v45, 0.0  ;;  %v3959_v4 = vrot.slane %v8425_v59, 7  ;;  %v3960_v22 = vrot.slane %v8429_v41, 7  ;;  %vm10180_vm11 = vmmov %vm10173_vm2  ;;  %v10186_v45 = vld [vmem:[#allocation9_spill] sm:$0xff] }
 0x9dc   : > { %6055 = vmatmul.mubr.msk.bf16.gmra.mxu0 %vm10170_vm13, %v10169_v7  ;;  %v10177_v7 = vld [vmem:[#allocation30_spill] sm:$0xff]  ;;  %v4141_v35 = vpack.c.bf16 %v3987_v43, %v4021_v14  ;;  %vm10182_vm15 = vmmov %vm10180_vm11 }
 0x9dd   : > { %6058 = vmatprep.mubr.msk.bf16.mxu0 %vm10173_vm2, %v10172_v61  ;;  %vm10178_vm13 = vnez %v10177_v7  ;;  %vm10181_vm2 = vmmov %vm10175_vm5  ;;  %v3962_v7 = vrot.slane %v8433_v63, 7  ;;  %vm10187_vm5 = vcmp.lt.s32.totalorder %v6890_v30, 7 }
 0x9de   : > { %v4019_v1 = vsel %vm10178_vm13, %v3990_v51, 0.0  ;;  %v3986_v51 = vsel %vm10181_vm2, %v3958_v27, %v3959_v4  ;;  %vm10185_vm1 = vmmov %vm10180_vm11  ;;  %v3078_v43 = vsel %vm10187_vm5, %v7967_v54, %v10186_v45  ;;  %v8471_v45 = vld [vmem:[#allocation2 + $0xd0] sm:$0xff] }
 0x9df   : > { %v4140_v61 = vpack.c.bf16 %v3989_v5, %v4019_v1  ;;  %v3961_v1 = vrot.slane %v8440_v57, 7  ;;  %v10184_v5 = vld [vmem:[#allocation13_spill] sm:$0xff]  ;;  %vm10189_vm7 = vmmov %vm10185_vm1  ;;  %v4023_v27 = vsel %vm10073_vm14, %v3986_v51, 0.0  ;;  %v3110_v54 = vsel %vm8154_vm0, %v3078_v43, 0.0  ;;  %v8482_v8 = vpop.f32.mrf.mxu1 }
 0x9e0   : > { %vm10190_vm13 = vmmov %vm10181_vm2 }
 0x9e1   : > { %6081 = vmatmul.mubr.msk.bf16.gmra.mxu1 %vm10180_vm11, %v4140_v61  ;;  %v10188_v61 = vld [vmem:[#allocation77_spill] sm:$0xff]  ;;  %vm10191_vm11 = vmmov %vm10181_vm2 }
 0x9e2   : > { %6084 = vmatprep.mubr.msk.bf16.mxu1 %vm10182_vm15, %v4141_v35  ;;  %v3984_v35 = vsel %vm10190_vm13, %v3960_v22, %v3961_v1  ;;  %v3983_v14 = vsel %vm10191_vm11, %v3961_v1, %v3962_v7  ;;  %vm10192_vm14 = vmmov %vm10185_vm1 }
 0x9e3   : > { %v4025_v39 = vsel %vm10070_vm6, %v3984_v35, 0.0  ;;  %vm10193_vm15 = vmmov %vm10185_vm1 }
 0x9e4   : > { %6059 = vmatmul.mubr.msk.bf16.gmra.mxu0 %vm10185_vm1, %v10184_v5  ;;  %v3985_v5 = vsel %vm10181_vm2, %v3959_v4, %v3960_v22  ;;  %v4143_v1 = vpack.c.bf16 %v3983_v14, %v4025_v39  ;;  %v3658_v4 = vpack.c.bf16 %v3110_v54, %v8008_v34  ;;  %v3963_v22 = vrot.slane %v8471_v45, 7  ;;  %v8492_v39 = vpop.f32.mrf.mxu1  ;;  %vm10194_vm6 = vmmov %vm10185_vm1 }
 0x9e5   : > { %6062 = vmatprep.mubr.msk.bf16.mxu0 %vm10189_vm7, %v10188_v61  ;;  %v8473_v61 = vld [vmem:[#allocation2 + $0xe8] sm:$0xff]  ;;  %v4142_v51 = vpack.c.bf16 %v3985_v5, %v4023_v27  ;;  %v3965_v27 = vrot.slane %v8479_v60, 7  ;;  %vm10195_vm1 = vmmov %vm10181_vm2  ;;  %v8502_v5 = vld [vmem:[#allocation2 + $0xf0] sm:$0xff] }
 0x9e6   : > { %v3966_v43 = vrot.slane %v8473_v61, 7  ;;  %v3982_v35 = vsel %vm10195_vm1, %v3962_v7, %v3963_v22  ;;  %vm10196_vm5 = vmmov %vm10194_vm6  ;;  %10199 = vst [vmem:[#allocation71_spill] sm:$0xff] %v8502_v5  ;;  %v8504_v46 = vpop.f32.mrf.mxu1 }
 0x9e7   : > { %vm10197_vm7 = vmmov %vm10195_vm1  ;;  %v4027_v54 = vsel %vm10079_vm10, %v3982_v35, 0.0 }
 0x9e8   : > { %v3981_v34 = vsel %vm10197_vm7, %v3963_v22, %v3964_v6  ;;  %vm10198_vm13 = vmmov %vm10195_vm1 }
 0x9e9   : > { %6085 = vmatmul.mubr.msk.bf16.gmra.mxu1 %vm10192_vm14, %v4142_v51  ;;  %v3980_v14 = vsel %vm10198_vm13, %v3964_v6, %v3965_v27  ;;  %vm10200_vm11 = vmmov %vm10195_vm1  ;;  %v8510_v51 = vpop.f32.mrf.mxu1  ;;  %v4144_v7 = vpack.c.bf16 %v3981_v34, %v4027_v54 }
 0x9ea   : > { %6088 = vmatprep.mubr.msk.bf16.mxu1 %vm10193_vm15, %v4143_v1  ;;  %v3979_v55 = vsel %vm10200_vm11, %v3965_v27, %v3966_v43  ;;  %10201 = vst [vmem:[#allocation40_spill] sm:$0xff] %v8510_v51  ;;  %v4029_v1 = vsel %vm7954_vm8, %v3980_v14, 0.0  ;;  %vm10203_vm2 = vmmov %vm10196_vm5  ;;  %v4401_v27 = vpack.c.bf16 %v8279_v24, %v8292_v40  ;;  %v5900_v35 = vpop.f32.mrf.mxu0  ;;  %vm10223_vm11 = vcmp.lt.s32.totalorder %v6890_v30, 7 }
 0x9eb   : > { %v4145_v22 = vpack.c.bf16 %v3979_v55, %v4029_v1  ;;  %v8515_v6 = vpop.f32.mrf.mxu1  ;;  %vm10204_vm14 = vmmov %vm10195_vm1  ;;  %v4047_v51 = vrot.slane %v8357_v3, 1 }
 0x9ec   : > { %6063 = vmatmul.mubr.msk.bf16.gmra.mxu0 %vm10194_vm6, %v3658_v4  ;;  %v3967_v4 = vrot.slane %v8502_v5, 7  ;;  %10202 = vst [vmem:[#allocation64_spill] sm:$0xff] %v8515_v6  ;;  %vm10205_vm10 = vmmov %vm10203_vm2  ;;  %v10232_v5 = vld [vmem:[#allocation4_spill] sm:$0xff]  ;;  %v10237_v6 = vld [vmem:[#allocation10_spill] sm:$0xff] }
 0x9ed   : > { %6102 = vmatprep.mubr.msk.bf16.mxu0 %vm10196_vm5, %v4399_v16  ;;  %v4400_v16 = vpack.c.bf16 %v8275_v33, %v8287_v23  ;;  %v8525_v20 = vpop.f32.mrf.mxu1  ;;  %vm10207_vm8 = vmmov %vm10203_vm2  ;;  %v2494_v23 = vpop.f32.mrf.mxu0 }
 0x9ee   : > { %v3978_v52 = vsel %vm10204_vm14, %v3966_v43, %v3967_v4  ;;  %10206 = vst [vmem:[#allocation19_spill] sm:$0xff] %v8525_v20  ;;  %vm10208_vm15 = vmmov %vm10203_vm2  ;;  %v10210_v43 = vrot.slane %v7852_v15, 7 }
 0x9ef   : > { %v4031_v34 = vsel %vm10085_vm12, %v3978_v52, 0.0  ;;  %v8531_v14 = vpop.f32.mrf.mxu1  ;;  %vm10211_vm6 = vmmov %vm10195_vm1  ;;  %v4403_v52 = vpack.c.bf16 %v8323_v10, %v8332_v44 }
 0x9f0   : > { %10209 = vst [vmem:[#allocation33_spill] sm:$0xff] %v8531_v14  ;;  %v3977_v55 = vsel %vm10211_vm6, %v3967_v4, %v10210_v43  ;;  %vm10214_vm1 = vmmov %vm10203_vm2 }
 0x9f1   : > { %6089 = vmatmul.mubr.msk.bf16.gmra.mxu1 %vm10203_vm2, %v4144_v7  ;;  %v8537_v54 = vpop.f32.mrf.mxu1  ;;  %v5901_v7 = vpop.f32.mrf.mxu0  ;;  %v4146_v1 = vpack.c.bf16 %v3977_v55, %v4031_v34  ;;  %vm10215_vm12 = vmmov %vm10214_vm1  ;;  %v4040_v55 = vrot.slane %v8275_v33, 1 }
 0x9f2   : > { %6092 = vmatprep.mubr.msk.bf16.mxu1 %vm10205_vm10, %v4145_v22  ;;  %10212 = vst [vmem:[#allocation72_spill] sm:$0xff] %v8537_v54  ;;  %vm10217_vm5 = vmmov %vm10214_vm1 }
 0x9f3   : > { %v8539_v22 = vpop.f32.mrf.mxu1  ;;  %vm10218_vm7 = vmmov %vm10214_vm1 }
 0x9f4   : > { %6103 = vmatmul.mubr.msk.bf16.vlgmr.msra.gmra.mxu0 %vm10207_vm8, %v4400_v16  ;;  %10213 = vst [vmem:[#allocation41_spill] sm:$0xff] %v8539_v22  ;;  %v8542_v16 = vpop.f32.mrf.mxu0  ;;  %vm10222_vm13 = vmmov %vm10214_vm1 }
 0x9f5   : > { %6106 = vmatprep.mubr.msk.bf16.mxu0 %vm10208_vm15, %v4401_v27  ;;  %v8550_v4 = vpop.f32.mrf.mxu1  ;;  %vm10225_vm2 = vmmov %vm10214_vm1  ;;  %vm10233_vm15 = vnez %v10232_v5 }
 0x9f6   : > { %10216 = vst [vmem:[#allocation34_spill] sm:$0xff] %v8550_v4  ;;  %v8552_v27 = vpop.f32.mrf.mxu0  ;;  %v4043_v4 = vrot.slane %v8321_v19, 1  ;;  %vm10226_vm14 = vmmov %vm10223_vm11 }
 0x9f7   : > { %v8556_v34 = vpop.f32.mrf.mxu1  ;;  %vm10228_vm10 = vmmov %vm10214_vm1 }
 0x9f8   : > { %10219 = vst [vmem:[#allocation35_spill] sm:$0xff] %v8556_v34  ;;  %v8558_v43 = vpop.f32.mrf.mxu0  ;;  %vm10231_vm8 = vmmov %vm10223_vm11 }
 0x9f9   : > { %6093 = vmatmul.mubr.msk.bf16.gmra.mxu1 %vm10214_vm1, %v4146_v1  ;;  %v4042_v1 = vrot.slane %v8279_v24, 1  ;;  %v8563_v62 = vpop.f32.mrf.mxu1  ;;  %v4404_v24 = vpack.c.bf16 %v8361_v31, %v8357_v3  ;;  %vm10234_vm6 = vmmov %vm10214_vm1 }
 0x9fa   : > { %6096 = vmatprep.mubr.msk.bf16.mxu1 %vm10215_vm12, %v7926_v49  ;;  %v4041_v49 = vrot.slane %v8292_v40, 1  ;;  %10220 = vst [vmem:[#allocation42_spill] sm:$0xff] %v8563_v62  ;;  %v8565_v15 = vpop.f32.mrf.mxu0  ;;  %v10224_v40 = vld [vmem:[#allocation26_spill] sm:$0xff]  ;;  %v10229_v62 = vld [vmem:[#allocation25_spill] sm:$0xff]  ;;  %vm10236_vm1 = vmmov %vm10231_vm8  ;;  %vm10238_vm12 = vnez %v10237_v6 }
 0x9fb   : > { %v8568_v22 = vpop.f32.mrf.mxu1  ;;  %v4094_v19 = vsel %vm10226_vm14, %v4042_v1, %v4043_v4  ;;  %v10230_v34 = vrot.slane %v10229_v62, 1  ;;  %v4044_v62 = vrot.slane %v8314_v2, 1  ;;  %v4406_v2 = vpack.c.bf16 %v8395_v12, %v8391_v26  ;;  %vm10243_vm14 = vmmov %vm10225_vm2 }
 0x9fc   : > { %6107 = vmatmul.mubr.msk.bf16.gmra.mxu0 %vm10217_vm5, %v4402_v47  ;;  %10221 = vst [vmem:[#allocation79_spill] sm:$0xff] %v8568_v22  ;;  %v8572_v47 = vpop.f32.mrf.mxu0  ;;  %v4096_v33 = vsel %vm10223_vm11, %v4040_v55, %v4041_v49  ;;  %vm10239_vm5 = vmmov %vm10225_vm2 }
 0x9fd   : > { %6110 = vmatprep.mubr.msk.bf16.mxu0 %vm10218_vm7, %v4403_v52  ;;  %v4405_v52 = vpack.c.bf16 %v8365_v9, %v8372_v36  ;;  %v8584_v22 = vpop.f32.mrf.mxu1  ;;  %v4097_v54 = vsel %vm10231_vm8, %v10230_v34, %v4040_v55  ;;  %v4045_v34 = vrot.slane %v8332_v44, 1  ;;  %vm10240_vm7 = vmmov %vm10236_vm1  ;;  %v2495_v44 = vadd.f32 %v2494_v23, %v8240_v21 }
 0x9fe   : > { %10227 = vst [vmem:[#allocation31_spill] sm:$0xff] %v8584_v22  ;;  %v4095_v22 = vsel %vm10236_vm1, %v4041_v49, %v4042_v1  ;;  %vm10242_vm11 = vmmov %vm10236_vm1  ;;  %v2506_v49 = vadd.f32 %v5901_v7, %v8246_v48  ;;  %v4048_v48 = vrot.slane %v8361_v31, 1  ;;  %v4051_v7 = vrot.slane %v8391_v26, 1 }
 0x9ff   : > { %v8596_v14 = vpop.f32.mrf.mxu1  ;;  %v4092_v10 = vsel %vm10240_vm7, %v4044_v62, %v4045_v34  ;;  %v4090_v3 = vsel %vm10242_vm11, %v4046_v11, %v4047_v51 }
 0xa00   : > { %10235 = vst [vmem:[#allocation43_spill] sm:$0xff] %v8596_v14 }
 0xa01   : > { %6097 = vmatmul.mubr.msk.bf16.gmra.mxu1 %vm10222_vm13, %v7919_v32  ;;  %v8586_v32 = vpop.f32.mrf.mxu0  ;;  %v8607_v55 = vpop.f32.mrf.mxu1  ;;  %vm10241_vm13 = vmmov %vm10225_vm2 }
 0xa02   : > { %6136 = vmatprep.mubr.msk.bf16.mxu1 %vm10225_vm2, %v10224_v40  ;;  %v4104_v40 = vsel %vm10233_vm15, %v4096_v33, 0.0  ;;  %vm10247_vm15 = vmmov %vm10236_vm1 }
 0xa03   : > { %v8598_v20 = vpop.f32.mrf.mxu0  ;;  %v4666_v5 = vpack.c.bf16 %v4104_v40, %v4097_v54  ;;  %v5934_v1 = vpop.f32.mrf.mxu1 }
 0xa04   : > { %6111 = vmatmul.mubr.msk.bf16.gmra.mxu0 %vm10228_vm10, %v4404_v24  ;;  %v4106_v24 = vsel %vm10238_vm12, %v4094_v19, 0.0  ;;  %vm10244_vm10 = vmmov %vm10236_vm1 }
 0xa05   : > { %6114 = vmatprep.mubr.msk.bf16.mxu0 %vm10234_vm6, %v4405_v52  ;;  %v8609_v33 = vpop.f32.mrf.mxu0  ;;  %v2503_v52 = vadd.f32 %v5900_v35, %v8234_v25  ;;  %v4667_v14 = vpack.c.bf16 %v4106_v24, %v4095_v22  ;;  %v4407_v25 = vpack.c.bf16 %v8399_v53, %v8406_v38  ;;  %v2728_v35 = vpop.f32.mrf.mxu1  ;;  %v4093_v21 = vsel %vm10244_vm10, %v4043_v4, %v4044_v62  ;;  %vm10250_vm1 = vmmov %vm10225_vm2 }
 0xa06   : > { %v8632_v19 = vadd.f32 %v2728_v35, %v2495_v44  ;;  %v4049_v62 = vrot.slane %v8372_v36, 1  ;;  %vm10251_vm12 = vmmov %vm10240_vm7  ;;  %vm10258_vm10 = vnez %v9782_v17 }
 0xa07   : > { %v8614_v6 = vpop.f32.mrf.mxu0  ;;  %v8621_v54 = vadd.f32 %v5934_v1, %v2503_v52  ;;  %v5935_v40 = vpop.f32.mrf.mxu1  ;;  %v10248_v52 = vld [vmem:[#allocation11_spill] sm:$0xff] }
 0xa08   : > { %vm10249_vm6 = vnez %v10248_v52  ;;  %v8649_v4 = vadd.f32 %v5935_v40, %v2506_v49  ;;  %v4088_v36 = vsel %vm10251_vm12, %v4048_v48, %v4049_v62 }
 0xa09   : > { %6137 = vmatmul.mubr.msk.bf16.vlgmr.msra.gmra.mxu1 %vm10239_vm5, %v4666_v5  ;;  %v8628_v22 = vpop.f32.mrf.mxu0  ;;  %v4091_v5 = vsel %vm10247_vm15, %v4045_v34, %v4046_v11  ;;  %v4110_v1 = vsel %vm10249_vm6, %v4090_v3, 0.0  ;;  %v4050_v11 = vrot.slane %v8365_v9, 1  ;;  %v2519_v34 = vadd.f32 %v8552_v27, %v8265_v37  ;;  %vm10252_vm5 = vmmov %vm10240_vm7 }
 0xa0a   : > { %6140 = vmatprep.mubr.msk.bf16.mxu1 %vm10241_vm13, %v4667_v14  ;;  %v10245_v14 = vld [vmem:[#allocation7_spill] sm:$0xff]  ;;  %v4669_v31 = vpack.c.bf16 %v4110_v1, %v4091_v5  ;;  %v2511_v37 = vadd.f32 %v8558_v43, %v8281_v18  ;;  %vm10253_vm7 = vmmov %vm10250_vm1  ;;  %v2522_v18 = vadd.f32 %v8565_v15, %v8302_v28  ;;  %v2514_v15 = vadd.f32 %v8572_v47, %v8325_v0 }
 0xa0b   : > { %vm10246_vm8 = vnez %v10245_v14  ;;  %v8639_v24 = vpop.f32.mrf.mxu0  ;;  %v4086_v9 = vsel %vm10252_vm5, %v4050_v11, %v4051_v7  ;;  %vm10254_vm13 = vmmov %vm10250_vm1  ;;  %v2535_v0 = vadd.f32 %v8586_v32, %v8347_v42  ;;  %v2527_v42 = vadd.f32 %v8598_v20, %v8367_v50  ;;  %v10266_v50 = vld [vmem:[#allocation17_spill] sm:$0xff] }
 0xa0c   : > { %6115 = vmatmul.mubr.msk.bf16.gmra.mxu0 %vm10225_vm2, %v4406_v2  ;;  %v4108_v23 = vsel %vm10246_vm8, %v4092_v10, 0.0  ;;  %v2498_v2 = vadd.f32 %v8542_v16, %v8253_v29  ;;  %v2731_v10 = vpop.f32.mrf.mxu1  ;;  %v4408_v16 = vpack.c.bf16 %v8429_v41, %v8425_v59  ;;  %vm10255_vm11 = vmmov %vm10252_vm5  ;;  %v2538_v20 = vadd.f32 %v8609_v33, %v10266_v50 }
 0xa0d   : > { %6118 = vmatprep.mubr.msk.bf16.mxu0 %vm10243_vm14, %v4407_v25  ;;  %v8652_v44 = vpop.f32.mrf.mxu0  ;;  %v4668_v25 = vpack.c.bf16 %v4108_v23, %v4093_v21  ;;  %v4409_v21 = vpack.c.bf16 %v8433_v63, %v8440_v57  ;;  %v4089_v40 = vsel %vm10255_vm11, %v4047_v51, %v4048_v48  ;;  %vm10256_vm2 = vmmov %vm10250_vm1  ;;  %vm10257_vm14 = vnez %v9791_v58 }
 0xa0e   : > { %v8657_v3 = vadd.f32 %v2731_v10, %v2498_v2  ;;  %v5938_v35 = vpop.f32.mrf.mxu1  ;;  %v4112_v5 = vsel %vm10257_vm14, %v4088_v36, 0.0  ;;  %v4114_v2 = vsel %vm10258_vm10, %v4086_v9, 0.0  ;;  %v4052_v51 = vrot.slane %v8395_v12, 1  ;;  %vm10259_vm8 = vmmov %vm10252_vm5 }
 0xa0f   : > { %v2545_v29 = vpop.f32.mrf.mxu0  ;;  %v8670_v27 = vadd.f32 %v5938_v35, %v2519_v34  ;;  %v4054_v48 = vrot.slane %v8399_v53, 1  ;;  %v4053_v58 = vrot.slane %v8406_v38, 1  ;;  %v4670_v34 = vpack.c.bf16 %v4112_v5, %v4089_v40  ;;  %vm10260_vm15 = vmmov %vm10250_vm1 }
 0xa10   : > { %v8673_v49 = vadd.f32 %v2545_v29, %v8475_v13  ;;  %v2744_v14 = vpop.f32.mrf.mxu1  ;;  %v4087_v17 = vsel %vm10259_vm8, %v4049_v62, %v4050_v11  ;;  %v4055_v12 = vrot.slane %v8425_v59, 1  ;;  %v4410_v35 = vpack.c.bf16 %v8465_v56, %v8471_v45  ;;  %vm10261_vm6 = vmmov %vm10252_vm5 }
 0xa11   : > { %6141 = vmatmul.mubr.msk.bf16.gmra.mxu1 %vm10250_vm1, %v4668_v25  ;;  %v5916_v23 = vpop.f32.mrf.mxu0  ;;  %v8683_v43 = vadd.f32 %v2744_v14, %v2511_v37  ;;  %v4411_v62 = vpack.c.bf16 %v8473_v61, %v8479_v60  ;;  %v4084_v59 = vsel %vm10261_vm6, %v4052_v51, %v4053_v58  ;;  %vm10263_vm12 = vmmov %vm10252_vm5  ;;  %v4056_v33 = vrot.slane %v8429_v41, 1 }
 0xa12   : > { %6144 = vmatprep.mubr.msk.bf16.mxu1 %vm10253_vm7, %v4669_v31  ;;  %v8686_v13 = vadd.f32 %v5916_v23, %v8482_v8  ;;  %v5939_v52 = vpop.f32.mrf.mxu1  ;;  %v4671_v31 = vpack.c.bf16 %v4114_v2, %v4087_v17  ;;  %v4082_v29 = vsel %vm10263_vm12, %v4054_v48, %v4055_v12  ;;  %vm10264_vm5 = vmmov %vm10250_vm1  ;;  %v4116_v40 = vsel %vm10133_vm9, %v4084_v59, 0.0  ;;  %v6376_v59 = vld [vmem:[#allocation2 + $0xf8] sm:$0xff]  ;;  %v10285_v23 = vld [vmem:[#allocation76_spill] sm:$0xff] }
 0xa13   : > { %v2558_v1 = vpop.f32.mrf.mxu0  ;;  %v8696_v28 = vadd.f32 %v5939_v52, %v2522_v18  ;;  %vm10265_vm7 = vmmov %vm10261_vm6 }
 0xa14   : > { %6119 = vmatmul.mubr.msk.bf16.gmra.mxu0 %vm10254_vm13, %v4408_v16  ;;  %v8699_v8 = vadd.f32 %v2558_v1, %v8492_v39  ;;  %v2747_v10 = vpop.f32.mrf.mxu1  ;;  %v4085_v9 = vsel %vm10265_vm7, %v4051_v7, %v4052_v51  ;;  %vm10268_vm13 = vmmov %vm10250_vm1  ;;  %v4118_v7 = vsel %vm10136_vm4, %v4082_v29, 0.0  ;;  %v10272_v1 = vld [vmem:[#allocation18_spill] sm:$0xff] }
 0xa15   : > { %6122 = vmatprep.mubr.msk.bf16.mxu0 %vm10256_vm2, %v4409_v21  ;;  %v5917_v25 = vpop.f32.mrf.mxu0  ;;  %v8708_v47 = vadd.f32 %v2747_v10, %v2514_v15  ;;  %v10267_v21 = vld [vmem:[#allocation64_spill] sm:$0xff]  ;;  %vm10270_vm11 = vmmov %vm10261_vm6  ;;  %v2530_v2 = vadd.f32 %v8614_v6, %v10272_v1  ;;  %v10273_v15 = vld [vmem:[#allocation19_spill] sm:$0xff] }
 0xa16   : > { %v8711_v39 = vadd.f32 %v5917_v25, %v8504_v46  ;;  %v10262_v46 = vld [vmem:[#allocation40_spill] sm:$0xff]  ;;  %v4083_v26 = vsel %vm10270_vm11, %v4053_v58, %v4054_v48  ;;  %v4058_v25 = vrot.slane %v8433_v63, 1  ;;  %v4672_v48 = vpack.c.bf16 %v4116_v40, %v4085_v9  ;;  %v10275_v6 = vld [vmem:[#allocation33_spill] sm:$0xff]  ;;  %vm10276_vm9 = vmmov %vm10250_vm1 }
 0xa17   : > { %v2561_v38 = vpop.f32.mrf.mxu0  ;;  %v4059_v58 = vrot.slane %v8471_v45, 1  ;;  %vm10278_vm4 = vmmov %vm10261_vm6  ;;  %v10279_v45 = vld [vmem:[#allocation54_spill] sm:$0xff] }
 0xa18   : > { %v5942_v53 = vpop.f32.mrf.mxu1  ;;  %v8725_v11 = vadd.f32 %v2561_v38, %v10262_v46  ;;  %v2543_v29 = vadd.f32 %v8639_v24, %v10279_v45  ;;  %vm10281_vm2 = vmmov %vm10250_vm1  ;;  %v2554_v24 = vadd.f32 %v8652_v44, %v10285_v23  ;;  %v4060_v44 = vrot.slane %v8465_v56, 1  ;;  %v10294_v56 = vld [vmem:[#allocation35_spill] sm:$0xff] }
 0xa19   : > { %6145 = vmatmul.mubr.msk.bf16.gmra.mxu1 %vm10260_vm15, %v4670_v34  ;;  %v8722_v32 = vadd.f32 %v5942_v53, %v2535_v0  ;;  %v4057_v34 = vrot.slane %v8440_v57, 1  ;;  %v10277_v57 = vld [vmem:[#allocation71_spill] sm:$0xff]  ;;  %vm10282_vm14 = vmmov %vm10278_vm4 }
 0xa1a   : > { %6148 = vmatprep.mubr.msk.bf16.mxu1 %vm10250_vm1, %v4671_v31  ;;  %v2760_v16 = vpop.f32.mrf.mxu1  ;;  %v10274_v31 = vld [vmem:[#allocation70_spill] sm:$0xff]  ;;  %v4078_v9 = vsel %vm10282_vm14, %v4058_v25, %v4059_v58  ;;  %vm10283_vm10 = vmmov %vm10250_vm1  ;;  %v4063_v45 = vrot.slane %v10277_v57, 1  ;;  %v10301_v23 = vld [vmem:[#allocation79_spill] sm:$0xff] }
 0xa1b   : > { %v8737_v37 = vadd.f32 %v2760_v16, %v2527_v42  ;;  %v2551_v41 = vadd.f32 %v8628_v22, %v10274_v31  ;;  %v4412_v42 = vpack.c.bf16 %v6376_v59, %v10277_v57  ;;  %v4080_v46 = vsel %vm10278_vm4, %v4056_v33, %v4057_v34  ;;  %v10280_v16 = vld [vmem:[#allocation72_spill] sm:$0xff]  ;;  %vm10284_vm8 = vmmov %vm10278_vm4 }
 0xa1c   : > { %v5920_v36 = vpop.f32.mrf.mxu0  ;;  %6123 = vmatmul.mubr.msk.bf16.gmra.mxu0 %vm10264_vm5, %v4410_v35  ;;  %v5943_v18 = vpop.f32.mrf.mxu1  ;;  %v4673_v35 = vpack.c.bf16 %v4118_v7, %v4083_v26  ;;  %v10287_v26 = vld [vmem:[#allocation32_spill] sm:$0xff]  ;;  %vm10288_vm15 = vmmov %vm10250_vm1  ;;  %v4120_v7 = vsel %vm7670_vm3, %v4080_v46, 0.0  ;;  %v4062_v31 = vrot.slane %v8473_v61, 1 }
 0xa1d   : > { %v8740_v14 = vadd.f32 %v5920_v36, %v10267_v21  ;;  %6126 = vmatprep.mubr.msk.bf16.mxu0 %vm10268_vm13, %v4411_v62  ;;  %v8752_v51 = vadd.f32 %v5943_v18, %v2538_v20  ;;  %v4081_v21 = vsel %vm10284_vm8, %v4055_v12, %v4056_v33  ;;  %v10286_v18 = vld [vmem:[#allocation41_spill] sm:$0xff]  ;;  %vm10290_vm6 = vmmov %vm10278_vm4  ;;  %v10291_v12 = vld [vmem:[#allocation60_spill] sm:$0xff] }
 0xa1e   : > { %v2574_v5 = vpop.f32.mrf.mxu0  ;;  %v2763_v17 = vpop.f32.mrf.mxu1  ;;  %vm10292_vm1 = vnez %v10291_v12  ;;  %vm10295_vm3 = vmmov %vm10281_vm2 }
 0xa1f   : > { %v8755_v10 = vadd.f32 %v2574_v5, %v10273_v15  ;;  %v8762_v53 = vadd.f32 %v2763_v17, %v2530_v2  ;;  %v4079_v15 = vsel %vm10290_vm6, %v4057_v34, %v4058_v25  ;;  %v4122_v33 = vsel %vm10292_vm1, %v4078_v9, 0.0  ;;  %v6378_v25 = vld [vmem:[#allocation2 + $0x110] sm:$0xff]  ;;  %vm10296_vm12 = vmmov %vm10278_vm4  ;;  %v10297_v9 = vld [vmem:[#allocation42_spill] sm:$0xff] }
 0xa20   : > { %v5921_v0 = vpop.f32.mrf.mxu0  ;;  %v4675_v46 = vpack.c.bf16 %v4122_v33, %v4079_v15  ;;  %vm10298_vm5 = vmmov %vm10281_vm2 }
 0xa21   : > { %v8765_v38 = vadd.f32 %v5921_v0, %v10275_v6  ;;  %v5946_v62 = vpop.f32.mrf.mxu1  ;;  %6149 = vmatmul.mubr.msk.bf16.gmra.mxu1 %vm10276_vm9, %v4672_v48  ;;  %v10293_v0 = vld [vmem:[#allocation34_spill] sm:$0xff]  ;;  %vm10299_vm7 = vmmov %vm10278_vm4 }
 0xa22   : > { %v2577_v63 = vpop.f32.mrf.mxu0  ;;  %v8773_v22 = vadd.f32 %v5946_v62, %v2551_v41  ;;  %6152 = vmatprep.mubr.msk.bf16.mxu1 %vm10281_vm2, %v4673_v35  ;;  %v4061_v41 = vrot.slane %v8479_v60, 1  ;;  %v4674_v62 = vpack.c.bf16 %v4120_v7, %v4081_v21  ;;  %vm10300_vm13 = vmmov %vm10281_vm2 }
 0xa23   : > { %v8776_v36 = vadd.f32 %v2577_v63, %v10280_v16  ;;  %v2776_v50 = vpop.f32.mrf.mxu1  ;;  %v8807_v63 = vld [vmem:[#allocation2 + $0x118] sm:$0xff]  ;;  %vm10302_vm11 = vmmov %vm10278_vm4 }
 0xa24   : > { %v5924_v20 = vpop.f32.mrf.mxu0  ;;  %6127 = vmatmul.mubr.msk.bf16.gmra.mxu0 %vm10283_vm10, %v4412_v42  ;;  %v8786_v40 = vadd.f32 %v2776_v50, %v2543_v29  ;;  %v4414_v34 = vpack.c.bf16 %v8807_v63, %v6378_v25  ;;  %v4076_v29 = vsel %vm10296_vm12, %v4060_v44, %v4061_v41  ;;  %vm10309_vm14 = vmmov %vm10295_vm3 }
 0xa25   : > { %v8789_v5 = vadd.f32 %v5924_v20, %v10286_v18  ;;  %6130 = vmatprep.mubr.msk.bf16.mxu0 %vm10288_vm15, %v10287_v26  ;;  %v5947_v1 = vpop.f32.mrf.mxu1  ;;  %v10303_v18 = vld [vmem:[#allocation65_spill] sm:$0xff]  ;;  %vm10310_vm10 = vmmov %vm10295_vm3 }
 0xa26   : > { %v2590_v2 = vpop.f32.mrf.mxu0  ;;  %v8800_v17 = vadd.f32 %v5947_v1, %v2554_v24  ;;  %vm10304_vm9 = vnez %v10303_v18  ;;  %v4075_v1 = vsel %vm10278_vm4, %v4061_v41, %v4062_v31  ;;  %vm10313_vm8 = vmmov %vm10278_vm4  ;;  %v10316_v18 = vld [vmem:[#allocation81_spill] sm:$0xff] }
 0xa27   : > { %v8803_v48 = vadd.f32 %v2590_v2, %v10293_v0  ;;  %v2779_v6 = vpop.f32.mrf.mxu1  ;;  %v4124_v26 = vsel %vm10304_vm9, %v4076_v29, 0.0  ;;  %v10305_v2 = vld [vmem:[#allocation68_spill] sm:$0xff]  ;;  %vm10318_vm6 = vmmov %vm10295_vm3 }
 0xa28   : > { %v5925_v35 = vpop.f32.mrf.mxu0  ;;  %v8811_v59 = vadd.f32 %v2779_v6, %v8673_v49  ;;  %v4074_v49 = vsel %vm10299_vm7, %v4062_v31, %v4063_v45  ;;  %vm10306_vm2 = vnez %v10305_v2  ;;  %vm10321_vm1 = vmmov %vm10278_vm4 }
 0xa29   : > { %v8814_v42 = vadd.f32 %v5925_v35, %v10294_v56  ;;  %v5950_v61 = vpop.f32.mrf.mxu1  ;;  %6153 = vmatmul.mubr.msk.bf16.gmra.mxu1 %vm10295_vm3, %v4674_v62  ;;  %v4126_v15 = vsel %vm10306_vm2, %v4074_v49, 0.0  ;;  %vm10325_vm12 = vmmov %vm10321_vm1 }
 0xa2a   : > { %v2593_v60 = vpop.f32.mrf.mxu0  ;;  %v8821_v16 = vadd.f32 %v5950_v61, %v8686_v13  ;;  %6156 = vmatprep.mubr.msk.bf16.mxu1 %vm10298_vm5, %v4675_v46  ;;  %v4077_v13 = vsel %vm10302_vm11, %v4059_v58, %v4060_v44  ;;  %v10308_v44 = vld [vmem:[#allocation43_spill] sm:$0xff]  ;;  %v4677_v25 = vpack.c.bf16 %v4126_v15, %v4075_v1  ;;  %vm10327_vm5 = vmmov %vm10295_vm3 }
 0xa2b   : > { %v8824_v50 = vadd.f32 %v2593_v60, %v10297_v9  ;;  %v2792_v20 = vpop.f32.mrf.mxu1  ;;  %v4676_v35 = vpack.c.bf16 %v4124_v26, %v4077_v13  ;;  %v10311_v60 = vld [vmem:[#allocation78_spill] sm:$0xff] }
 0xa2c   : > { %v5928_v57 = vpop.f32.mrf.mxu0  ;;  %6131 = vmatmul.mubr.msk.bf16.gmra.mxu0 %vm10300_vm13, %v4414_v34  ;;  %v8831_v21 = vadd.f32 %v2792_v20, %v8699_v8  ;;  %v10307_v8 = vld [vmem:[#allocation31_spill] sm:$0xff]  ;;  %v10312_v29 = vrot.slane %v10311_v60, 1 }
 0xa2d   : > { %v2615_v24 = vadd.f32 %v5928_v57, %v10301_v23  ;;  %v5951_v52 = vpop.f32.mrf.mxu1 }
 0xa2e   : > { %v2606_v7 = vpop.f32.mrf.mxu0  ;;  %v8843_v12 = vadd.f32 %v5951_v52, %v8711_v39  ;;  %v4073_v9 = vsel %vm10313_vm8, %v4063_v45, %v10312_v29 }
 0xa2f   : > { %v2607_v33 = vadd.f32 %v2606_v7, %v10307_v8  ;;  %v2795_v0 = vpop.f32.mrf.mxu1  ;;  %v10322_v8 = vld [vmem:[#allocation82_spill] sm:$0xff] }
 0xa30   : > { %v5929_v6 = vpop.f32.mrf.mxu0  ;;  %v8847_v58 = vadd.f32 %v2795_v0, %v8725_v11 }
 0xa31   : > { %v2618_v62 = vadd.f32 %v5929_v6, %v10308_v44  ;;  %v5954_v34 = vpop.f32.mrf.mxu1  ;;  %6157 = vmatmul.mubr.msk.bf16.gmra.mxu1 %vm10309_vm14, %v4676_v35  ;;  %v10323_v35 = vld [vmem:[#allocation56_spill] sm:$0xff] }
 0xa32   : > { %v2609_v31 = vpop.f32.mrf.mxu0  ;;  %v8852_v41 = vadd.f32 %v5954_v34, %v8740_v14  ;;  %6160 = vmatprep.mubr.msk.bf16.mxu1 %vm10310_vm10, %v4677_v25  ;;  %v4068_v14 = vrot.slane %v8807_v63, 1  ;;  %v10324_v44 = vrot.slane %v10323_v35, 1 }
 0xa33   : > { %v2610_v39 = vadd.f32 %v2609_v31, %v8607_v55  ;;  %v2808_v56 = vpop.f32.mrf.mxu1 }
 0xa34   : > { %v5968_v46 = vpop.f32.mrf.mxu0  ;;  %v8857_v61 = vadd.f32 %v2808_v56, %v8755_v10  ;;  %v10314_v10 = vld [vmem:[#allocation73_spill] sm:$0xff]  ;;  %v4069_v25 = vsel %vm10325_vm12, %v10324_v44, %v4068_v14 }
 0xa35   : > { %v3347_v11 = vadd.f32 %v5968_v46, %v8621_v54  ;;  %v5955_v49 = vpop.f32.mrf.mxu1  ;;  %vm10315_vm15 = vnez %v10314_v10 }
 0xa36   : > { %v3218_v20 = vpop.f32.mrf.mxu0  ;;  %v8866_v55 = vadd.f32 %v5955_v49, %v8765_v38  ;;  %v10317_v54 = vsel %vm10315_vm15, %v10316_v18, 0.0  ;;  %v10319_v38 = vld [vmem:[#allocation24_spill] sm:$0xff] }
 0xa37   : > { %v3345_v57 = vadd.f32 %v3218_v20, %v8632_v19  ;;  %v2811_v23 = vpop.f32.mrf.mxu1  ;;  %v4678_v26 = vpack.c.bf16 %v10317_v54, %v4073_v9  ;;  %v10320_v1 = vrot.slane %v10319_v38, 1 }
 0xa38   : > { %v5969_v13 = vpop.f32.mrf.mxu0  ;;  %v8874_v52 = vadd.f32 %v2811_v23, %v8776_v36 }
 0xa39   : > { %v3348_v45 = vadd.f32 %v5969_v13, %v8649_v4  ;;  %v5958_v7 = vpop.f32.mrf.mxu1  ;;  %6161 = vmatmul.mubr.msk.bf16.gmra.mxu1 %vm10318_vm6, %v4678_v26  ;;  %v4100_v19 = vsel %vm10321_vm1, %v4068_v14, %v10320_v1 }
 0xa3a   : > { %v3221_v63 = vpop.f32.mrf.mxu0  ;;  %v8883_v2 = vadd.f32 %v5958_v7, %v8789_v5  ;;  %6164 = vmatprep.mubr.msk.bf16.mxu1 %vm10295_vm3, %v10322_v8  ;;  %v4132_v5 = vsel %vm8154_vm0, %v4100_v19, 0.0  ;;  %vm10410_vm0 = vmmov %vm10295_vm3 }
 0xa3b   : > { %v3346_v15 = vadd.f32 %v3221_v63, %v8657_v3  ;;  %v2824_v36 = vpop.f32.mrf.mxu1  ;;  %v4680_v29 = vpack.c.bf16 %v4132_v5, %v4069_v25  ;;  %vm10411_vm7 = vmmov %vm10410_vm0 }
 0xa3c   : > { %v5972_v0 = vpop.f32.mrf.mxu0  ;;  %v8889_v4 = vadd.f32 %v2824_v36, %v8803_v48  ;;  %vm10412_vm13 = vmmov %vm10410_vm0 }
 0xa3d   : > { %v3351_v6 = vadd.f32 %v5972_v0, %v8670_v27  ;;  %v5959_v31 = vpop.f32.mrf.mxu1  ;;  %vm10413_vm11 = vmmov %vm10410_vm0 }
 0xa3e   : > { %v3234_v3 = vpop.f32.mrf.mxu0  ;;  %v8899_v56 = vadd.f32 %v5959_v31, %v8814_v42  ;;  %vm10414_vm9 = vmmov %vm10410_vm0 }
 0xa3f   : > { %v3349_v46 = vadd.f32 %v3234_v3, %v8683_v43  ;;  %v2827_v60 = vpop.f32.mrf.mxu1  ;;  %vm10415_vm4 = vmmov %vm10410_vm0 }
 0xa40   : > { %v5973_v48 = vpop.f32.mrf.mxu0  ;;  %v8903_v27 = vadd.f32 %v2827_v60, %v8824_v50  ;;  %vm10416_vm2 = vmmov %vm10410_vm0 }
 0xa41   : > { %v3352_v9 = vadd.f32 %v5973_v48, %v8696_v28  ;;  %v5962_v30 = vpop.f32.mrf.mxu1  ;;  %6165 = vmatmul.mubr.msk.bf16.gmra.mxu1 %vm10327_vm5, %v4680_v29  ;;  %vm10417_vm14 = vmmov %vm10410_vm0 }
 0xa42   : > { %v3237_v49 = vpop.f32.mrf.mxu0  ;;  %v8907_v20 = vadd.f32 %v5962_v30, %v2615_v24  ;;  %vm10418_vm10 = vmmov %vm10410_vm0 }
 0xa43   : > { %v3350_v14 = vadd.f32 %v3237_v49, %v8708_v47  ;;  %v2840_v42 = vpop.f32.mrf.mxu1  ;;  %vm10419_vm8 = vmmov %vm10410_vm0 }
 0xa44   : > { %v5976_v23 = vpop.f32.mrf.mxu0  ;;  %v8910_v13 = vadd.f32 %v2840_v42, %v2607_v33  ;;  %vm10420_vm15 = vmmov %vm10410_vm0 }
 0xa45   : > { %v3355_v43 = vadd.f32 %v5976_v23, %v8722_v32  ;;  %v5963_v10 = vpop.f32.mrf.mxu1  ;;  %vm10421_vm6 = vmmov %vm10410_vm0 }
 0xa46   : > { %v3250_v18 = vpop.f32.mrf.mxu0  ;;  %v8913_v50 = vadd.f32 %v5963_v10, %v2618_v62  ;;  %vm10422_vm1 = vmmov %vm10410_vm0 }
 0xa47   : > { %v3353_v28 = vadd.f32 %v3250_v18, %v8737_v37  ;;  %v2843_v54 = vpop.f32.mrf.mxu1  ;;  %vm10423_vm3 = vmmov %vm10410_vm0 }
 0xa48   : > { %v5977_v26 = vpop.f32.mrf.mxu0  ;;  %v8916_v7 = vadd.f32 %v2843_v54, %v2610_v39  ;;  %vm10424_vm12 = vmmov %vm10410_vm0 }
 0xa49   : > { %v3356_v24 = vadd.f32 %v5977_v26, %v8752_v51  ;;  %v6002_v63 = vpop.f32.mrf.mxu1  ;;  %vm10425_vm5 = vmmov %vm10410_vm0 }
 0xa4a   : > { %v3253_v47 = vpop.f32.mrf.mxu0  ;;  %v8919_v38 = vadd.f32 %v6002_v63, %v3347_v11 }
 0xa4b   : > { %v3354_v33 = vadd.f32 %v3253_v47, %v8762_v53  ;;  %v3484_v1 = vpop.f32.mrf.mxu1 }
 0xa4c   : > { %v5980_v32 = vpop.f32.mrf.mxu0  ;;  %v8922_v19 = vadd.f32 %v3484_v1, %v3345_v57 }
 0xa4d   : > { %v3359_v62 = vadd.f32 %v5980_v32, %v8773_v22  ;;  %v6003_v8 = vpop.f32.mrf.mxu1 }
 0xa4e   : > { %v3266_v37 = vpop.f32.mrf.mxu0  ;;  %v8925_v36 = vadd.f32 %v6003_v8, %v3348_v45 }
 0xa4f   : > { %v3357_v39 = vadd.f32 %v3266_v37, %v8786_v40  ;;  %v3487_v0 = vpop.f32.mrf.mxu1 }
 0xa50   : > { %v5981_v51 = vpop.f32.mrf.mxu0  ;;  %v8928_v35 = vadd.f32 %v3487_v0, %v3346_v15 }
 0xa51   : > { %v3360_v11 = vadd.f32 %v5981_v51, %v8800_v17  ;;  %v6006_v44 = vpop.f32.mrf.mxu1 }
 0xa52   : > { %v3269_v53 = vpop.f32.mrf.mxu0  ;;  %v8931_v25 = vadd.f32 %v6006_v44, %v3351_v6 }
 0xa53   : > { %v3358_v57 = vadd.f32 %v3269_v53, %v8811_v59  ;;  %v3500_v34 = vpop.f32.mrf.mxu1 }
 0xa54   : > { %v5984_v22 = vpop.f32.mrf.mxu0  ;;  %v8934_v5 = vadd.f32 %v3500_v34, %v3349_v46 }
 0xa55   : > { %v3363_v45 = vadd.f32 %v5984_v22, %v8821_v16  ;;  %v6007_v31 = vpop.f32.mrf.mxu1 }
 0xa56   : > { %v3282_v40 = vpop.f32.mrf.mxu0  ;;  %v8937_v3 = vadd.f32 %v6007_v31, %v3352_v9 }
 0xa57   : > { %v3361_v15 = vadd.f32 %v3282_v40, %v8831_v21  ;;  %v3503_v60 = vpop.f32.mrf.mxu1 }
 0xa58   : > { %v5985_v17 = vpop.f32.mrf.mxu0  ;;  %v8940_v48 = vadd.f32 %v3503_v60, %v3350_v14 }
 0xa59   : > { %v3364_v6 = vadd.f32 %v5985_v17, %v8843_v12  ;;  %v6010_v29 = vpop.f32.mrf.mxu1 }
 0xa5a   : > { %v3285_v59 = vpop.f32.mrf.mxu0  ;;  %v8943_v30 = vadd.f32 %v6010_v29, %v3355_v43 }
 0xa5b   : > { %v3362_v46 = vadd.f32 %v3285_v59, %v8847_v58  ;;  %v3516_v49 = vpop.f32.mrf.mxu1 }
 0xa5c   : > { %v5988_v16 = vpop.f32.mrf.mxu0  ;;  %v8946_v42 = vadd.f32 %v3516_v49, %v3353_v28 }
 0xa5d   : > { %v3367_v9 = vadd.f32 %v5988_v16, %v8852_v41  ;;  %v6011_v23 = vpop.f32.mrf.mxu1 }
 0xa5e   : > { %v3298_v21 = vpop.f32.mrf.mxu0  ;;  %v8949_v10 = vadd.f32 %v6011_v23, %v3356_v24 }
 0xa5f   : > { %v3365_v14 = vadd.f32 %v3298_v21, %v8857_v61  ;;  %v3519_v18 = vpop.f32.mrf.mxu1 }
 0xa60   : > { %v5989_v12 = vpop.f32.mrf.mxu0  ;;  %v8952_v54 = vadd.f32 %v3519_v18, %v3354_v33 }
 0xa61   : > { %v3368_v43 = vadd.f32 %v5989_v12, %v8866_v55  ;;  %v6014_v26 = vpop.f32.mrf.mxu1 }
 0xa62   : > { %v3301_v58 = vpop.f32.mrf.mxu0  ;;  %v8955_v63 = vadd.f32 %v6014_v26, %v3359_v62 }
 0xa63   : > { %v3366_v28 = vadd.f32 %v3301_v58, %v8874_v52  ;;  %v3532_v47 = vpop.f32.mrf.mxu1 }
 0xa64   : > { %v5992_v41 = vpop.f32.mrf.mxu0  ;;  %v8958_v1 = vadd.f32 %v3532_v47, %v3357_v39 }
 0xa65   : > { %v3371_v24 = vadd.f32 %v5992_v41, %v8883_v2  ;;  %v6015_v32 = vpop.f32.mrf.mxu1 }
 0xa66   : > { %v3314_v61 = vpop.f32.mrf.mxu0  ;;  %v8961_v8 = vadd.f32 %v6015_v32, %v3360_v11 }
 0xa67   : > { %v3369_v33 = vadd.f32 %v3314_v61, %v8889_v4  ;;  %v3535_v37 = vpop.f32.mrf.mxu1 }
 0xa68   : > { %v5993_v55 = vpop.f32.mrf.mxu0  ;;  %v8964_v0 = vadd.f32 %v3535_v37, %v3358_v57 }
 0xa69   : > { %v3372_v62 = vadd.f32 %v5993_v55, %v8899_v56  ;;  %v6018_v51 = vpop.f32.mrf.mxu1 }
 0xa6a   : > { %v3317_v52 = vpop.f32.mrf.mxu0  ;;  %v8967_v44 = vadd.f32 %v6018_v51, %v3363_v45 }
 0xa6b   : > { %v3370_v39 = vadd.f32 %v3317_v52, %v8903_v27  ;;  %v3548_v53 = vpop.f32.mrf.mxu1 }
 0xa6c   : > { %v5996_v2 = vpop.f32.mrf.mxu0  ;;  %v8970_v34 = vadd.f32 %v3548_v53, %v3361_v15 }
 0xa6d   : > { %v3375_v11 = vadd.f32 %v5996_v2, %v8907_v20  ;;  %v6019_v22 = vpop.f32.mrf.mxu1 }
 0xa6e   : > { %v3330_v4 = vpop.f32.mrf.mxu0  ;;  %v8973_v31 = vadd.f32 %v6019_v22, %v3364_v6 }
 0xa6f   : > { %v3373_v57 = vadd.f32 %v3330_v4, %v8910_v13  ;;  %v3551_v40 = vpop.f32.mrf.mxu1 }
 0xa70   : > { %v5997_v56 = vpop.f32.mrf.mxu0  ;;  %v8976_v60 = vadd.f32 %v3551_v40, %v3362_v46 }
 0xa71   : > { %v3376_v45 = vadd.f32 %v5997_v56, %v8913_v50  ;;  %v6022_v17 = vpop.f32.mrf.mxu1 }
 0xa72   : > { %v3333_v27 = vpop.f32.mrf.mxu0  ;;  %v8979_v29 = vadd.f32 %v6022_v17, %v3367_v9 }
 0xa73   : > { %v3374_v15 = vadd.f32 %v3333_v27, %v8916_v7  ;;  %v3564_v59 = vpop.f32.mrf.mxu1 }
 0xa74   : > { %v8982_v20 = vpop.f32.mrf.mxu0  ;;  %v8984_v49 = vadd.f32 %v3564_v59, %v3365_v14 }
 0xa75   : > { %v6023_v6 = vpop.f32.mrf.mxu1 }
 0xa76   : > { %10328 = vst [vmem:[#allocation74_spill] sm:$0xff] %v8984_v49  ;;  %v8986_v16 = vpop.f32.mrf.mxu0  ;;  %v8988_v13 = vadd.f32 %v6023_v6, %v3368_v43 }
 0xa77   : > { %v3567_v46 = vpop.f32.mrf.mxu1 }
 0xa78   : > { %10329 = vst [vmem:[#allocation36_spill] sm:$0xff] %v8988_v13  ;;  %v8990_v23 = vpop.f32.mrf.mxu0  ;;  %v8992_v50 = vadd.f32 %v3567_v46, %v3366_v28 }
 0xa79   : > { %v6026_v21 = vpop.f32.mrf.mxu1 }
 0xa7a   : > { %10330 = vst [vmem:[#allocation80_spill] sm:$0xff] %v8992_v50  ;;  %v8994_v9 = vpop.f32.mrf.mxu0  ;;  %v8996_v18 = vadd.f32 %v6026_v21, %v3371_v24 }
 0xa7b   : > { %v3580_v7 = vpop.f32.mrf.mxu1 }
 0xa7c   : > { %10331 = vst [vmem:[#allocation14_spill] sm:$0xff] %v8996_v18  ;;  %v8998_v12 = vpop.f32.mrf.mxu0  ;;  %v9000_v14 = vadd.f32 %v3580_v7, %v3369_v33 }
 0xa7d   : > { %v6027_v26 = vpop.f32.mrf.mxu1 }
 0xa7e   : > { %10332 = vst [vmem:[#allocation44_spill] sm:$0xff] %v9000_v14  ;;  %v9002_v58 = vpop.f32.mrf.mxu0  ;;  %v9004_v43 = vadd.f32 %v6027_v26, %v3372_v62 }
 0xa7f   : > { %v3583_v47 = vpop.f32.mrf.mxu1 }
 0xa80   : > { %10333 = vst [vmem:[#allocation45_spill] sm:$0xff] %v9004_v43  ;;  %v9006_v41 = vpop.f32.mrf.mxu0  ;;  %v9008_v28 = vadd.f32 %v3583_v47, %v3370_v39 }
 0xa81   : > { %v6030_v32 = vpop.f32.mrf.mxu1 }
 0xa82   : > { %10334 = vst [vmem:[#allocation46_spill] sm:$0xff] %v9008_v28  ;;  %v9010_v61 = vpop.f32.mrf.mxu0  ;;  %v9012_v24 = vadd.f32 %v6030_v32, %v3375_v11 }
 0xa83   : > { %v3596_v37 = vpop.f32.mrf.mxu1 }
 0xa84   : > { %10335 = vst [vmem:[#allocation47_spill] sm:$0xff] %v9012_v24  ;;  %v9014_v55 = vpop.f32.mrf.mxu0  ;;  %v9016_v33 = vadd.f32 %v3596_v37, %v3373_v57 }
 0xa85   : > { %v6031_v51 = vpop.f32.mrf.mxu1 }
 0xa86   : > { %10336 = vst [vmem:[#allocation48_spill] sm:$0xff] %v9016_v33  ;;  %v9018_v52 = vpop.f32.mrf.mxu0  ;;  %v9020_v62 = vadd.f32 %v6031_v51, %v3376_v45 }
 0xa87   : > { %v3599_v53 = vpop.f32.mrf.mxu1 }
 0xa88   : > { %10337 = vst [vmem:[#allocation49_spill] sm:$0xff] %v9020_v62  ;;  %v9022_v2 = vpop.f32.mrf.mxu0  ;;  %v9024_v39 = vadd.f32 %v3599_v53, %v3374_v15 }
 0xa89   : > { %v9026_v22 = vpop.f32.mrf.mxu1 }
 0xa8a   : > { %10338 = vst [vmem:[#allocation50_spill] sm:$0xff] %v9024_v39  ;;  %v9028_v4 = vpop.f32.mrf.mxu0 }
 0xa8b   : > { %v9030_v11 = vpop.f32.mrf.mxu1 }
 0xa8c   : > { %v9032_v40 = vpop.f32.mrf.mxu0 }
 0xa8d   : > { %v9034_v57 = vpop.f32.mrf.mxu1 }
 0xa8e   : > { %v9036_v56 = vpop.f32.mrf.mxu0 }
 0xa8f   : > { %v9038_v17 = vpop.f32.mrf.mxu1 }
 0xa90   : > { %v9040_v45 = vpop.f32.mrf.mxu0 }
 0xa91   : > { %v9042_v27 = vpop.f32.mrf.mxu1 }
 0xa92   : > { %v9044_v15 = vpop.f32.mrf.mxu0 }
 0xa93   : > { %v9046_v59 = vpop.f32.mrf.mxu1 }
 0xa94   : > { %v9048_v6 = vpop.f32.mrf.mxu0 }
 0xa95   : > { %v9050_v46 = vpop.f32.mrf.mxu1 }
 0xa96   : > { %v9052_v21 = vpop.f32.mrf.mxu0 }
 0xa97   : > { %v9054_v7 = vpop.f32.mrf.mxu1 }
 0xa98   : > { %v9056_v26 = vpop.f32.mrf.mxu0 }
 0xa99   : > { %v9058_v47 = vpop.f32.mrf.mxu1 }
 0xa9a   : > { %v9060_v32 = vpop.f32.mrf.mxu0 }
 0xa9b   : > { %v9062_v37 = vpop.f32.mrf.mxu1 }
 0xa9c   : > { %v9064_v51 = vpop.f32.mrf.mxu0 }
 0xa9d   : > { %v9066_v53 = vpop.f32.mrf.mxu1 }
 0xa9e   : > { %v9068_v39 = vpop.f32.mrf.mxu0 }
 0xa9f   : > { %10339 = vst [vmem:[#allocation52_spill] sm:$0xff] %v9068_v39  ;;  %v9070_v62 = vpop.f32.mrf.mxu1 }
 0xaa0   : > { %10340 = vst [vmem:[#allocation63_spill] sm:$0xff] %v9070_v62  ;;  %v9072_v33 = vpop.f32.mrf.mxu0 }
 0xaa1   : > { %10341 = vst [vmem:[#allocation20_spill] sm:$0xff] %v9072_v33  ;;  %v9074_v24 = vpop.f32.mrf.mxu1 }
 0xaa2   : > { %10342 = vst [vmem:[#allocation53_spill] sm:$0xff] %v9074_v24  ;;  %v9076_v28 = vpop.f32.mrf.mxu0 }
 0xaa3   : > { %10343 = vst [vmem:[#allocation57_spill] sm:$0xff] %v9076_v28  ;;  %v9078_v43 = vpop.f32.mrf.mxu1 }
 0xaa4   : > { %10344 = vst [vmem:[#allocation22_spill] sm:$0xff] %v9078_v43  ;;  %v9080_v14 = vpop.f32.mrf.mxu0 }
 0xaa5   : > { %10345 = vst [vmem:[#allocation21_spill] sm:$0xff] %v9080_v14  ;;  %v9082_v18 = vpop.f32.mrf.mxu1 }
 0xaa6   : > { %10346 = vst [vmem:[#allocation58_spill] sm:$0xff] %v9082_v18  ;;  %v9084_v50 = vpop.f32.mrf.mxu0 }
 0xaa7   : > { %10347 = vst [vmem:[#allocation61_spill] sm:$0xff] %v9084_v50  ;;  %v9086_v13 = vpop.f32.mrf.mxu1 }
 0xaa8   : > { %10348 = vst [vmem:[#allocation23_spill] sm:$0xff] %v9086_v13  ;;  %v9088_v49 = vpop.f32.mrf.mxu0 }
 0xaa9   : > { %10349 = vst [vmem:[#allocation38_spill] sm:$0xff] %v9088_v49  ;;  %v9090_v39 = vpop.f32.mrf.mxu1 }
 0xaaa   : > { %10350 = vst [vmem:[#allocation55_spill] sm:$0xff] %v9090_v39  ;;  %v9092_v62 = vpop.f32.mrf.mxu0 }
 0xaab   : > { %10351 = vst [vmem:[#allocation59_spill] sm:$0xff] %v9092_v62  ;;  %v9094_v33 = vpop.f32.mrf.mxu1 }
 0xaac   : > { %10352 = vst [vmem:[#allocation51_spill] sm:$0xff] %v9094_v33  ;;  %v9096_v24 = vpop.f32.mrf.mxu0 }
 0xaad   : > { %10353 = vst [vmem:[#allocation39_spill] sm:$0xff] %v9096_v24  ;;  %v9098_v28 = vpop.f32.mrf.mxu1 }
 0xaae   : > { %10354 = vst [vmem:[#allocation3_spill] sm:$0xff] %v9098_v28  ;;  %v9100_v43 = vpop.f32.mrf.mxu0 }
 0xaaf   : > { %10355 = vst [vmem:[#allocation37_spill] sm:$0xff] %v9100_v43  ;;  %v9102_v14 = vpop.f32.mrf.mxu1 }
 0xab0   : > { %10356 = vst [vmem:[#allocation5_spill] sm:$0xff] %v9102_v14  ;;  %v9104_v18 = vpop.f32.mrf.mxu0 }
 0xab1   : > { %10357 = vst [vmem:[#allocation27_spill] sm:$0xff] %v9104_v18  ;;  %v9106_v50 = vpop.f32.mrf.mxu1 }
 0xab2   : > { %10358 = vst [vmem:[#allocation8_spill] sm:$0xff] %v9106_v50  ;;  %v9108_v13 = vpop.f32.mrf.mxu0 }
 0xab3   : > { %10359 = vst [vmem:[#allocation6_spill] sm:$0xff] %v9108_v13  ;;  %v9110_v49 = vpop.f32.mrf.mxu1 }
 0xab4   : > { %10360 = vst [vmem:[#allocation66_spill] sm:$0xff] %v9110_v49  ;;  %v6104_v39 = vpop.f32.mrf.mxu0 }
 0xab5   : > { %v9112_v62 = vpop.f32.mrf.mxu1 }
 0xab6   : > { %10361 = vst [vmem:[#allocation67_spill] sm:$0xff] %v9112_v62  ;;  %v9114_v33 = vpop.f32.mrf.mxu0  ;;  %v3879_v62 = vadd.f32 %v8982_v20, %v8919_v38  ;;  %v3884_v38 = vadd.f32 %v9006_v41, %v8937_v3 }
 0xab7   : > { %v9116_v24 = vpop.f32.mrf.mxu1 }
 0xab8   : > { %10362 = vst [vmem:[#allocation28_spill] sm:$0xff] %v9116_v24  ;;  %v9118_v28 = vpop.f32.mrf.mxu0  ;;  %v3877_v24 = vadd.f32 %v8986_v16, %v8922_v19  ;;  %v3882_v19 = vadd.f32 %v9010_v61, %v8940_v48  ;;  %v4369_v20 = vadd.f32 %v9026_v22, %v3879_v62 }
 0xab9   : > { %10363 = vst [vmem:[#allocation29_spill] sm:$0xff] %v9118_v28  ;;  %v9120_v43 = vpop.f32.mrf.mxu1  ;;  %v3880_v28 = vadd.f32 %v8990_v23, %v8925_v36  ;;  %v3887_v36 = vadd.f32 %v9014_v55, %v8943_v30  ;;  %v3891_v30 = vadd.f32 %v9032_v40, %v8955_v63  ;;  %v10374_v40 = vld [vmem:[#allocation53_spill] sm:$0xff] }
 0xaba   : > { %10364 = vst [vmem:[#allocation69_spill] sm:$0xff] %v9120_v43  ;;  %v9122_v14 = vpop.f32.mrf.mxu0  ;;  %v3878_v43 = vadd.f32 %v8994_v9, %v8928_v35  ;;  %v3885_v35 = vadd.f32 %v9018_v52, %v8946_v42  ;;  %v4367_v48 = vadd.f32 %v9030_v11, %v3877_v24  ;;  %v3889_v42 = vadd.f32 %v9036_v56, %v8958_v1  ;;  %v10370_v52 = vld [vmem:[#allocation52_spill] sm:$0xff] }
 0xabb   : > { %v9124_v18 = vpop.f32.mrf.mxu1  ;;  %v4370_v23 = vadd.f32 %v9034_v57, %v3880_v28  ;;  %v3892_v9 = vadd.f32 %v9040_v45, %v8961_v8  ;;  %v3895_v1 = vadd.f32 %v9048_v6, %v8967_v44  ;;  %v3893_v8 = vadd.f32 %v9052_v21, %v8970_v34  ;;  %v10375_v56 = vld [vmem:[#allocation80_spill] sm:$0xff]  ;;  %v10378_v6 = vld [vmem:[#allocation14_spill] sm:$0xff] }
 0xabc   : > { %10365 = vst [vmem:[#allocation75_spill] sm:$0xff] %v9124_v18  ;;  %v9126_v50 = vpop.f32.mrf.mxu0  ;;  %v3883_v18 = vadd.f32 %v8998_v12, %v8931_v25  ;;  %v3888_v25 = vadd.f32 %v9022_v2, %v8949_v10  ;;  %v4368_v10 = vadd.f32 %v9038_v17, %v3878_v43  ;;  %v3890_v12 = vadd.f32 %v9044_v15, %v8964_v0  ;;  %v10371_v2 = vld [vmem:[#allocation63_spill] sm:$0xff]  ;;  %v10376_v17 = vld [vmem:[#allocation57_spill] sm:$0xff]  ;;  %v10377_v15 = vld [vmem:[#allocation22_spill] sm:$0xff] }
 0xabd   : > { %10366 = vst [vmem:[#allocation30_spill] sm:$0xff] %v9126_v50  ;;  %v9128_v13 = vpop.f32.mrf.mxu1  ;;  %v9189_v43 = vadd.f32 %v9050_v46, %v3884_v38  ;;  %v3896_v0 = vadd.f32 %v9056_v26, %v8973_v31  ;;  %v9199_v28 = vadd.f32 %v9058_v47, %v3887_v36  ;;  %v9208_v24 = vadd.f32 %v9062_v37, %v3885_v35  ;;  %v10369_v31 = vld [vmem:[#allocation74_spill] sm:$0xff]  ;;  %v10379_v46 = vld [vmem:[#allocation21_spill] sm:$0xff] }
 0xabe   : > { %10367 = vst [vmem:[#allocation13_spill] sm:$0xff] %v9128_v13  ;;  %v9130_v49 = vpop.f32.mrf.mxu0  ;;  %v3899_v34 = vadd.f32 %v9064_v51, %v8979_v29  ;;  %v9213_v55 = vadd.f32 %v9066_v53, %v3888_v25  ;;  %v3897_v62 = vadd.f32 %v10370_v52, %v10369_v31  ;;  %v9223_v57 = vadd.f32 %v10374_v40, %v3891_v30  ;;  %v10382_v37 = vld [vmem:[#allocation61_spill] sm:$0xff]  ;;  %v10383_v53 = vld [vmem:[#allocation23_spill] sm:$0xff]  ;;  %v10385_v36 = vld [vmem:[#allocation38_spill] sm:$0xff] }
 0xabf   : > { %10368 = vst [vmem:[#allocation9_spill] sm:$0xff] %v9130_v49  ;;  %v9142_v50 = vpop.f32.mrf.mxu1  ;;  %v3881_v49 = vadd.f32 %v9002_v58, %v8934_v5  ;;  %v3886_v5 = vadd.f32 %v9028_v4, %v8952_v54  ;;  %v9175_v54 = vadd.f32 %v9042_v27, %v3883_v18  ;;  %v9194_v18 = vadd.f32 %v9054_v7, %v3882_v19  ;;  %v10373_v4 = vld [vmem:[#allocation20_spill] sm:$0xff]  ;;  %v10380_v7 = vld [vmem:[#allocation58_spill] sm:$0xff]  ;;  %v10384_v19 = vld [vmem:[#allocation45_spill] sm:$0xff] }
 0xac0   : > { %v9144_v13 = vpop.f32.mrf.mxu0  ;;  %v3898_v45 = vadd.f32 %v10376_v17, %v10375_v56  ;;  %v3903_v21 = vadd.f32 %v10379_v46, %v10378_v6  ;;  %v9237_v26 = vadd.f32 %v10380_v7, %v3892_v9  ;;  %v4635_v47 = vadd.f32 %v6104_v39, %v4369_v20  ;;  %v10386_v25 = vld [vmem:[#allocation55_spill] sm:$0xff]  ;;  %v10387_v39 = vld [vmem:[#allocation46_spill] sm:$0xff]  ;;  %v10394_v6 = vld [vmem:[#allocation37_spill] sm:$0xff] }
 0xac1   : > { %v9161_v16 = vpop.f32.mrf.mxu1  ;;  %v9184_v63 = vadd.f32 %v9046_v59, %v3881_v49  ;;  %v3894_v49 = vadd.f32 %v9060_v32, %v8976_v60  ;;  %v9218_v22 = vadd.f32 %v10371_v2, %v3886_v5  ;;  %v10372_v60 = vld [vmem:[#allocation36_spill] sm:$0xff]  ;;  %v9232_v59 = vadd.f32 %v10377_v15, %v3889_v42  ;;  %v9252_v42 = vld [vmem:[%s9614_s4] ss:$0 sm:$0xff]  ;;  %v10395_v7 = vld [vmem:[#allocation5_spill] sm:$0xff] }
 0xac2   : > { %v9163_v3 = vpop.f32.mrf.mxu0  ;;  %v3900_v11 = vadd.f32 %v10373_v4, %v10372_v60  ;;  %v10381_v32 = vld [vmem:[#allocation44_spill] sm:$0xff]  ;;  %v9242_v38 = vadd.f32 %v10383_v53, %v3890_v12  ;;  %v3904_v35 = vadd.f32 %v10385_v36, %v10384_v19  ;;  %v9247_v5 = vadd.f32 %v10386_v25, %v3895_v1  ;;  %v10388_v20 = vld [vmem:[#allocation59_spill] sm:$0xff]  ;;  %v10398_v19 = vld [vmem:[#allocation29_spill] sm:$0xff] }
 0xac3   : > { %v9179_v58 = vpop.f32.mrf.mxu1  ;;  %v3901_v51 = vadd.f32 %v10382_v37, %v10381_v32  ;;  %v3902_v31 = vadd.f32 %v10388_v20, %v10387_v39  ;;  %v10389_v52 = vld [vmem:[#allocation51_spill] sm:$0xff]  ;;  %v4633_v2 = vadd.f32 %v9114_v33, %v4367_v48  ;;  %v10393_v15 = vld [vmem:[#allocation48_spill] sm:$0xff]  ;;  %v9270_v32 = vadd.f32 %v10395_v7, %v3894_v49  ;;  %v10396_v48 = vld [vmem:[#allocation49_spill] sm:$0xff] }
 0xac4   : > { %v9181_v41 = vpop.f32.mrf.mxu0  ;;  %v9259_v12 = vadd.f32 %v10389_v52, %v3893_v8  ;;  %v10390_v4 = vld [vmem:[#allocation47_spill] sm:$0xff]  ;;  %v3905_v46 = vadd.f32 %v10394_v6, %v10393_v15  ;;  %v10400_v49 = vld [vmem:[#allocation50_spill] sm:$0xff] }
 0xac5   : > { %v9203_v61 = vpop.f32.mrf.mxu1  ;;  %v10391_v1 = vld [vmem:[#allocation39_spill] sm:$0xff]  ;;  %v10401_v20 = vld [vmem:[#allocation6_spill] sm:$0xff] }
 0xac6   : > { %v9205_v44 = vpop.f32.mrf.mxu0  ;;  %v3907_v40 = vadd.f32 %v10391_v1, %v10390_v4  ;;  %v10392_v56 = vld [vmem:[#allocation3_spill] sm:$0xff]  ;;  %v9288_v52 = vadd.f32 %v10401_v20, %v10400_v49  ;;  %v10402_v4 = vld [vmem:[#allocation66_spill] sm:$0xff] }
 0xac7   : > { %v9227_v27 = vpop.f32.mrf.mxu1  ;;  %v9265_v17 = vadd.f32 %v10392_v56, %v3896_v0  ;;  %v9275_v8 = vld [vmem:[%s9615_s5] ss:$0 sm:$0xff]  ;;  %v4636_v0 = vadd.f32 %v10398_v19, %v4370_v23  ;;  %v9291_v1 = vadd.f32 %v10402_v4, %v3897_v62  ;;  %v10404_v62 = vld [vmem:[#allocation28_spill] sm:$0xff]  ;;  %v10407_v49 = vld [vmem:[#allocation30_spill] sm:$0xff] }
 0xac8   : > { %v9229_v29 = vpop.f32.mrf.mxu0  ;;  %v10403_v56 = vld [vmem:[#allocation67_spill] sm:$0xff]  ;;  %v4639_v20 = vadd.f32 %v10407_v49, %v9175_v54  ;;  %v4640_v54 = vadd.f32 %v9144_v13, %v9189_v43 }
 0xac9   : > { %v6138_v30 = vpop.f32.mrf.mxu1  ;;  %v9294_v15 = vadd.f32 %v10403_v56, %v3900_v11  ;;  %v9299_v23 = vld [vmem:[%s9616_s6] ss:$0 sm:$0xff]  ;;  %v10405_v11 = vld [vmem:[#allocation69_spill] sm:$0xff] }
 0xaca   : > { %v9254_v9 = vpop.f32.mrf.mxu0  ;;  %v4901_v60 = vadd.f32 %v6138_v30, %v4635_v47  ;;  %v10397_v47 = vld [vmem:[#allocation27_spill] sm:$0xff]  ;;  %v10399_v30 = vld [vmem:[#allocation8_spill] sm:$0xff] }
 0xacb   : > { %v4772_v37 = vpop.f32.mrf.mxu1  ;;  %v3908_v53 = vadd.f32 %v10397_v47, %v10396_v48  ;;  %v9284_v39 = vadd.f32 %v10399_v30, %v3899_v34  ;;  %v4634_v34 = vadd.f32 %v9122_v14, %v4368_v10  ;;  %v9307_v48 = vadd.f32 %v10404_v62, %v3898_v45  ;;  %v10406_v19 = vld [vmem:[#allocation75_spill] sm:$0xff] }
 0xacc   : > { %v9277_v33 = vpop.f32.mrf.mxu0  ;;  %v4940_v36 = vadd.f32 %v9252_v42, %v4901_v60  ;;  %v4899_v25 = vadd.f32 %v4772_v37, %v4633_v2  ;;  %v9310_v47 = vadd.f32 %v10405_v11, %v3903_v21  ;;  %v9313_v30 = vadd.f32 %v10406_v19, %v3901_v51  ;;  %v10409_v21 = vld [vmem:[#allocation9_spill] sm:$0xff] }
 0xacd   : > { %v6139_v60 = vpop.f32.mrf.mxu1  ;;  %v4637_v51 = vadd.f32 %v10409_v21, %v9184_v63  ;;  %v9338_v11 = vadd.f32 %v9161_v16, %v3907_v40  ;;  %v9343_v63 = vadd.f32 %v9179_v58, %v3905_v46  ;;  %v6379_v19 = vld [vmem:[%s6481_s8 + $0x10] sm:$0xff]  ;;  %v4643_v16 = vadd.f32 %v9181_v41, %v9199_v28 }
 0xace   : > { %v9301_v2 = vpop.f32.mrf.mxu0  ;;  %v4979_v6 = vmul.f32 %v9275_v8, %v4940_v36  ;;  %v4938_v7 = vadd.f32 %v9252_v42, %v4899_v25  ;;  %v4902_v37 = vadd.f32 %v6139_v60, %v4636_v0  ;;  %v10408_v36 = vld [vmem:[#allocation13_spill] sm:$0xff]  ;;  %v9328_v60 = vadd.f32 %v9142_v50, %v3902_v31 }
 0xacf   : > { %v4775_v4 = vpop.f32.mrf.mxu1  ;;  %v9323_v25 = vadd.f32 %v10408_v36, %v3904_v35  ;;  %v4638_v50 = vadd.f32 %v9163_v3, %v9194_v18  ;;  %v9360_v3 = vadd.f32 %v9203_v61, %v3908_v53  ;;  %v4641_v41 = vadd.f32 %v9205_v44, %v9208_v24 }
 0xad0   : > { %v9317_v56 = vpop.f32.mrf.mxu0  ;;  %v5018_v14 = vadd.f32 %v9299_v23, %v4979_v6  ;;  %v4977_v10 = vmul.f32 %v9275_v8, %v4938_v7  ;;  %v4941_v0 = vadd.f32 %v9252_v42, %v4902_v37  ;;  %v4900_v45 = vadd.f32 %v4775_v4, %v4634_v34 }
 0xad1   : > { %v6142_v62 = vpop.f32.mrf.mxu1  ;;  %v9378_v44 = vadd.f32 %v9227_v27, %v9288_v52  ;;  %v4644_v52 = vadd.f32 %v9229_v29, %v9213_v55  ;;  %v4642_v55 = vadd.f32 %v9254_v9, %v9218_v22  ;;  %v6383_v29 = vld [vmem:[%s6481_s8 + $0x30] sm:$0xff]  ;;  %v4647_v22 = vadd.f32 %v9277_v33, %v9223_v57  ;;  %v6385_v33 = vld [vmem:[%s6481_s8 + $0x38] sm:$0xff] }
 0xad2   : > { %v9332_v6 = vpop.f32.mrf.mxu0  ;;  %v5050_v7 = vmul.f32 0.25, %v5018_v14  ;;  %v5016_v34 = vadd.f32 %v9299_v23, %v4977_v10  ;;  %v4980_v35 = vmul.f32 %v9275_v8, %v4941_v0  ;;  %v4939_v37 = vadd.f32 %v9252_v42, %v4900_v45  ;;  %v6380_v0 = vld [vmem:[%s6481_s8] sm:$0xff] }
 0xad3   : > { %v4905_v13 = vadd.f32 %v6142_v62, %v4639_v20  ;;  %v4788_v43 = vpop.f32.mrf.mxu1 }
 0xad4   : > { %v9345_v31 = vpop.f32.mrf.mxu0  ;;  %v5082_v49 = vadd.f32 %v6379_v19, %v5050_v7  ;;  %v5048_v4 = vmul.f32 0.25, %v5016_v34  ;;  %v5019_v14 = vadd.f32 %v9299_v23, %v4980_v35  ;;  %v4978_v10 = vmul.f32 %v9275_v8, %v4939_v37  ;;  %v6381_v34 = vld [vmem:[%s6481_s8 + $0x18] sm:$0xff] }
 0xad5   : > { %v4944_v58 = vadd.f32 %v9252_v42, %v4905_v13  ;;  %v4903_v18 = vadd.f32 %v4788_v43, %v4637_v51  ;;  %v6143_v40 = vpop.f32.mrf.mxu1 }
 0xad6   : > { %v9363_v46 = vpop.f32.mrf.mxu0  ;;  %v5114_v20 = vmax.f32 %v5082_v49, 0.0  ;;  %v5080_v45 = vadd.f32 %v6380_v0, %v5048_v4  ;;  %v5051_v36 = vmul.f32 0.25, %v5019_v14  ;;  %v5017_v21 = vadd.f32 %v9299_v23, %v4978_v10  ;;  %v6382_v14 = vld [vmem:[%s6481_s8 + $0x8] sm:$0xff] }
 0xad7   : > { %v4983_v28 = vmul.f32 %v9275_v8, %v4944_v58  ;;  %v4942_v61 = vadd.f32 %v9252_v42, %v4903_v18  ;;  %v4906_v53 = vadd.f32 %v6143_v40, %v4640_v54  ;;  %v4791_v51 = vpop.f32.mrf.mxu1 }
 0xad8   : > { %v9371_v62 = vpop.f32.mrf.mxu0  ;;  %5146 = vst.msk [vmem:[%s9355_s22 + $0x10] sm:$0xff] %vm10410_vm0, %v5114_v20  ;;  %v5112_v7 = vmax.f32 %v5080_v45, 0.0  ;;  %v5083_v35 = vadd.f32 %v6381_v34, %v5051_v36  ;;  %v5049_v37 = vmul.f32 0.25, %v5017_v21  ;;  %v4904_v13 = vadd.f32 %v4791_v51, %v4638_v50 }
 0xad9   : > { %v5022_v24 = vadd.f32 %v9299_v23, %v4983_v28  ;;  %v4981_v43 = vmul.f32 %v9275_v8, %v4942_v61  ;;  %v4945_v54 = vadd.f32 %v9252_v42, %v4906_v53  ;;  %v6146_v19 = vpop.f32.mrf.mxu1 }
 0xada   : > { %v9383_v49 = vpop.f32.mrf.mxu0  ;;  %5144 = vst.msk [vmem:[%s9355_s22] sm:$0xff] %vm10411_vm7, %v5112_v7  ;;  %v5115_v4 = vmax.f32 %v5083_v35, 0.0  ;;  %v5081_v50 = vadd.f32 %v6382_v14, %v5049_v37  ;;  %v4943_v10 = vadd.f32 %v9252_v42, %v4904_v13  ;;  %v4909_v27 = vadd.f32 %v6146_v19, %v4643_v16  ;;  %v6384_v13 = vld [vmem:[%s6481_s8 + $0x20] sm:$0xff]  ;;  %vm10426_vm7 = vmmov %vm10410_vm0 }
 0xadb   : > { %v5054_v58 = vmul.f32 0.25, %v5022_v24  ;;  %v5020_v18 = vadd.f32 %v9299_v23, %v4981_v43  ;;  %v4984_v40 = vmul.f32 %v9275_v8, %v4945_v54  ;;  %v4804_v20 = vpop.f32.mrf.mxu1 }
 0xadc   : > { %v9393_v0 = vpop.f32.mrf.mxu0  ;;  %5147 = vst.msk [vmem:[%s9355_s22 + $0x18] sm:$0xff] %vm10412_vm13, %v5115_v4  ;;  %v5113_v45 = vmax.f32 %v5081_v50, 0.0  ;;  %v4982_v36 = vmul.f32 %v9275_v8, %v4943_v10  ;;  %v4948_v21 = vadd.f32 %v9252_v42, %v4909_v27  ;;  %v4907_v16 = vadd.f32 %v4804_v20, %v4641_v41  ;;  %vm10427_vm13 = vmmov %vm10410_vm0 }
 0xadd   : > { %v5086_v28 = vadd.f32 %v6383_v29, %v5054_v58  ;;  %v5052_v61 = vmul.f32 0.25, %v5020_v18  ;;  %v5023_v53 = vadd.f32 %v9299_v23, %v4984_v40  ;;  %v6147_v51 = vpop.f32.mrf.mxu1  ;;  %v4645_v27 = vadd.f32 %v9301_v2, %v9232_v59  ;;  %v6386_v40 = vld [vmem:[%s6481_s8 + $0x28] sm:$0xff] }
 0xade   : > { %v9403_v7 = vpop.f32.mrf.mxu0  ;;  %5145 = vst.msk [vmem:[%s9355_s22 + $0x8] sm:$0xff] %vm10413_vm11, %v5113_v45  ;;  %v5021_v34 = vadd.f32 %v9299_v23, %v4982_v36  ;;  %v4987_v35 = vmul.f32 %v9275_v8, %v4948_v21  ;;  %v4946_v41 = vadd.f32 %v9252_v42, %v4907_v16  ;;  %v4910_v37 = vadd.f32 %v6147_v51, %v4644_v52  ;;  %vm10428_vm11 = vmmov %vm10410_vm0 }
 0xadf   : > { %v5118_v9 = vmax.f32 %v5086_v28, 0.0  ;;  %v5084_v24 = vadd.f32 %v6384_v13, %v5052_v61  ;;  %v5055_v43 = vmul.f32 0.25, %v5023_v53  ;;  %v4807_v54 = vpop.f32.mrf.mxu1  ;;  %v4648_v59 = vadd.f32 %v9317_v56, %v9237_v26  ;;  %v6387_v53 = vld [vmem:[%s6481_s8 + $0x50] sm:$0xff]  ;;  %v6388_v13 = vld [vmem:[%s6481_s8 + $0x40] sm:$0xff] }
 0xae0   : > { %v9413_v19 = vpop.f32.mrf.mxu0  ;;  %v5053_v4 = vmul.f32 0.25, %v5021_v34  ;;  %v5026_v14 = vadd.f32 %v9299_v23, %v4987_v35  ;;  %v4985_v50 = vmul.f32 %v9275_v8, %v4946_v41  ;;  %v4949_v10 = vadd.f32 %v9252_v42, %v4910_v37 }
 0xae1   : > { %5150 = vst.msk [vmem:[%s9355_s22 + $0x30] sm:$0xff] %vm10414_vm9, %v5118_v9  ;;  %v5116_v57 = vmax.f32 %v5084_v24, 0.0  ;;  %v5087_v52 = vadd.f32 %v6385_v33, %v5055_v43  ;;  %v4908_v58 = vadd.f32 %v4807_v54, %v4642_v55  ;;  %v6150_v18 = vpop.f32.mrf.mxu1  ;;  %v4646_v41 = vadd.f32 %v9332_v6, %v9242_v38  ;;  %vm10429_vm9 = vmmov %vm10410_vm0 }
 0xae2   : > { %v5085_v20 = vadd.f32 %v6386_v40, %v5053_v4  ;;  %v5058_v45 = vmul.f32 0.25, %v5026_v14  ;;  %v5024_v36 = vadd.f32 %v9299_v23, %v4985_v50  ;;  %v4988_v21 = vmul.f32 %v9275_v8, %v4949_v10  ;;  %v9426_v16 = vpop.f32.mrf.mxu0 }
 0xae3   : > { %5148 = vst.msk [vmem:[%s9355_s22 + $0x20] sm:$0xff] %vm10415_vm4, %v5116_v57  ;;  %v5119_v2 = vmax.f32 %v5087_v52, 0.0  ;;  %v4947_v55 = vadd.f32 %v9252_v42, %v4908_v58  ;;  %v4913_v29 = vadd.f32 %v6150_v18, %v4647_v22  ;;  %v4820_v28 = vpop.f32.mrf.mxu1  ;;  %v4651_v38 = vadd.f32 %v9345_v31, %v9247_v5  ;;  %v6389_v57 = vld [vmem:[%s6481_s8 + $0x58] sm:$0xff]  ;;  %vm10430_vm4 = vmmov %vm10410_vm0 }
 0xae4   : > { %v5117_v61 = vmax.f32 %v5085_v20, 0.0  ;;  %v5090_v51 = vadd.f32 %v6387_v53, %v5058_v45  ;;  %v5056_v34 = vmul.f32 0.25, %v5024_v36  ;;  %v5027_v35 = vadd.f32 %v9299_v23, %v4988_v21  ;;  %v9444_v54 = vpop.f32.mrf.mxu0 }
 0xae5   : > { %5151 = vst.msk [vmem:[%s9355_s22 + $0x38] sm:$0xff] %vm10416_vm2, %v5119_v2  ;;  %v4986_v26 = vmul.f32 %v9275_v8, %v4947_v55  ;;  %v4952_v56 = vadd.f32 %v9252_v42, %v4913_v29  ;;  %v4911_v37 = vadd.f32 %v4820_v28, %v4645_v27  ;;  %v6151_v22 = vpop.f32.mrf.mxu1  ;;  %v4649_v5 = vadd.f32 %v9363_v46, %v9259_v12  ;;  %v6390_v46 = vld [vmem:[%s6481_s8 + $0x48] sm:$0xff]  ;;  %vm10431_vm2 = vmmov %vm10410_vm0 }
 0xae6   : > { %5149 = vst.msk [vmem:[%s9355_s22 + $0x28] sm:$0xff] %vm10417_vm14, %v5117_v61  ;;  %v5122_v9 = vmax.f32 %v5090_v51, 0.0  ;;  %v5088_v24 = vadd.f32 %v6388_v13, %v5056_v34  ;;  %v5059_v43 = vmul.f32 0.25, %v5027_v35  ;;  %v4914_v4 = vadd.f32 %v6151_v22, %v4648_v59  ;;  %v9462_v21 = vpop.f32.mrf.mxu0  ;;  %vm10432_vm14 = vmmov %vm10410_vm0 }
 0xae7   : > { %v5025_v6 = vadd.f32 %v9299_v23, %v4986_v26  ;;  %v4991_v14 = vmul.f32 %v9275_v8, %v4952_v56  ;;  %v4950_v50 = vadd.f32 %v9252_v42, %v4911_v37  ;;  %v4823_v10 = vpop.f32.mrf.mxu1  ;;  %v4652_v12 = vadd.f32 %v9371_v62, %v9265_v17 }
 0xae8   : > { %5154 = vst.msk [vmem:[%s9355_s22 + $0x50] sm:$0xff] %vm10418_vm10, %v5122_v9  ;;  %v5120_v27 = vmax.f32 %v5088_v24, 0.0  ;;  %v5091_v33 = vadd.f32 %v6389_v57, %v5059_v43  ;;  %v4953_v52 = vadd.f32 %v9252_v42, %v4914_v4  ;;  %v4912_v58 = vadd.f32 %v4823_v10, %v4646_v41  ;;  %v6391_v41 = vld [vmem:[%s6481_s8 + $0x70] sm:$0xff]  ;;  %v9478_v13 = vpop.f32.mrf.mxu0  ;;  %vm10433_vm10 = vmmov %vm10410_vm0 }
 0xae9   : > { %v5057_v31 = vmul.f32 0.25, %v5025_v6  ;;  %v5030_v18 = vadd.f32 %v9299_v23, %v4991_v14  ;;  %v4989_v40 = vmul.f32 %v9275_v8, %v4950_v50  ;;  %v6154_v20 = vpop.f32.mrf.mxu1  ;;  %v4650_v17 = vadd.f32 %v9383_v49, %v9270_v32  ;;  %v6392_v49 = vld [vmem:[%s6481_s8 + $0x60] sm:$0xff]  ;;  %v6393_v50 = vld [vmem:[%s6481_s8 + $0x78] sm:$0xff] }
 0xaea   : > { %5152 = vst.msk [vmem:[%s9355_s22 + $0x40] sm:$0xff] %vm10419_vm8, %v5120_v27  ;;  %v5123_v45 = vmax.f32 %v5091_v33, 0.0  ;;  %v4992_v36 = vmul.f32 %v9275_v8, %v4953_v52  ;;  %v4951_v59 = vadd.f32 %v9252_v42, %v4912_v58  ;;  %v4917_v2 = vadd.f32 %v6154_v20, %v4651_v38  ;;  %vm10434_vm8 = vmmov %vm10410_vm0 }
 0xaeb   : > { %v5089_v55 = vadd.f32 %v6390_v46, %v5057_v31  ;;  %v5062_v29 = vmul.f32 0.25, %v5030_v18  ;;  %v5028_v28 = vadd.f32 %v9299_v23, %v4989_v40  ;;  %v4836_v61 = vpop.f32.mrf.mxu1  ;;  %v4655_v4 = vadd.f32 %v9393_v0, %v9284_v39  ;;  %v6394_v18 = vld [vmem:[%s6481_s8 + $0x68] sm:$0xff] }
 0xaec   : > { %5155 = vst.msk [vmem:[%s9355_s22 + $0x58] sm:$0xff] %vm10420_vm15, %v5123_v45  ;;  %v5031_v53 = vadd.f32 %v9299_v23, %v4992_v36  ;;  %v4990_v51 = vmul.f32 %v9275_v8, %v4951_v59  ;;  %v4956_v34 = vadd.f32 %v9252_v42, %v4917_v2  ;;  %v4915_v35 = vadd.f32 %v4836_v61, %v4649_v5  ;;  %v4605_v45 = vpop.f32.mrf.mxu0  ;;  %vm10435_vm15 = vmmov %vm10410_vm0 }
 0xaed   : > { %v5121_v62 = vmax.f32 %v5089_v55, 0.0  ;;  %v5094_v26 = vadd.f32 %v6391_v41, %v5062_v29  ;;  %v5060_v56 = vmul.f32 0.25, %v5028_v28  ;;  %v6155_v37 = vpop.f32.mrf.mxu1  ;;  %v4653_v52 = vadd.f32 %v9403_v7, %v9291_v1  ;;  %v6395_v55 = vld [vmem:[%s6481_s8 + $0x90] sm:$0xff] }
 0xaee   : > { %v5063_v22 = vmul.f32 0.25, %v5031_v53  ;;  %v5029_v9 = vadd.f32 %v9299_v23, %v4990_v51  ;;  %v4995_v24 = vmul.f32 %v9275_v8, %v4956_v34  ;;  %v4954_v43 = vadd.f32 %v9252_v42, %v4915_v35  ;;  %v6132_v41 = vpop.f32.mrf.mxu0 }
 0xaef   : > { %5153 = vst.msk [vmem:[%s9355_s22 + $0x48] sm:$0xff] %vm10421_vm6, %v5121_v62  ;;  %v5126_v32 = vmax.f32 %v5094_v26, 0.0  ;;  %v5092_v38 = vadd.f32 %v6392_v49, %v5060_v56  ;;  %v4918_v6 = vadd.f32 %v6155_v37, %v4652_v12  ;;  %v4839_v14 = vpop.f32.mrf.mxu1  ;;  %v4656_v59 = vadd.f32 %v9413_v19, %v9294_v15  ;;  %vm10436_vm6 = vmmov %vm10410_vm0 }
 0xaf0   : > { %v5095_v10 = vadd.f32 %v6393_v50, %v5063_v22  ;;  %v5061_v27 = vmul.f32 0.25, %v5029_v9  ;;  %v5034_v57 = vadd.f32 %v9299_v23, %v4995_v24  ;;  %v4993_v33 = vmul.f32 %v9275_v8, %v4954_v43  ;;  %v4618_v50 = vpop.f32.mrf.mxu0 }
 0xaf1   : > { %5158 = vst.msk [vmem:[%s9355_s22 + $0x70] sm:$0xff] %vm10422_vm1, %v5126_v32  ;;  %v5124_v39 = vmax.f32 %v5092_v38, 0.0  ;;  %v4957_v0 = vadd.f32 %v9252_v42, %v4918_v6  ;;  %v4916_v58 = vadd.f32 %v4839_v14, %v4650_v17  ;;  %v6158_v5 = vpop.f32.mrf.mxu1  ;;  %v4654_v15 = vadd.f32 %v9426_v16, %v9307_v48  ;;  %v6396_v17 = vld [vmem:[%s6481_s8 + $0x80] sm:$0xff]  ;;  %vm10437_vm1 = vmmov %vm10410_vm0 }
 0xaf2   : > { %v5127_v31 = vmax.f32 %v5095_v10, 0.0  ;;  %v5093_v40 = vadd.f32 %v6394_v18, %v5061_v27  ;;  %v5066_v20 = vmul.f32 0.25, %v5034_v57  ;;  %v5032_v36 = vadd.f32 %v9299_v23, %v4993_v33 }
 0xaf3   : > { %5156 = vst.msk [vmem:[%s9355_s22 + $0x60] sm:$0xff] %vm10423_vm3, %v5124_v39  ;;  %v4996_v1 = vmul.f32 %v9275_v8, %v4957_v0  ;;  %v4955_v7 = vadd.f32 %v9252_v42, %v4916_v58  ;;  %v4921_v2 = vadd.f32 %v6158_v5, %v4655_v4  ;;  %v4852_v12 = vpop.f32.mrf.mxu1  ;;  %v4659_v48 = vadd.f32 %v9444_v54, %v9310_v47  ;;  %v6397_v47 = vld [vmem:[%s6481_s8 + $0x98] sm:$0xff]  ;;  %vm10438_vm3 = vmmov %vm10410_vm0 }
 0xaf4   : > { %5159 = vst.msk [vmem:[%s9355_s22 + $0x78] sm:$0xff] %vm10424_vm12, %v5127_v31  ;;  %v5125_v46 = vmax.f32 %v5093_v40, 0.0  ;;  %v5098_v29 = vadd.f32 %v6395_v55, %v5066_v20  ;;  %v5064_v28 = vmul.f32 0.25, %v5032_v36  ;;  %v4919_v61 = vadd.f32 %v4852_v12, %v4653_v52  ;;  %v6398_v52 = vld [vmem:[%s6481_s8 + $0x88] sm:$0xff]  ;;  %vm10439_vm12 = vmmov %vm10410_vm0 }
 0xaf5   : > { %v5035_v19 = vadd.f32 %v9299_v23, %v4996_v1  ;;  %v4994_v53 = vmul.f32 %v9275_v8, %v4955_v7  ;;  %v4960_v51 = vadd.f32 %v9252_v42, %v4921_v2  ;;  %v6159_v34 = vpop.f32.mrf.mxu1  ;;  %v4657_v49 = vadd.f32 %v9462_v21, %v9313_v30  ;;  %v6133_v7 = vpop.f32.mrf.mxu0  ;;  %v6400_v2 = vld [vmem:[%s6481_s8 + $0xa0] sm:$0xff] }
 0xaf6   : > { %5157 = vst.msk [vmem:[%s9355_s22 + $0x68] sm:$0xff] %vm10425_vm5, %v5125_v46  ;;  %v5130_v35 = vmax.f32 %v5098_v29, 0.0  ;;  %v5096_v62 = vadd.f32 %v6396_v17, %v5064_v28  ;;  %v4958_v26 = vadd.f32 %v9252_v42, %v4919_v61  ;;  %v4922_v56 = vadd.f32 %v6159_v34, %v4656_v59  ;;  %vm10440_vm5 = vmmov %vm10410_vm0 }
 0xaf7   : > { %v5067_v16 = vmul.f32 0.25, %v5035_v19  ;;  %v5033_v37 = vadd.f32 %v9299_v23, %v4994_v53  ;;  %v4999_v22 = vmul.f32 %v9275_v8, %v4960_v51  ;;  %v4855_v9 = vpop.f32.mrf.mxu1  ;;  %v4660_v30 = vadd.f32 %v9478_v13, %v9323_v25  ;;  %v6399_v25 = vld [vmem:[%s6481_s8 + $0xb0] sm:$0xff]  ;;  %v6401_v53 = vld [vmem:[%s6481_s8 + $0xb8] sm:$0xff] }
 0xaf8   : > { %5162 = vst.msk [vmem:[%s9355_s22 + $0x90] sm:$0xff] %vm10410_vm0, %v5130_v35  ;;  %v5128_v24 = vmax.f32 %v5096_v62, 0.0  ;;  %v4997_v43 = vmul.f32 %v9275_v8, %v4958_v26  ;;  %v4961_v4 = vadd.f32 %v9252_v42, %v4922_v56  ;;  %v4920_v32 = vadd.f32 %v4855_v9, %v4654_v15  ;;  %v4621_v56 = vpop.f32.mrf.mxu0 }
 0xaf9   : > { %v5099_v54 = vadd.f32 %v6397_v47, %v5067_v16  ;;  %v5065_v38 = vmul.f32 0.25, %v5033_v37  ;;  %v5038_v6 = vadd.f32 %v9299_v23, %v4999_v22  ;;  %v6162_v14 = vpop.f32.mrf.mxu1  ;;  %v4658_v20 = vadd.f32 %v4605_v45, %v9328_v60  ;;  %v6402_v16 = vld [vmem:[%s6481_s8 + $0xa8] sm:$0xff]  ;;  %v6403_v47 = vld [vmem:[%s6481_s8 + $0xd0] sm:$0xff] }
 0xafa   : > { %5160 = vst.msk [vmem:[%s9355_s22 + $0x80] sm:$0xff] %vm10426_vm7, %v5128_v24  ;;  %v5036_v10 = vadd.f32 %v9299_v23, %v4997_v43  ;;  %v5000_v27 = vmul.f32 %v9275_v8, %v4961_v4  ;;  %v4959_v57 = vadd.f32 %v9252_v42, %v4920_v32  ;;  %v4925_v33 = vadd.f32 %v6162_v14, %v4659_v48 }
 0xafb   : > { %v5131_v21 = vmax.f32 %v5099_v54, 0.0  ;;  %v5097_v39 = vadd.f32 %v6398_v52, %v5065_v38  ;;  %v5070_v0 = vmul.f32 0.25, %v5038_v6  ;;  %v4868_v58 = vpop.f32.mrf.mxu1  ;;  %v4663_v28 = vadd.f32 %v6132_v41, %v9338_v11  ;;  %v6404_v52 = vld [vmem:[%s6481_s8 + $0xc0] sm:$0xff] }
 0xafc   : > { %v5068_v5 = vmul.f32 0.25, %v5036_v10  ;;  %v5039_v31 = vadd.f32 %v9299_v23, %v5000_v27  ;;  %v4998_v18 = vmul.f32 %v9275_v8, %v4959_v57  ;;  %v4964_v40 = vadd.f32 %v9252_v42, %v4925_v33 }
 0xafd   : > { %5163 = vst.msk [vmem:[%s9355_s22 + $0x98] sm:$0xff] %vm10427_vm13, %v5131_v21  ;;  %v5129_v36 = vmax.f32 %v5097_v39, 0.0  ;;  %v5102_v13 = vadd.f32 %v6399_v25, %v5070_v0  ;;  %v4923_v59 = vadd.f32 %v4868_v58, %v4657_v49  ;;  %v6163_v1 = vpop.f32.mrf.mxu1  ;;  %v4661_v17 = vadd.f32 %v4618_v50, %v9343_v63 }
 0xafe   : > { %v5100_v12 = vadd.f32 %v6400_v2, %v5068_v5  ;;  %v5071_v46 = vmul.f32 0.25, %v5039_v31  ;;  %v5037_v55 = vadd.f32 %v9299_v23, %v4998_v18  ;;  %v5003_v29 = vmul.f32 %v9275_v8, %v4964_v40 }
 0xaff   : > { %5161 = vst.msk [vmem:[%s9355_s22 + $0x88] sm:$0xff] %vm10428_vm11, %v5129_v36  ;;  %v5134_v60 = vmax.f32 %v5102_v13, 0.0  ;;  %v4962_v45 = vadd.f32 %v9252_v42, %v4923_v59  ;;  %v4926_v61 = vadd.f32 %v6163_v1, %v4660_v30  ;;  %v4871_v15 = vpop.f32.mrf.mxu1  ;;  %v4664_v63 = vadd.f32 %v6133_v7, %v9360_v3  ;;  %v6405_v36 = vld [vmem:[%s6481_s8 + $0xd8] sm:$0xff] }
 0xb00   : > { %v5132_v19 = vmax.f32 %v5100_v12, 0.0  ;;  %v5103_v51 = vadd.f32 %v6401_v53, %v5071_v46  ;;  %v5069_v34 = vmul.f32 0.25, %v5037_v55  ;;  %v5042_v35 = vadd.f32 %v9299_v23, %v5003_v29  ;;  %v6406_v46 = vld [vmem:[%s6481_s8 + $0xc8] sm:$0xff]  ;;  %v6407_v29 = vld [vmem:[%s6481_s8 + $0xf0] sm:$0xff] }
 0xb01   : > { %5166 = vst.msk [vmem:[%s9355_s22 + $0xb0] sm:$0xff] %vm10429_vm9, %v5134_v60  ;;  %v5001_v11 = vmul.f32 %v9275_v8, %v4962_v45  ;;  %v4965_v62 = vadd.f32 %v9252_v42, %v4926_v61  ;;  %v4924_v41 = vadd.f32 %v4871_v15, %v4658_v20  ;;  %v6166_v26 = vpop.f32.mrf.mxu1  ;;  %v4662_v3 = vadd.f32 %v4621_v56, %v9378_v44 }
 0xb02   : > { %5164 = vst.msk [vmem:[%s9355_s22 + $0xa0] sm:$0xff] %vm10430_vm4, %v5132_v19  ;;  %v5135_v48 = vmax.f32 %v5103_v51, 0.0  ;;  %v5101_v37 = vadd.f32 %v6402_v16, %v5069_v34  ;;  %v5074_v22 = vmul.f32 0.25, %v5042_v35  ;;  %v4929_v9 = vadd.f32 %v6166_v26, %v4663_v28  ;;  %v6408_v19 = vld [vmem:[%s6481_s8 + $0xe0] sm:$0xff] }
 0xb03   : > { %v5040_v24 = vadd.f32 %v9299_v23, %v5001_v11  ;;  %v5004_v43 = vmul.f32 %v9275_v8, %v4965_v62  ;;  %v4963_v4 = vadd.f32 %v9252_v42, %v4924_v41  ;;  %v4884_v32 = vpop.f32.mrf.mxu1  ;;  %v6410_v41 = vld [vmem:[%s6481_s8 + $0xe8] sm:$0xff] }
 0xb04   : > { %5167 = vst.msk [vmem:[%s9355_s22 + $0xb8] sm:$0xff] %vm10431_vm2, %v5135_v48  ;;  %v5133_v49 = vmax.f32 %v5101_v37, 0.0  ;;  %v5106_v54 = vadd.f32 %v6403_v47, %v5074_v22  ;;  %v4968_v38 = vadd.f32 %v9252_v42, %v4929_v9  ;;  %v4927_v6 = vadd.f32 %v4884_v32, %v4661_v17  ;;  %v6409_v17 = vld [vmem:[%s6481_s8 + $0xf8] sm:$0xff] }
 0xb05   : > { %v5072_v14 = vmul.f32 0.25, %v5040_v24  ;;  %v5043_v50 = vadd.f32 %v9299_v23, %v5004_v43  ;;  %v5002_v10 = vmul.f32 %v9275_v8, %v4963_v4  ;;  %v6167_v27 = vpop.f32.mrf.mxu1 }
 0xb06   : > { %5165 = vst.msk [vmem:[%s9355_s22 + $0xa8] sm:$0xff] %vm10432_vm14, %v5133_v49  ;;  %v5138_v57 = vmax.f32 %v5106_v54, 0.0  ;;  %v5007_v33 = vmul.f32 %v9275_v8, %v4968_v38  ;;  %v4966_v30 = vadd.f32 %v9252_v42, %v4927_v6  ;;  %v4930_v21 = vadd.f32 %v6167_v27, %v4664_v63 }
 0xb07   : > { %v5104_v39 = vadd.f32 %v6404_v52, %v5072_v14  ;;  %v5075_v0 = vmul.f32 0.25, %v5043_v50  ;;  %v5041_v44 = vadd.f32 %v9299_v23, %v5002_v10  ;;  %v4887_v58 = vpop.f32.mrf.mxu1 }
 0xb08   : > { %5170 = vst.msk [vmem:[%s9355_s22 + $0xd0] sm:$0xff] %vm10433_vm10, %v5138_v57  ;;  %v5046_v5 = vadd.f32 %v9299_v23, %v5007_v33  ;;  %v5005_v31 = vmul.f32 %v9275_v8, %v4966_v30  ;;  %v4969_v18 = vadd.f32 %v9252_v42, %v4930_v21  ;;  %v4928_v40 = vadd.f32 %v4887_v58, %v4662_v3 }
 0xb09   : > { %v5136_v20 = vmax.f32 %v5104_v39, 0.0  ;;  %v5107_v25 = vadd.f32 %v6405_v36, %v5075_v0  ;;  %v5073_v13 = vmul.f32 0.25, %v5041_v44 }
 0xb0a   : > { %v5078_v59 = vmul.f32 0.25, %v5046_v5  ;;  %v5044_v1 = vadd.f32 %v9299_v23, %v5005_v31  ;;  %v5008_v7 = vmul.f32 %v9275_v8, %v4969_v18  ;;  %v4967_v2 = vadd.f32 %v9252_v42, %v4928_v40 }
 0xb0b   : > { %5168 = vst.msk [vmem:[%s9355_s22 + $0xc0] sm:$0xff] %vm10434_vm8, %v5136_v20  ;;  %v5139_v12 = vmax.f32 %v5107_v25, 0.0  ;;  %v5105_v55 = vadd.f32 %v6406_v46, %v5073_v13 }
 0xb0c   : > { %v5110_v28 = vadd.f32 %v6407_v29, %v5078_v59  ;;  %v5076_v60 = vmul.f32 0.25, %v5044_v1  ;;  %v5047_v45 = vadd.f32 %v9299_v23, %v5008_v7  ;;  %v5006_v61 = vmul.f32 %v9275_v8, %v4967_v2 }
 0xb0d   : > { %5171 = vst.msk [vmem:[%s9355_s22 + $0xd8] sm:$0xff] %vm10435_vm15, %v5139_v12  ;;  %v5137_v42 = vmax.f32 %v5105_v55, 0.0 }
 0xb0e   : > { %v5142_v15 = vmax.f32 %v5110_v28, 0.0  ;;  %v5108_v53 = vadd.f32 %v6408_v19, %v5076_v60  ;;  %v5079_v51 = vmul.f32 0.25, %v5047_v45  ;;  %v5045_v34 = vadd.f32 %v9299_v23, %v5006_v61 }
 0xb0f   : > { %5169 = vst.msk [vmem:[%s9355_s22 + $0xc8] sm:$0xff] %vm10436_vm6, %v5137_v42 }
 0xb10   : > { %5174 = vst.msk [vmem:[%s9355_s22 + $0xf0] sm:$0xff] %vm10437_vm1, %v5142_v15  ;;  %v5140_v35 = vmax.f32 %v5108_v53, 0.0  ;;  %v5111_v11 = vadd.f32 %v6409_v17, %v5079_v51  ;;  %v5077_v8 = vmul.f32 0.25, %v5045_v34 }
 0xb12   : > { %5172 = vst.msk [vmem:[%s9355_s22 + $0xe0] sm:$0xff] %vm10438_vm3, %v5140_v35  ;;  %v5143_v62 = vmax.f32 %v5111_v11, 0.0  ;;  %v5109_v26 = vadd.f32 %v6410_v41, %v5077_v8 }
 0xb14   : > { %5175 = vst.msk [vmem:[%s9355_s22 + $0xf8] sm:$0xff] %vm10439_vm12, %v5143_v62  ;;  %v5141_v56 = vmax.f32 %v5109_v26, 0.0 }
 0xb16   : > { %5173 = vst.msk [vmem:[%s9355_s22 + $0xe8] sm:$0xff] %vm10440_vm5, %v5141_v56 }
 0xb17 PF: > { %s17_s24 = sadd.s32 1, %s6417_s24  }
 0xb18   : > { %p14_p4 = scmp.ge.s32.totalorder %s17_s24, 4  }
 0xb1a   :  { %16 = sbr.rel (!%p14_p4) target bundleno = 1 (0x1), region = 86 }

</bundles_post_ra>
